<compile_context>
chip_gen: v7x
topology: tpu7x:2x2x1
jax: 0.10.0
libtpu: 0.0.40
codegen_flags: <defaults>
</compile_context>

<pallas_src>
import jax
import jax.numpy as jnp
from jax.experimental import pallas as pl
from jax.experimental.pallas import tpu as pltpu

_BN_EPS = 1e-5
_MXU_DTYPE = jnp.bfloat16   # MXU operand dtype; accumulation + epilogue stay f32
_PAD = 2                    # border of the shared spatial scratch (max pad = 5x5 conv)


# --------------------------- parameters (pre-folded) ------------------------

def _conv_bn_params(key, kh, kw, cin, cout, use_bias):
    """Conv + eval-mode BatchNorm, folded for the kernel.

    Returns (w, shift):
      w     : [kh*kw, cin, cout] (or [cin, cout] for 1x1) bf16, BN scale folded
              in (w' = w * gamma / sqrt(var + eps)).
      shift : [1, cout] f32 bias (= beta + (conv_bias - mean) * scale).
    """
    ks = jax.random.split(key, 6)
    fan_in = kh * kw * cin
    w = jax.random.normal(ks[0], (kh, kw, cin, cout), jnp.float32) / jnp.sqrt(fan_in)
    b = (0.1 * jax.random.normal(ks[1], (cout,), jnp.float32)
         if use_bias else jnp.zeros((cout,), jnp.float32))
    gamma = 1.0 + 0.1 * jax.random.normal(ks[2], (cout,), jnp.float32)
    beta = 0.1 * jax.random.normal(ks[3], (cout,), jnp.float32)
    mean = 0.1 * jax.random.normal(ks[4], (cout,), jnp.float32)
    var = jnp.abs(1.0 + 0.1 * jax.random.normal(ks[5], (cout,), jnp.float32))
    scale = gamma / jnp.sqrt(var + _BN_EPS)
    shift = beta + (b - mean) * scale
    wf = (w * scale).reshape(kh * kw, cin, cout)     # fold BN scale into weights
    if kh * kw == 1:
        wf = wf.reshape(cin, cout)
    return wf.astype(_MXU_DTYPE), shift.reshape(1, cout).astype(jnp.float32)


def init_params(key, height, width, is_direct, num_players,
                inner_channels=32, restower_blocks=2):
    tot_area = height * width
    num_actions = tot_area if is_direct else width
    C, Cq, Ce = inner_channels, inner_channels // 4, inner_channels // 8
    keys = iter(jax.random.split(key, 8 + 3 * restower_blocks))
    p = {}
    p["block1"] = _conv_bn_params(next(keys), 5, 5, num_players, C, False)
    # TODO(synk): ResBlockBottleBias definition was not provided with the module;
    # assumed standard bottleneck: 1x1(C->C/4,bias)+BN+ReLU, 3x3(C/4->C/4,bias)+BN+ReLU,
    # 1x1(C/4->C,bias)+BN, long skip add, ReLU.
    p["res_blocks"] = [
        {"c1": _conv_bn_params(next(keys), 1, 1, C, Cq, True),
         "c2": _conv_bn_params(next(keys), 3, 3, Cq, Cq, True),
         "c3": _conv_bn_params(next(keys), 1, 1, Cq, C, True)}
        for _ in range(restower_blocks)
    ]
    p["tower_out"] = _conv_bn_params(next(keys), 3, 3, C, Cq, False)
    p["concat"] = _conv_bn_params(next(keys), 5, 5, Cq + num_players, Cq, False)
    p["pol1"] = _conv_bn_params(next(keys), 1, 1, Cq, Ce, False)
    p["pol2"] = _conv_bn_params(next(keys), 1, 1, Ce, 1, False)
    p["val1"] = _conv_bn_params(next(keys), 1, 1, Cq, 1, False)
    kf1, kf2, kf3, kf4 = jax.random.split(next(keys), 4)
    fc1_w = jax.random.normal(kf1, (tot_area, num_actions), jnp.float32) / jnp.sqrt(tot_area)
    fc2_w = jax.random.normal(kf3, (num_actions, 1), jnp.float32) / jnp.sqrt(num_actions)
    # FC weights stored pre-transposed ([out, in]) so the kernel keeps the
    # flattened value activation as a [HW, 1] column (no in-kernel transpose).
    p["fc1_w_t"] = fc1_w.T.astype(_MXU_DTYPE)                                          # [A, HW]
    p["fc1_b"] = (0.1 * jax.random.normal(kf2, (num_actions,), jnp.float32)).reshape(num_actions, 1)
    p["fc2_w_t"] = fc2_w.T.astype(_MXU_DTYPE)                                          # [1, A]
    p["fc2_b"] = (0.1 * jax.random.normal(kf4, (1,), jnp.float32)).reshape(1, 1)
    return p


def _flatten_params(p):
    flat = [p["block1"][0], p["block1"][1]]
    for blk in p["res_blocks"]:
        for name in ("c1", "c2", "c3"):
            flat += [blk[name][0], blk[name][1]]
    for name in ("tower_out", "concat", "pol1", "pol2", "val1"):
        flat += [p[name][0], p[name][1]]
    flat += [p["fc1_w_t"], p["fc1_b"], p["fc2_w_t"], p["fc2_b"]]
    return flat


# ------------------------------- fused kernel -------------------------------

def _make_fused_kernel(H, W, P, n_res, n_params):
    HW = H * W
    PB = _PAD

    def kernel(*refs):
        xp_ref = refs[0]
        wrefs = refs[1:1 + n_params]
        pol_ref = refs[1 + n_params]
        val_ref = refs[2 + n_params]
        pad_ref = refs[3 + n_params]
        it = iter(wrefs)

        def nxt():
            return next(it), next(it)

        # Shared spatial scratch: interior is rewritten before every use, the
        # border must stay zero ("same" padding) -> zero once per grid step.
        pad_ref[...] = jnp.zeros(pad_ref.shape, pad_ref.dtype)

        def dense(x, w_ref, b_ref, relu=True, residual=None):
            """1x1 conv / linear with folded BN: act(x @ w + shift [+ res])."""
            acc = jnp.dot(x.astype(_MXU_DTYPE), w_ref[...],
                          preferred_element_type=jnp.float32)
            acc = acc + b_ref[...]
            if residual is not None:
                acc = acc + residual
            return jnp.maximum(acc, 0.0) if relu else acc

        def conv(pieces, k, w_ref, b_ref, relu=True):
            """k x k same-padding conv = sum of k*k shifted MXU matmuls.

            `pieces` are [HW, ci] activations written into consecutive channel
            ranges of the padded scratch (channel concatenation is free).
            """
            coff = 0
            for xf in pieces:
                ci = xf.shape[-1]
                pad_ref[PB:PB + H, PB:PB + W, coff:coff + ci] = xf.reshape(H, W, ci)
                coff += ci
            cin = coff
            off = PB - k // 2
            cout = w_ref.shape[-1]
            acc = jnp.zeros((HW, cout), jnp.float32)
            for di in range(k):
                for dj in range(k):
                    sl = pad_ref[off + di:off + di + H, off + dj:off + dj + W, :cin]
                    sl = sl.reshape(HW, cin).astype(_MXU_DTYPE)
                    acc = acc + jnp.dot(sl, w_ref[di * k + dj],
                                        preferred_element_type=jnp.float32)
            acc = acc + b_ref[...]
            return jnp.maximum(acc, 0.0) if relu else acc

        xp = xp_ref[...].reshape(HW, P)          # player planes (empty channel already dropped)

        # block1: 5x5 conv -> folded BN -> ReLU
        w, b = nxt()
        h = conv([xp], 5, w, b)

        # residual tower: bottleneck blocks with a long skip inside each block
        for _ in range(n_res):
            w1, b1 = nxt(); w2, b2 = nxt(); w3, b3 = nxt()
            skip = h
            t = dense(h, w1, b1)
            t = conv([t], 3, w2, b2)
            h = dense(t, w3, b3, residual=skip)

        # tower tail: 3x3 conv C -> C/4
        w, b = nxt()
        h = conv([h], 3, w, b)

        # concat with the player planes + 5x5 conv
        w, b = nxt()
        feat = conv([h, xp], 5, w, b)

        # ---------------- policy head (fused softmax) ----------------
        wp1, bp1 = nxt()
        wp2, bp2 = nxt()
        p1 = dense(feat, wp1, bp1)                  # [HW, Ce]
        logits = dense(p1, wp2, bp2, relu=False)    # [HW, 1] column
        m = jnp.max(logits, axis=0, keepdims=True)
        e = jnp.exp(logits - m)
        pol_ref[...] = e / jnp.sum(e, axis=0, keepdims=True)

        # ---------------- value head (fused FC + tanh) ----------------
        wv1, bv1 = nxt()
        f1w, f1b = nxt()
        f2w, f2b = nxt()
        v = dense(feat, wv1, bv1)                   # [HW, 1] column
        h1 = jnp.dot(f1w[...], v.astype(_MXU_DTYPE),
                     preferred_element_type=jnp.float32) + f1b[...]
        h1 = jnp.maximum(h1, 0.0)                   # [A, 1]
        val = jnp.dot(f2w[...], h1.astype(_MXU_DTYPE),
                      preferred_element_type=jnp.float32) + f2b[...]
        val_ref[...] = jnp.tanh(val)                # [1, 1]

    return kernel


# --------------------------------- forward ----------------------------------

def conv_skip_nn_forward(params, x_nchw):
    """x_nchw: [N, num_players+1, H, W]; channel 0 (empty-space one-hot) is dropped."""
    N, ptot, H, W = x_nchw.shape
    P = ptot - 1
    HW = H * W
    xp = jnp.transpose(x_nchw[:, 1:], (0, 2, 3, 1)).astype(jnp.float32)   # tiny NHWC glue

    flat = _flatten_params(params)
    n_params = len(flat)
    n_res = len(params["res_blocks"])
    C = params["block1"][0].shape[-1]
    Cq = params["tower_out"][0].shape[-1]
    cmax = max(C, Cq + P)

    kernel = _make_fused_kernel(H, W, P, n_res, n_params)

    in_specs = [pl.BlockSpec((None, H, W, P), lambda n: (n, 0, 0, 0))]
    for a in flat:   # weights/biases: whole (tiny) arrays resident in VMEM, same block each step
        in_specs.append(pl.BlockSpec(a.shape, lambda n, _nd=a.ndim: (0,) * _nd))

    policy, value = pl.pallas_call(
        kernel,
        out_shape=(jax.ShapeDtypeStruct((N, HW, 1), jnp.float32),
                   jax.ShapeDtypeStruct((N, 1, 1), jnp.float32)),
        grid=(N,),                                    # one batch element per grid step
        in_specs=in_specs,
        out_specs=(pl.BlockSpec((None, HW, 1), lambda n: (n, 0, 0)),
                   pl.BlockSpec((None, 1, 1), lambda n: (n, 0, 0))),
        scratch_shapes=[pltpu.VMEM((H + 2 * _PAD, W + 2 * _PAD, cmax), jnp.float32)],
        compiler_params=pltpu.CompilerParams(
            # batch elements are independent -> megacore-shardable on v7x,
            # plain short sequential loop on v5e/v6e.
            dimension_semantics=("parallel",)),
    )(xp, *flat)

    return policy.reshape(N, HW), value.reshape(N, 1)


# ---------------------------------- driver -----------------------------------

if __name__ == "__main__":
    HEIGHT, WIDTH = 8, 8
    NUM_PLAYERS = 2
    IS_DIRECT = True
    INNER_CHANNELS = 32
    RESTOWER_BLOCKS = 2
    BATCH = 2

    key = jax.random.PRNGKey(0)
    kp, kx = jax.random.split(key)
    params = init_params(kp, HEIGHT, WIDTH, IS_DIRECT, NUM_PLAYERS,
                         inner_channels=INNER_CHANNELS,
                         restower_blocks=RESTOWER_BLOCKS)
    x = jax.random.uniform(kx, (BATCH, NUM_PLAYERS + 1, HEIGHT, WIDTH), jnp.float32)

    fwd = jax.jit(conv_skip_nn_forward)
    policy, value = fwd(params, x)
    jax.block_until_ready((policy, value))

    assert policy.shape == (BATCH, HEIGHT * WIDTH)
    assert value.shape == (BATCH, 1)
    assert bool(jnp.all(jnp.isfinite(policy))) and bool(jnp.all(jnp.isfinite(value)))
    assert bool(jnp.allclose(jnp.sum(policy, axis=1), 1.0, atol=1e-3))
    print("KERNEL_OK")
</pallas_src>

<mosaic_0001>
module attributes {stable_mosaic.version = 11 : i64} {
  func.func @kernel(%arg0: i32, %arg1: memref<1x8x8x2xf32, #tpu.memory_space<vmem>>, %arg2: memref<25x2x32xbf16, #tpu.memory_space<vmem>>, %arg3: memref<1x32xf32, #tpu.memory_space<vmem>>, %arg4: memref<32x8xbf16, #tpu.memory_space<vmem>>, %arg5: memref<1x8xf32, #tpu.memory_space<vmem>>, %arg6: memref<9x8x8xbf16, #tpu.memory_space<vmem>>, %arg7: memref<1x8xf32, #tpu.memory_space<vmem>>, %arg8: memref<8x32xbf16, #tpu.memory_space<vmem>>, %arg9: memref<1x32xf32, #tpu.memory_space<vmem>>, %arg10: memref<32x8xbf16, #tpu.memory_space<vmem>>, %arg11: memref<1x8xf32, #tpu.memory_space<vmem>>, %arg12: memref<9x8x8xbf16, #tpu.memory_space<vmem>>, %arg13: memref<1x8xf32, #tpu.memory_space<vmem>>, %arg14: memref<8x32xbf16, #tpu.memory_space<vmem>>, %arg15: memref<1x32xf32, #tpu.memory_space<vmem>>, %arg16: memref<9x32x8xbf16, #tpu.memory_space<vmem>>, %arg17: memref<1x8xf32, #tpu.memory_space<vmem>>, %arg18: memref<25x10x8xbf16, #tpu.memory_space<vmem>>, %arg19: memref<1x8xf32, #tpu.memory_space<vmem>>, %arg20: memref<8x4xbf16, #tpu.memory_space<vmem>>, %arg21: memref<1x4xf32, #tpu.memory_space<vmem>>, %arg22: memref<4x1xbf16, #tpu.memory_space<vmem>>, %arg23: memref<1x1xf32, #tpu.memory_space<vmem>>, %arg24: memref<8x1xbf16, #tpu.memory_space<vmem>>, %arg25: memref<1x1xf32, #tpu.memory_space<vmem>>, %arg26: memref<64x64xbf16, #tpu.memory_space<vmem>>, %arg27: memref<64x1xf32, #tpu.memory_space<vmem>>, %arg28: memref<1x64xbf16, #tpu.memory_space<vmem>>, %arg29: memref<1x1xf32, #tpu.memory_space<vmem>>, %arg30: memref<1x64x1xf32, #tpu.memory_space<vmem>>, %arg31: memref<1x1x1xf32, #tpu.memory_space<vmem>>, %arg32: memref<12x12x32xf32, #tpu.memory_space<vmem>>) attributes {dimension_semantics = [#tpu.dimension_semantics<parallel>], iteration_bounds = array<i64: 2>, scalar_prefetch = 0 : i64, scratch_operands = 1 : i64, tpu.core_type = #tpu.core_type<tc>, window_params = [{transform_indices = @transform_0, window_bounds = array<i64: 1, 8, 8, 2>}, {pipeline_mode = #tpu.pipeline_mode<synchronous>, transform_indices = @transform_1, window_bounds = array<i64: 25, 2, 32>}, {pipeline_mode = #tpu.pipeline_mode<synchronous>, transform_indices = @transform_2, window_bounds = array<i64: 1, 32>}, {pipeline_mode = #tpu.pipeline_mode<synchronous>, transform_indices = @transform_3, window_bounds = array<i64: 32, 8>}, {pipeline_mode = #tpu.pipeline_mode<synchronous>, transform_indices = @transform_4, window_bounds = array<i64: 1, 8>}, {pipeline_mode = #tpu.pipeline_mode<synchronous>, transform_indices = @transform_5, window_bounds = array<i64: 9, 8, 8>}, {pipeline_mode = #tpu.pipeline_mode<synchronous>, transform_indices = @transform_6, window_bounds = array<i64: 1, 8>}, {pipeline_mode = #tpu.pipeline_mode<synchronous>, transform_indices = @transform_7, window_bounds = array<i64: 8, 32>}, {pipeline_mode = #tpu.pipeline_mode<synchronous>, transform_indices = @transform_8, window_bounds = array<i64: 1, 32>}, {pipeline_mode = #tpu.pipeline_mode<synchronous>, transform_indices = @transform_9, window_bounds = array<i64: 32, 8>}, {pipeline_mode = #tpu.pipeline_mode<synchronous>, transform_indices = @transform_10, window_bounds = array<i64: 1, 8>}, {pipeline_mode = #tpu.pipeline_mode<synchronous>, transform_indices = @transform_11, window_bounds = array<i64: 9, 8, 8>}, {pipeline_mode = #tpu.pipeline_mode<synchronous>, transform_indices = @transform_12, window_bounds = array<i64: 1, 8>}, {pipeline_mode = #tpu.pipeline_mode<synchronous>, transform_indices = @transform_13, window_bounds = array<i64: 8, 32>}, {pipeline_mode = #tpu.pipeline_mode<synchronous>, transform_indices = @transform_14, window_bounds = array<i64: 1, 32>}, {pipeline_mode = #tpu.pipeline_mode<synchronous>, transform_indices = @transform_15, window_bounds = array<i64: 9, 32, 8>}, {pipeline_mode = #tpu.pipeline_mode<synchronous>, transform_indices = @transform_16, window_bounds = array<i64: 1, 8>}, {pipeline_mode = #tpu.pipeline_mode<synchronous>, transform_indices = @transform_17, window_bounds = array<i64: 25, 10, 8>}, {pipeline_mode = #tpu.pipeline_mode<synchronous>, transform_indices = @transform_18, window_bounds = array<i64: 1, 8>}, {pipeline_mode = #tpu.pipeline_mode<synchronous>, transform_indices = @transform_19, window_bounds = array<i64: 8, 4>}, {pipeline_mode = #tpu.pipeline_mode<synchronous>, transform_indices = @transform_20, window_bounds = array<i64: 1, 4>}, {pipeline_mode = #tpu.pipeline_mode<synchronous>, transform_indices = @transform_21, window_bounds = array<i64: 4, 1>}, {pipeline_mode = #tpu.pipeline_mode<synchronous>, transform_indices = @transform_22, window_bounds = array<i64: 1, 1>}, {pipeline_mode = #tpu.pipeline_mode<synchronous>, transform_indices = @transform_23, window_bounds = array<i64: 8, 1>}, {pipeline_mode = #tpu.pipeline_mode<synchronous>, transform_indices = @transform_24, window_bounds = array<i64: 1, 1>}, {pipeline_mode = #tpu.pipeline_mode<synchronous>, transform_indices = @transform_25, window_bounds = array<i64: 64, 64>}, {pipeline_mode = #tpu.pipeline_mode<synchronous>, transform_indices = @transform_26, window_bounds = array<i64: 64, 1>}, {pipeline_mode = #tpu.pipeline_mode<synchronous>, transform_indices = @transform_27, window_bounds = array<i64: 1, 64>}, {pipeline_mode = #tpu.pipeline_mode<synchronous>, transform_indices = @transform_28, window_bounds = array<i64: 1, 1>}, {transform_indices = @transform_29, window_bounds = array<i64: 1, 64, 1>}, {transform_indices = @transform_30, window_bounds = array<i64: 1, 1, 1>}]} {
    %cst = arith.constant 0.000000e+00 : f32
    %0 = vector.broadcast %cst : f32 to vector<12x12x32xf32>
    %c0 = arith.constant 0 : index
    %c0_0 = arith.constant 0 : index
    %c0_1 = arith.constant 0 : index
    %1 = vector.load %arg32[%c0, %c0_0, %c0_1] : memref<12x12x32xf32, #tpu.memory_space<vmem>>, vector<12x12x32xf32>
    tpu.vector_store %arg32[%c0, %c0_0, %c0_1], %0 {strides = array<i32>} : memref<12x12x32xf32, #tpu.memory_space<vmem>>, vector<12x12x32xf32>,
    %c0_2 = arith.constant 0 : index
    %c0_3 = arith.constant 0 : index
    %c0_4 = arith.constant 0 : index
    %c0_5 = arith.constant 0 : index
    %2 = vector.load %arg1[%c0_2, %c0_3, %c0_4, %c0_5] : memref<1x8x8x2xf32, #tpu.memory_space<vmem>>, vector<1x8x8x2xf32>
    %3 = vector.shape_cast %2 : vector<1x8x8x2xf32> to vector<8x8x2xf32>
    %4 = vector.shape_cast %3 : vector<8x8x2xf32> to vector<64x2xf32>
    %5 = vector.shape_cast %4 : vector<64x2xf32> to vector<8x8x2xf32>
    %c2 = arith.constant 2 : index
    %c2_6 = arith.constant 2 : index
    %c0_7 = arith.constant 0 : index
    %6 = vector.load %arg32[%c2, %c2_6, %c0_7] : memref<12x12x32xf32, #tpu.memory_space<vmem>>, vector<8x8x2xf32>
    tpu.vector_store %arg32[%c2, %c2_6, %c0_7], %5 {strides = array<i32>} : memref<12x12x32xf32, #tpu.memory_space<vmem>>, vector<8x8x2xf32>,
    %cst_8 = arith.constant 0.000000e+00 : f32
    %7 = vector.broadcast %cst_8 : f32 to vector<64x32xf32>
    %c0_9 = arith.constant 0 : index
    %c0_10 = arith.constant 0 : index
    %c0_11 = arith.constant 0 : index
    %8 = vector.load %arg32[%c0_9, %c0_10, %c0_11] : memref<12x12x32xf32, #tpu.memory_space<vmem>>, vector<8x8x2xf32>
    %9 = vector.shape_cast %8 : vector<8x8x2xf32> to vector<64x2xf32>
    %10 = arith.truncf %9 : vector<64x2xf32> to vector<64x2xbf16>
    %c0_12 = arith.constant 0 : index
    %c0_13 = arith.constant 0 : index
    %c0_14 = arith.constant 0 : index
    %11 = vector.load %arg2[%c0_12, %c0_13, %c0_14] : memref<25x2x32xbf16, #tpu.memory_space<vmem>>, vector<1x2x32xbf16>
    %12 = vector.shape_cast %11 : vector<1x2x32xbf16> to vector<2x32xbf16>
    %cst_15 = arith.constant dense<0.000000e+00> : vector<64x32xf32>
    %13 = tpu.matmul %10, %12, %cst_15 {dimension_numbers = #tpu.dot_dimension_numbers<[1], [0], [0], [1], [0, 0, 1, 1], [], []>} : vector<64x2xbf16>, vector<2x32xbf16>, vector<64x32xf32> -> vector<64x32xf32>
    %14 = arith.addf %7, %13 : vector<64x32xf32>
    %c0_16 = arith.constant 0 : index
    %c1 = arith.constant 1 : index
    %c0_17 = arith.constant 0 : index
    %15 = vector.load %arg32[%c0_16, %c1, %c0_17] : memref<12x12x32xf32, #tpu.memory_space<vmem>>, vector<8x8x2xf32>
    %16 = vector.shape_cast %15 : vector<8x8x2xf32> to vector<64x2xf32>
    %17 = arith.truncf %16 : vector<64x2xf32> to vector<64x2xbf16>
    %c1_18 = arith.constant 1 : index
    %c0_19 = arith.constant 0 : index
    %c0_20 = arith.constant 0 : index
    %18 = vector.load %arg2[%c1_18, %c0_19, %c0_20] : memref<25x2x32xbf16, #tpu.memory_space<vmem>>, vector<1x2x32xbf16>
    %19 = vector.shape_cast %18 : vector<1x2x32xbf16> to vector<2x32xbf16>
    %cst_21 = arith.constant dense<0.000000e+00> : vector<64x32xf32>
    %20 = tpu.matmul %17, %19, %cst_21 {dimension_numbers = #tpu.dot_dimension_numbers<[1], [0], [0], [1], [0, 0, 1, 1], [], []>} : vector<64x2xbf16>, vector<2x32xbf16>, vector<64x32xf32> -> vector<64x32xf32>
    %21 = arith.addf %14, %20 : vector<64x32xf32>
    %c0_22 = arith.constant 0 : index
    %c2_23 = arith.constant 2 : index
    %c0_24 = arith.constant 0 : index
    %22 = vector.load %arg32[%c0_22, %c2_23, %c0_24] : memref<12x12x32xf32, #tpu.memory_space<vmem>>, vector<8x8x2xf32>
    %23 = vector.shape_cast %22 : vector<8x8x2xf32> to vector<64x2xf32>
    %24 = arith.truncf %23 : vector<64x2xf32> to vector<64x2xbf16>
    %c2_25 = arith.constant 2 : index
    %c0_26 = arith.constant 0 : index
    %c0_27 = arith.constant 0 : index
    %25 = vector.load %arg2[%c2_25, %c0_26, %c0_27] : memref<25x2x32xbf16, #tpu.memory_space<vmem>>, vector<1x2x32xbf16>
    %26 = vector.shape_cast %25 : vector<1x2x32xbf16> to vector<2x32xbf16>
    %cst_28 = arith.constant dense<0.000000e+00> : vector<64x32xf32>
    %27 = tpu.matmul %24, %26, %cst_28 {dimension_numbers = #tpu.dot_dimension_numbers<[1], [0], [0], [1], [0, 0, 1, 1], [], []>} : vector<64x2xbf16>, vector<2x32xbf16>, vector<64x32xf32> -> vector<64x32xf32>
    %28 = arith.addf %21, %27 : vector<64x32xf32>
    %c0_29 = arith.constant 0 : index
    %c3 = arith.constant 3 : index
    %c0_30 = arith.constant 0 : index
    %29 = vector.load %arg32[%c0_29, %c3, %c0_30] : memref<12x12x32xf32, #tpu.memory_space<vmem>>, vector<8x8x2xf32>
    %30 = vector.shape_cast %29 : vector<8x8x2xf32> to vector<64x2xf32>
    %31 = arith.truncf %30 : vector<64x2xf32> to vector<64x2xbf16>
    %c3_31 = arith.constant 3 : index
    %c0_32 = arith.constant 0 : index
    %c0_33 = arith.constant 0 : index
    %32 = vector.load %arg2[%c3_31, %c0_32, %c0_33] : memref<25x2x32xbf16, #tpu.memory_space<vmem>>, vector<1x2x32xbf16>
    %33 = vector.shape_cast %32 : vector<1x2x32xbf16> to vector<2x32xbf16>
    %cst_34 = arith.constant dense<0.000000e+00> : vector<64x32xf32>
    %34 = tpu.matmul %31, %33, %cst_34 {dimension_numbers = #tpu.dot_dimension_numbers<[1], [0], [0], [1], [0, 0, 1, 1], [], []>} : vector<64x2xbf16>, vector<2x32xbf16>, vector<64x32xf32> -> vector<64x32xf32>
    %35 = arith.addf %28, %34 : vector<64x32xf32>
    %c0_35 = arith.constant 0 : index
    %c4 = arith.constant 4 : index
    %c0_36 = arith.constant 0 : index
    %36 = vector.load %arg32[%c0_35, %c4, %c0_36] : memref<12x12x32xf32, #tpu.memory_space<vmem>>, vector<8x8x2xf32>
    %37 = vector.shape_cast %36 : vector<8x8x2xf32> to vector<64x2xf32>
    %38 = arith.truncf %37 : vector<64x2xf32> to vector<64x2xbf16>
    %c4_37 = arith.constant 4 : index
    %c0_38 = arith.constant 0 : index
    %c0_39 = arith.constant 0 : index
    %39 = vector.load %arg2[%c4_37, %c0_38, %c0_39] : memref<25x2x32xbf16, #tpu.memory_space<vmem>>, vector<1x2x32xbf16>
    %40 = vector.shape_cast %39 : vector<1x2x32xbf16> to vector<2x32xbf16>
    %cst_40 = arith.constant dense<0.000000e+00> : vector<64x32xf32>
    %41 = tpu.matmul %38, %40, %cst_40 {dimension_numbers = #tpu.dot_dimension_numbers<[1], [0], [0], [1], [0, 0, 1, 1], [], []>} : vector<64x2xbf16>, vector<2x32xbf16>, vector<64x32xf32> -> vector<64x32xf32>
    %42 = arith.addf %35, %41 : vector<64x32xf32>
    %c1_41 = arith.constant 1 : index
    %c0_42 = arith.constant 0 : index
    %c0_43 = arith.constant 0 : index
    %43 = vector.load %arg32[%c1_41, %c0_42, %c0_43] : memref<12x12x32xf32, #tpu.memory_space<vmem>>, vector<8x8x2xf32>
    %44 = vector.shape_cast %43 : vector<8x8x2xf32> to vector<64x2xf32>
    %45 = arith.truncf %44 : vector<64x2xf32> to vector<64x2xbf16>
    %c5 = arith.constant 5 : index
    %c0_44 = arith.constant 0 : index
    %c0_45 = arith.constant 0 : index
    %46 = vector.load %arg2[%c5, %c0_44, %c0_45] : memref<25x2x32xbf16, #tpu.memory_space<vmem>>, vector<1x2x32xbf16>
    %47 = vector.shape_cast %46 : vector<1x2x32xbf16> to vector<2x32xbf16>
    %cst_46 = arith.constant dense<0.000000e+00> : vector<64x32xf32>
    %48 = tpu.matmul %45, %47, %cst_46 {dimension_numbers = #tpu.dot_dimension_numbers<[1], [0], [0], [1], [0, 0, 1, 1], [], []>} : vector<64x2xbf16>, vector<2x32xbf16>, vector<64x32xf32> -> vector<64x32xf32>
    %49 = arith.addf %42, %48 : vector<64x32xf32>
    %c1_47 = arith.constant 1 : index
    %c1_48 = arith.constant 1 : index
    %c0_49 = arith.constant 0 : index
    %50 = vector.load %arg32[%c1_47, %c1_48, %c0_49] : memref<12x12x32xf32, #tpu.memory_space<vmem>>, vector<8x8x2xf32>
    %51 = vector.shape_cast %50 : vector<8x8x2xf32> to vector<64x2xf32>
    %52 = arith.truncf %51 : vector<64x2xf32> to vector<64x2xbf16>
    %c6 = arith.constant 6 : index
    %c0_50 = arith.constant 0 : index
    %c0_51 = arith.constant 0 : index
    %53 = vector.load %arg2[%c6, %c0_50, %c0_51] : memref<25x2x32xbf16, #tpu.memory_space<vmem>>, vector<1x2x32xbf16>
    %54 = vector.shape_cast %53 : vector<1x2x32xbf16> to vector<2x32xbf16>
    %cst_52 = arith.constant dense<0.000000e+00> : vector<64x32xf32>
    %55 = tpu.matmul %52, %54, %cst_52 {dimension_numbers = #tpu.dot_dimension_numbers<[1], [0], [0], [1], [0, 0, 1, 1], [], []>} : vector<64x2xbf16>, vector<2x32xbf16>, vector<64x32xf32> -> vector<64x32xf32>
    %56 = arith.addf %49, %55 : vector<64x32xf32>
    %c1_53 = arith.constant 1 : index
    %c2_54 = arith.constant 2 : index
    %c0_55 = arith.constant 0 : index
    %57 = vector.load %arg32[%c1_53, %c2_54, %c0_55] : memref<12x12x32xf32, #tpu.memory_space<vmem>>, vector<8x8x2xf32>
    %58 = vector.shape_cast %57 : vector<8x8x2xf32> to vector<64x2xf32>
    %59 = arith.truncf %58 : vector<64x2xf32> to vector<64x2xbf16>
    %c7 = arith.constant 7 : index
    %c0_56 = arith.constant 0 : index
    %c0_57 = arith.constant 0 : index
    %60 = vector.load %arg2[%c7, %c0_56, %c0_57] : memref<25x2x32xbf16, #tpu.memory_space<vmem>>, vector<1x2x32xbf16>
    %61 = vector.shape_cast %60 : vector<1x2x32xbf16> to vector<2x32xbf16>
    %cst_58 = arith.constant dense<0.000000e+00> : vector<64x32xf32>
    %62 = tpu.matmul %59, %61, %cst_58 {dimension_numbers = #tpu.dot_dimension_numbers<[1], [0], [0], [1], [0, 0, 1, 1], [], []>} : vector<64x2xbf16>, vector<2x32xbf16>, vector<64x32xf32> -> vector<64x32xf32>
    %63 = arith.addf %56, %62 : vector<64x32xf32>
    %c1_59 = arith.constant 1 : index
    %c3_60 = arith.constant 3 : index
    %c0_61 = arith.constant 0 : index
    %64 = vector.load %arg32[%c1_59, %c3_60, %c0_61] : memref<12x12x32xf32, #tpu.memory_space<vmem>>, vector<8x8x2xf32>
    %65 = vector.shape_cast %64 : vector<8x8x2xf32> to vector<64x2xf32>
    %66 = arith.truncf %65 : vector<64x2xf32> to vector<64x2xbf16>
    %c8 = arith.constant 8 : index
    %c0_62 = arith.constant 0 : index
    %c0_63 = arith.constant 0 : index
    %67 = vector.load %arg2[%c8, %c0_62, %c0_63] : memref<25x2x32xbf16, #tpu.memory_space<vmem>>, vector<1x2x32xbf16>
    %68 = vector.shape_cast %67 : vector<1x2x32xbf16> to vector<2x32xbf16>
    %cst_64 = arith.constant dense<0.000000e+00> : vector<64x32xf32>
    %69 = tpu.matmul %66, %68, %cst_64 {dimension_numbers = #tpu.dot_dimension_numbers<[1], [0], [0], [1], [0, 0, 1, 1], [], []>} : vector<64x2xbf16>, vector<2x32xbf16>, vector<64x32xf32> -> vector<64x32xf32>
    %70 = arith.addf %63, %69 : vector<64x32xf32>
    %c1_65 = arith.constant 1 : index
    %c4_66 = arith.constant 4 : index
    %c0_67 = arith.constant 0 : index
    %71 = vector.load %arg32[%c1_65, %c4_66, %c0_67] : memref<12x12x32xf32, #tpu.memory_space<vmem>>, vector<8x8x2xf32>
    %72 = vector.shape_cast %71 : vector<8x8x2xf32> to vector<64x2xf32>
    %73 = arith.truncf %72 : vector<64x2xf32> to vector<64x2xbf16>
    %c9 = arith.constant 9 : index
    %c0_68 = arith.constant 0 : index
    %c0_69 = arith.constant 0 : index
    %74 = vector.load %arg2[%c9, %c0_68, %c0_69] : memref<25x2x32xbf16, #tpu.memory_space<vmem>>, vector<1x2x32xbf16>
    %75 = vector.shape_cast %74 : vector<1x2x32xbf16> to vector<2x32xbf16>
    %cst_70 = arith.constant dense<0.000000e+00> : vector<64x32xf32>
    %76 = tpu.matmul %73, %75, %cst_70 {dimension_numbers = #tpu.dot_dimension_numbers<[1], [0], [0], [1], [0, 0, 1, 1], [], []>} : vector<64x2xbf16>, vector<2x32xbf16>, vector<64x32xf32> -> vector<64x32xf32>
    %77 = arith.addf %70, %76 : vector<64x32xf32>
    %c2_71 = arith.constant 2 : index
    %c0_72 = arith.constant 0 : index
    %c0_73 = arith.constant 0 : index
    %78 = vector.load %arg32[%c2_71, %c0_72, %c0_73] : memref<12x12x32xf32, #tpu.memory_space<vmem>>, vector<8x8x2xf32>
    %79 = vector.shape_cast %78 : vector<8x8x2xf32> to vector<64x2xf32>
    %80 = arith.truncf %79 : vector<64x2xf32> to vector<64x2xbf16>
    %c10 = arith.constant 10 : index
    %c0_74 = arith.constant 0 : index
    %c0_75 = arith.constant 0 : index
    %81 = vector.load %arg2[%c10, %c0_74, %c0_75] : memref<25x2x32xbf16, #tpu.memory_space<vmem>>, vector<1x2x32xbf16>
    %82 = vector.shape_cast %81 : vector<1x2x32xbf16> to vector<2x32xbf16>
    %cst_76 = arith.constant dense<0.000000e+00> : vector<64x32xf32>
    %83 = tpu.matmul %80, %82, %cst_76 {dimension_numbers = #tpu.dot_dimension_numbers<[1], [0], [0], [1], [0, 0, 1, 1], [], []>} : vector<64x2xbf16>, vector<2x32xbf16>, vector<64x32xf32> -> vector<64x32xf32>
    %84 = arith.addf %77, %83 : vector<64x32xf32>
    %c2_77 = arith.constant 2 : index
    %c1_78 = arith.constant 1 : index
    %c0_79 = arith.constant 0 : index
    %85 = vector.load %arg32[%c2_77, %c1_78, %c0_79] : memref<12x12x32xf32, #tpu.memory_space<vmem>>, vector<8x8x2xf32>
    %86 = vector.shape_cast %85 : vector<8x8x2xf32> to vector<64x2xf32>
    %87 = arith.truncf %86 : vector<64x2xf32> to vector<64x2xbf16>
    %c11 = arith.constant 11 : index
    %c0_80 = arith.constant 0 : index
    %c0_81 = arith.constant 0 : index
    %88 = vector.load %arg2[%c11, %c0_80, %c0_81] : memref<25x2x32xbf16, #tpu.memory_space<vmem>>, vector<1x2x32xbf16>
    %89 = vector.shape_cast %88 : vector<1x2x32xbf16> to vector<2x32xbf16>
    %cst_82 = arith.constant dense<0.000000e+00> : vector<64x32xf32>
    %90 = tpu.matmul %87, %89, %cst_82 {dimension_numbers = #tpu.dot_dimension_numbers<[1], [0], [0], [1], [0, 0, 1, 1], [], []>} : vector<64x2xbf16>, vector<2x32xbf16>, vector<64x32xf32> -> vector<64x32xf32>
    %91 = arith.addf %84, %90 : vector<64x32xf32>
    %c2_83 = arith.constant 2 : index
    %c2_84 = arith.constant 2 : index
    %c0_85 = arith.constant 0 : index
    %92 = vector.load %arg32[%c2_83, %c2_84, %c0_85] : memref<12x12x32xf32, #tpu.memory_space<vmem>>, vector<8x8x2xf32>
    %93 = vector.shape_cast %92 : vector<8x8x2xf32> to vector<64x2xf32>
    %94 = arith.truncf %93 : vector<64x2xf32> to vector<64x2xbf16>
    %c12 = arith.constant 12 : index
    %c0_86 = arith.constant 0 : index
    %c0_87 = arith.constant 0 : index
    %95 = vector.load %arg2[%c12, %c0_86, %c0_87] : memref<25x2x32xbf16, #tpu.memory_space<vmem>>, vector<1x2x32xbf16>
    %96 = vector.shape_cast %95 : vector<1x2x32xbf16> to vector<2x32xbf16>
    %cst_88 = arith.constant dense<0.000000e+00> : vector<64x32xf32>
    %97 = tpu.matmul %94, %96, %cst_88 {dimension_numbers = #tpu.dot_dimension_numbers<[1], [0], [0], [1], [0, 0, 1, 1], [], []>} : vector<64x2xbf16>, vector<2x32xbf16>, vector<64x32xf32> -> vector<64x32xf32>
    %98 = arith.addf %91, %97 : vector<64x32xf32>
    %c2_89 = arith.constant 2 : index
    %c3_90 = arith.constant 3 : index
    %c0_91 = arith.constant 0 : index
    %99 = vector.load %arg32[%c2_89, %c3_90, %c0_91] : memref<12x12x32xf32, #tpu.memory_space<vmem>>, vector<8x8x2xf32>
    %100 = vector.shape_cast %99 : vector<8x8x2xf32> to vector<64x2xf32>
    %101 = arith.truncf %100 : vector<64x2xf32> to vector<64x2xbf16>
    %c13 = arith.constant 13 : index
    %c0_92 = arith.constant 0 : index
    %c0_93 = arith.constant 0 : index
    %102 = vector.load %arg2[%c13, %c0_92, %c0_93] : memref<25x2x32xbf16, #tpu.memory_space<vmem>>, vector<1x2x32xbf16>
    %103 = vector.shape_cast %102 : vector<1x2x32xbf16> to vector<2x32xbf16>
    %cst_94 = arith.constant dense<0.000000e+00> : vector<64x32xf32>
    %104 = tpu.matmul %101, %103, %cst_94 {dimension_numbers = #tpu.dot_dimension_numbers<[1], [0], [0], [1], [0, 0, 1, 1], [], []>} : vector<64x2xbf16>, vector<2x32xbf16>, vector<64x32xf32> -> vector<64x32xf32>
    %105 = arith.addf %98, %104 : vector<64x32xf32>
    %c2_95 = arith.constant 2 : index
    %c4_96 = arith.constant 4 : index
    %c0_97 = arith.constant 0 : index
    %106 = vector.load %arg32[%c2_95, %c4_96, %c0_97] : memref<12x12x32xf32, #tpu.memory_space<vmem>>, vector<8x8x2xf32>
    %107 = vector.shape_cast %106 : vector<8x8x2xf32> to vector<64x2xf32>
    %108 = arith.truncf %107 : vector<64x2xf32> to vector<64x2xbf16>
    %c14 = arith.constant 14 : index
    %c0_98 = arith.constant 0 : index
    %c0_99 = arith.constant 0 : index
    %109 = vector.load %arg2[%c14, %c0_98, %c0_99] : memref<25x2x32xbf16, #tpu.memory_space<vmem>>, vector<1x2x32xbf16>
    %110 = vector.shape_cast %109 : vector<1x2x32xbf16> to vector<2x32xbf16>
    %cst_100 = arith.constant dense<0.000000e+00> : vector<64x32xf32>
    %111 = tpu.matmul %108, %110, %cst_100 {dimension_numbers = #tpu.dot_dimension_numbers<[1], [0], [0], [1], [0, 0, 1, 1], [], []>} : vector<64x2xbf16>, vector<2x32xbf16>, vector<64x32xf32> -> vector<64x32xf32>
    %112 = arith.addf %105, %111 : vector<64x32xf32>
    %c3_101 = arith.constant 3 : index
    %c0_102 = arith.constant 0 : index
    %c0_103 = arith.constant 0 : index
    %113 = vector.load %arg32[%c3_101, %c0_102, %c0_103] : memref<12x12x32xf32, #tpu.memory_space<vmem>>, vector<8x8x2xf32>
    %114 = vector.shape_cast %113 : vector<8x8x2xf32> to vector<64x2xf32>
    %115 = arith.truncf %114 : vector<64x2xf32> to vector<64x2xbf16>
    %c15 = arith.constant 15 : index
    %c0_104 = arith.constant 0 : index
    %c0_105 = arith.constant 0 : index
    %116 = vector.load %arg2[%c15, %c0_104, %c0_105] : memref<25x2x32xbf16, #tpu.memory_space<vmem>>, vector<1x2x32xbf16>
    %117 = vector.shape_cast %116 : vector<1x2x32xbf16> to vector<2x32xbf16>
    %cst_106 = arith.constant dense<0.000000e+00> : vector<64x32xf32>
    %118 = tpu.matmul %115, %117, %cst_106 {dimension_numbers = #tpu.dot_dimension_numbers<[1], [0], [0], [1], [0, 0, 1, 1], [], []>} : vector<64x2xbf16>, vector<2x32xbf16>, vector<64x32xf32> -> vector<64x32xf32>
    %119 = arith.addf %112, %118 : vector<64x32xf32>
    %c3_107 = arith.constant 3 : index
    %c1_108 = arith.constant 1 : index
    %c0_109 = arith.constant 0 : index
    %120 = vector.load %arg32[%c3_107, %c1_108, %c0_109] : memref<12x12x32xf32, #tpu.memory_space<vmem>>, vector<8x8x2xf32>
    %121 = vector.shape_cast %120 : vector<8x8x2xf32> to vector<64x2xf32>
    %122 = arith.truncf %121 : vector<64x2xf32> to vector<64x2xbf16>
    %c16 = arith.constant 16 : index
    %c0_110 = arith.constant 0 : index
    %c0_111 = arith.constant 0 : index
    %123 = vector.load %arg2[%c16, %c0_110, %c0_111] : memref<25x2x32xbf16, #tpu.memory_space<vmem>>, vector<1x2x32xbf16>
    %124 = vector.shape_cast %123 : vector<1x2x32xbf16> to vector<2x32xbf16>
    %cst_112 = arith.constant dense<0.000000e+00> : vector<64x32xf32>
    %125 = tpu.matmul %122, %124, %cst_112 {dimension_numbers = #tpu.dot_dimension_numbers<[1], [0], [0], [1], [0, 0, 1, 1], [], []>} : vector<64x2xbf16>, vector<2x32xbf16>, vector<64x32xf32> -> vector<64x32xf32>
    %126 = arith.addf %119, %125 : vector<64x32xf32>
    %c3_113 = arith.constant 3 : index
    %c2_114 = arith.constant 2 : index
    %c0_115 = arith.constant 0 : index
    %127 = vector.load %arg32[%c3_113, %c2_114, %c0_115] : memref<12x12x32xf32, #tpu.memory_space<vmem>>, vector<8x8x2xf32>
    %128 = vector.shape_cast %127 : vector<8x8x2xf32> to vector<64x2xf32>
    %129 = arith.truncf %128 : vector<64x2xf32> to vector<64x2xbf16>
    %c17 = arith.constant 17 : index
    %c0_116 = arith.constant 0 : index
    %c0_117 = arith.constant 0 : index
    %130 = vector.load %arg2[%c17, %c0_116, %c0_117] : memref<25x2x32xbf16, #tpu.memory_space<vmem>>, vector<1x2x32xbf16>
    %131 = vector.shape_cast %130 : vector<1x2x32xbf16> to vector<2x32xbf16>
    %cst_118 = arith.constant dense<0.000000e+00> : vector<64x32xf32>
    %132 = tpu.matmul %129, %131, %cst_118 {dimension_numbers = #tpu.dot_dimension_numbers<[1], [0], [0], [1], [0, 0, 1, 1], [], []>} : vector<64x2xbf16>, vector<2x32xbf16>, vector<64x32xf32> -> vector<64x32xf32>
    %133 = arith.addf %126, %132 : vector<64x32xf32>
    %c3_119 = arith.constant 3 : index
    %c3_120 = arith.constant 3 : index
    %c0_121 = arith.constant 0 : index
    %134 = vector.load %arg32[%c3_119, %c3_120, %c0_121] : memref<12x12x32xf32, #tpu.memory_space<vmem>>, vector<8x8x2xf32>
    %135 = vector.shape_cast %134 : vector<8x8x2xf32> to vector<64x2xf32>
    %136 = arith.truncf %135 : vector<64x2xf32> to vector<64x2xbf16>
    %c18 = arith.constant 18 : index
    %c0_122 = arith.constant 0 : index
    %c0_123 = arith.constant 0 : index
    %137 = vector.load %arg2[%c18, %c0_122, %c0_123] : memref<25x2x32xbf16, #tpu.memory_space<vmem>>, vector<1x2x32xbf16>
    %138 = vector.shape_cast %137 : vector<1x2x32xbf16> to vector<2x32xbf16>
    %cst_124 = arith.constant dense<0.000000e+00> : vector<64x32xf32>
    %139 = tpu.matmul %136, %138, %cst_124 {dimension_numbers = #tpu.dot_dimension_numbers<[1], [0], [0], [1], [0, 0, 1, 1], [], []>} : vector<64x2xbf16>, vector<2x32xbf16>, vector<64x32xf32> -> vector<64x32xf32>
    %140 = arith.addf %133, %139 : vector<64x32xf32>
    %c3_125 = arith.constant 3 : index
    %c4_126 = arith.constant 4 : index
    %c0_127 = arith.constant 0 : index
    %141 = vector.load %arg32[%c3_125, %c4_126, %c0_127] : memref<12x12x32xf32, #tpu.memory_space<vmem>>, vector<8x8x2xf32>
    %142 = vector.shape_cast %141 : vector<8x8x2xf32> to vector<64x2xf32>
    %143 = arith.truncf %142 : vector<64x2xf32> to vector<64x2xbf16>
    %c19 = arith.constant 19 : index
    %c0_128 = arith.constant 0 : index
    %c0_129 = arith.constant 0 : index
    %144 = vector.load %arg2[%c19, %c0_128, %c0_129] : memref<25x2x32xbf16, #tpu.memory_space<vmem>>, vector<1x2x32xbf16>
    %145 = vector.shape_cast %144 : vector<1x2x32xbf16> to vector<2x32xbf16>
    %cst_130 = arith.constant dense<0.000000e+00> : vector<64x32xf32>
    %146 = tpu.matmul %143, %145, %cst_130 {dimension_numbers = #tpu.dot_dimension_numbers<[1], [0], [0], [1], [0, 0, 1, 1], [], []>} : vector<64x2xbf16>, vector<2x32xbf16>, vector<64x32xf32> -> vector<64x32xf32>
    %147 = arith.addf %140, %146 : vector<64x32xf32>
    %c4_131 = arith.constant 4 : index
    %c0_132 = arith.constant 0 : index
    %c0_133 = arith.constant 0 : index
    %148 = vector.load %arg32[%c4_131, %c0_132, %c0_133] : memref<12x12x32xf32, #tpu.memory_space<vmem>>, vector<8x8x2xf32>
    %149 = vector.shape_cast %148 : vector<8x8x2xf32> to vector<64x2xf32>
    %150 = arith.truncf %149 : vector<64x2xf32> to vector<64x2xbf16>
    %c20 = arith.constant 20 : index
    %c0_134 = arith.constant 0 : index
    %c0_135 = arith.constant 0 : index
    %151 = vector.load %arg2[%c20, %c0_134, %c0_135] : memref<25x2x32xbf16, #tpu.memory_space<vmem>>, vector<1x2x32xbf16>
    %152 = vector.shape_cast %151 : vector<1x2x32xbf16> to vector<2x32xbf16>
    %cst_136 = arith.constant dense<0.000000e+00> : vector<64x32xf32>
    %153 = tpu.matmul %150, %152, %cst_136 {dimension_numbers = #tpu.dot_dimension_numbers<[1], [0], [0], [1], [0, 0, 1, 1], [], []>} : vector<64x2xbf16>, vector<2x32xbf16>, vector<64x32xf32> -> vector<64x32xf32>
    %154 = arith.addf %147, %153 : vector<64x32xf32>
    %c4_137 = arith.constant 4 : index
    %c1_138 = arith.constant 1 : index
    %c0_139 = arith.constant 0 : index
    %155 = vector.load %arg32[%c4_137, %c1_138, %c0_139] : memref<12x12x32xf32, #tpu.memory_space<vmem>>, vector<8x8x2xf32>
    %156 = vector.shape_cast %155 : vector<8x8x2xf32> to vector<64x2xf32>
    %157 = arith.truncf %156 : vector<64x2xf32> to vector<64x2xbf16>
    %c21 = arith.constant 21 : index
    %c0_140 = arith.constant 0 : index
    %c0_141 = arith.constant 0 : index
    %158 = vector.load %arg2[%c21, %c0_140, %c0_141] : memref<25x2x32xbf16, #tpu.memory_space<vmem>>, vector<1x2x32xbf16>
    %159 = vector.shape_cast %158 : vector<1x2x32xbf16> to vector<2x32xbf16>
    %cst_142 = arith.constant dense<0.000000e+00> : vector<64x32xf32>
    %160 = tpu.matmul %157, %159, %cst_142 {dimension_numbers = #tpu.dot_dimension_numbers<[1], [0], [0], [1], [0, 0, 1, 1], [], []>} : vector<64x2xbf16>, vector<2x32xbf16>, vector<64x32xf32> -> vector<64x32xf32>
    %161 = arith.addf %154, %160 : vector<64x32xf32>
    %c4_143 = arith.constant 4 : index
    %c2_144 = arith.constant 2 : index
    %c0_145 = arith.constant 0 : index
    %162 = vector.load %arg32[%c4_143, %c2_144, %c0_145] : memref<12x12x32xf32, #tpu.memory_space<vmem>>, vector<8x8x2xf32>
    %163 = vector.shape_cast %162 : vector<8x8x2xf32> to vector<64x2xf32>
    %164 = arith.truncf %163 : vector<64x2xf32> to vector<64x2xbf16>
    %c22 = arith.constant 22 : index
    %c0_146 = arith.constant 0 : index
    %c0_147 = arith.constant 0 : index
    %165 = vector.load %arg2[%c22, %c0_146, %c0_147] : memref<25x2x32xbf16, #tpu.memory_space<vmem>>, vector<1x2x32xbf16>
    %166 = vector.shape_cast %165 : vector<1x2x32xbf16> to vector<2x32xbf16>
    %cst_148 = arith.constant dense<0.000000e+00> : vector<64x32xf32>
    %167 = tpu.matmul %164, %166, %cst_148 {dimension_numbers = #tpu.dot_dimension_numbers<[1], [0], [0], [1], [0, 0, 1, 1], [], []>} : vector<64x2xbf16>, vector<2x32xbf16>, vector<64x32xf32> -> vector<64x32xf32>
    %168 = arith.addf %161, %167 : vector<64x32xf32>
    %c4_149 = arith.constant 4 : index
    %c3_150 = arith.constant 3 : index
    %c0_151 = arith.constant 0 : index
    %169 = vector.load %arg32[%c4_149, %c3_150, %c0_151] : memref<12x12x32xf32, #tpu.memory_space<vmem>>, vector<8x8x2xf32>
    %170 = vector.shape_cast %169 : vector<8x8x2xf32> to vector<64x2xf32>
    %171 = arith.truncf %170 : vector<64x2xf32> to vector<64x2xbf16>
    %c23 = arith.constant 23 : index
    %c0_152 = arith.constant 0 : index
    %c0_153 = arith.constant 0 : index
    %172 = vector.load %arg2[%c23, %c0_152, %c0_153] : memref<25x2x32xbf16, #tpu.memory_space<vmem>>, vector<1x2x32xbf16>
    %173 = vector.shape_cast %172 : vector<1x2x32xbf16> to vector<2x32xbf16>
    %cst_154 = arith.constant dense<0.000000e+00> : vector<64x32xf32>
    %174 = tpu.matmul %171, %173, %cst_154 {dimension_numbers = #tpu.dot_dimension_numbers<[1], [0], [0], [1], [0, 0, 1, 1], [], []>} : vector<64x2xbf16>, vector<2x32xbf16>, vector<64x32xf32> -> vector<64x32xf32>
    %175 = arith.addf %168, %174 : vector<64x32xf32>
    %c4_155 = arith.constant 4 : index
    %c4_156 = arith.constant 4 : index
    %c0_157 = arith.constant 0 : index
    %176 = vector.load %arg32[%c4_155, %c4_156, %c0_157] : memref<12x12x32xf32, #tpu.memory_space<vmem>>, vector<8x8x2xf32>
    %177 = vector.shape_cast %176 : vector<8x8x2xf32> to vector<64x2xf32>
    %178 = arith.truncf %177 : vector<64x2xf32> to vector<64x2xbf16>
    %c24 = arith.constant 24 : index
    %c0_158 = arith.constant 0 : index
    %c0_159 = arith.constant 0 : index
    %179 = vector.load %arg2[%c24, %c0_158, %c0_159] : memref<25x2x32xbf16, #tpu.memory_space<vmem>>, vector<1x2x32xbf16>
    %180 = vector.shape_cast %179 : vector<1x2x32xbf16> to vector<2x32xbf16>
    %cst_160 = arith.constant dense<0.000000e+00> : vector<64x32xf32>
    %181 = tpu.matmul %178, %180, %cst_160 {dimension_numbers = #tpu.dot_dimension_numbers<[1], [0], [0], [1], [0, 0, 1, 1], [], []>} : vector<64x2xbf16>, vector<2x32xbf16>, vector<64x32xf32> -> vector<64x32xf32>
    %182 = arith.addf %175, %181 : vector<64x32xf32>
    %c0_161 = arith.constant 0 : index
    %c0_162 = arith.constant 0 : index
    %183 = vector.load %arg3[%c0_161, %c0_162] : memref<1x32xf32, #tpu.memory_space<vmem>>, vector<1x32xf32>
    %184 = vector.broadcast %183 : vector<1x32xf32> to vector<64x32xf32>
    %185 = arith.addf %182, %184 : vector<64x32xf32>
    %cst_163 = arith.constant 0.000000e+00 : f32
    %186 = vector.broadcast %cst_163 : f32 to vector<64x32xf32>
    %187 = arith.maximumf %185, %186 : vector<64x32xf32>
    %188 = arith.truncf %187 : vector<64x32xf32> to vector<64x32xbf16>
    %c0_164 = arith.constant 0 : index
    %c0_165 = arith.constant 0 : index
    %189 = vector.load %arg4[%c0_164, %c0_165] : memref<32x8xbf16, #tpu.memory_space<vmem>>, vector<32x8xbf16>
    %cst_166 = arith.constant dense<0.000000e+00> : vector<64x8xf32>
    %190 = tpu.matmul %188, %189, %cst_166 {dimension_numbers = #tpu.dot_dimension_numbers<[1], [0], [0], [1], [0, 0, 1, 1], [], []>} : vector<64x32xbf16>, vector<32x8xbf16>, vector<64x8xf32> -> vector<64x8xf32>
    %c0_167 = arith.constant 0 : index
    %c0_168 = arith.constant 0 : index
    %191 = vector.load %arg5[%c0_167, %c0_168] : memref<1x8xf32, #tpu.memory_space<vmem>>, vector<1x8xf32>
    %192 = vector.broadcast %191 : vector<1x8xf32> to vector<64x8xf32>
    %193 = arith.addf %190, %192 : vector<64x8xf32>
    %cst_169 = arith.constant 0.000000e+00 : f32
    %194 = vector.broadcast %cst_169 : f32 to vector<64x8xf32>
    %195 = arith.maximumf %193, %194 : vector<64x8xf32>
    %196 = vector.shape_cast %195 : vector<64x8xf32> to vector<8x8x8xf32>
    %c2_170 = arith.constant 2 : index
    %c2_171 = arith.constant 2 : index
    %c0_172 = arith.constant 0 : index
    %197 = vector.load %arg32[%c2_170, %c2_171, %c0_172] : memref<12x12x32xf32, #tpu.memory_space<vmem>>, vector<8x8x8xf32>
    tpu.vector_store %arg32[%c2_170, %c2_171, %c0_172], %196 {strides = array<i32>} : memref<12x12x32xf32, #tpu.memory_space<vmem>>, vector<8x8x8xf32>,
    %cst_173 = arith.constant 0.000000e+00 : f32
    %198 = vector.broadcast %cst_173 : f32 to vector<64x8xf32>
    %c1_174 = arith.constant 1 : index
    %c1_175 = arith.constant 1 : index
    %c0_176 = arith.constant 0 : index
    %199 = vector.load %arg32[%c1_174, %c1_175, %c0_176] : memref<12x12x32xf32, #tpu.memory_space<vmem>>, vector<8x8x8xf32>
    %200 = vector.shape_cast %199 : vector<8x8x8xf32> to vector<64x8xf32>
    %201 = arith.truncf %200 : vector<64x8xf32> to vector<64x8xbf16>
    %c0_177 = arith.constant 0 : index
    %c0_178 = arith.constant 0 : index
    %c0_179 = arith.constant 0 : index
    %202 = vector.load %arg6[%c0_177, %c0_178, %c0_179] : memref<9x8x8xbf16, #tpu.memory_space<vmem>>, vector<1x8x8xbf16>
    %203 = vector.shape_cast %202 : vector<1x8x8xbf16> to vector<8x8xbf16>
    %cst_180 = arith.constant dense<0.000000e+00> : vector<64x8xf32>
    %204 = tpu.matmul %201, %203, %cst_180 {dimension_numbers = #tpu.dot_dimension_numbers<[1], [0], [0], [1], [0, 0, 1, 1], [], []>} : vector<64x8xbf16>, vector<8x8xbf16>, vector<64x8xf32> -> vector<64x8xf32>
    %205 = arith.addf %198, %204 : vector<64x8xf32>
    %c1_181 = arith.constant 1 : index
    %c2_182 = arith.constant 2 : index
    %c0_183 = arith.constant 0 : index
    %206 = vector.load %arg32[%c1_181, %c2_182, %c0_183] : memref<12x12x32xf32, #tpu.memory_space<vmem>>, vector<8x8x8xf32>
    %207 = vector.shape_cast %206 : vector<8x8x8xf32> to vector<64x8xf32>
    %208 = arith.truncf %207 : vector<64x8xf32> to vector<64x8xbf16>
    %c1_184 = arith.constant 1 : index
    %c0_185 = arith.constant 0 : index
    %c0_186 = arith.constant 0 : index
    %209 = vector.load %arg6[%c1_184, %c0_185, %c0_186] : memref<9x8x8xbf16, #tpu.memory_space<vmem>>, vector<1x8x8xbf16>
    %210 = vector.shape_cast %209 : vector<1x8x8xbf16> to vector<8x8xbf16>
    %cst_187 = arith.constant dense<0.000000e+00> : vector<64x8xf32>
    %211 = tpu.matmul %208, %210, %cst_187 {dimension_numbers = #tpu.dot_dimension_numbers<[1], [0], [0], [1], [0, 0, 1, 1], [], []>} : vector<64x8xbf16>, vector<8x8xbf16>, vector<64x8xf32> -> vector<64x8xf32>
    %212 = arith.addf %205, %211 : vector<64x8xf32>
    %c1_188 = arith.constant 1 : index
    %c3_189 = arith.constant 3 : index
    %c0_190 = arith.constant 0 : index
    %213 = vector.load %arg32[%c1_188, %c3_189, %c0_190] : memref<12x12x32xf32, #tpu.memory_space<vmem>>, vector<8x8x8xf32>
    %214 = vector.shape_cast %213 : vector<8x8x8xf32> to vector<64x8xf32>
    %215 = arith.truncf %214 : vector<64x8xf32> to vector<64x8xbf16>
    %c2_191 = arith.constant 2 : index
    %c0_192 = arith.constant 0 : index
    %c0_193 = arith.constant 0 : index
    %216 = vector.load %arg6[%c2_191, %c0_192, %c0_193] : memref<9x8x8xbf16, #tpu.memory_space<vmem>>, vector<1x8x8xbf16>
    %217 = vector.shape_cast %216 : vector<1x8x8xbf16> to vector<8x8xbf16>
    %cst_194 = arith.constant dense<0.000000e+00> : vector<64x8xf32>
    %218 = tpu.matmul %215, %217, %cst_194 {dimension_numbers = #tpu.dot_dimension_numbers<[1], [0], [0], [1], [0, 0, 1, 1], [], []>} : vector<64x8xbf16>, vector<8x8xbf16>, vector<64x8xf32> -> vector<64x8xf32>
    %219 = arith.addf %212, %218 : vector<64x8xf32>
    %c2_195 = arith.constant 2 : index
    %c1_196 = arith.constant 1 : index
    %c0_197 = arith.constant 0 : index
    %220 = vector.load %arg32[%c2_195, %c1_196, %c0_197] : memref<12x12x32xf32, #tpu.memory_space<vmem>>, vector<8x8x8xf32>
    %221 = vector.shape_cast %220 : vector<8x8x8xf32> to vector<64x8xf32>
    %222 = arith.truncf %221 : vector<64x8xf32> to vector<64x8xbf16>
    %c3_198 = arith.constant 3 : index
    %c0_199 = arith.constant 0 : index
    %c0_200 = arith.constant 0 : index
    %223 = vector.load %arg6[%c3_198, %c0_199, %c0_200] : memref<9x8x8xbf16, #tpu.memory_space<vmem>>, vector<1x8x8xbf16>
    %224 = vector.shape_cast %223 : vector<1x8x8xbf16> to vector<8x8xbf16>
    %cst_201 = arith.constant dense<0.000000e+00> : vector<64x8xf32>
    %225 = tpu.matmul %222, %224, %cst_201 {dimension_numbers = #tpu.dot_dimension_numbers<[1], [0], [0], [1], [0, 0, 1, 1], [], []>} : vector<64x8xbf16>, vector<8x8xbf16>, vector<64x8xf32> -> vector<64x8xf32>
    %226 = arith.addf %219, %225 : vector<64x8xf32>
    %c2_202 = arith.constant 2 : index
    %c2_203 = arith.constant 2 : index
    %c0_204 = arith.constant 0 : index
    %227 = vector.load %arg32[%c2_202, %c2_203, %c0_204] : memref<12x12x32xf32, #tpu.memory_space<vmem>>, vector<8x8x8xf32>
    %228 = vector.shape_cast %227 : vector<8x8x8xf32> to vector<64x8xf32>
    %229 = arith.truncf %228 : vector<64x8xf32> to vector<64x8xbf16>
    %c4_205 = arith.constant 4 : index
    %c0_206 = arith.constant 0 : index
    %c0_207 = arith.constant 0 : index
    %230 = vector.load %arg6[%c4_205, %c0_206, %c0_207] : memref<9x8x8xbf16, #tpu.memory_space<vmem>>, vector<1x8x8xbf16>
    %231 = vector.shape_cast %230 : vector<1x8x8xbf16> to vector<8x8xbf16>
    %cst_208 = arith.constant dense<0.000000e+00> : vector<64x8xf32>
    %232 = tpu.matmul %229, %231, %cst_208 {dimension_numbers = #tpu.dot_dimension_numbers<[1], [0], [0], [1], [0, 0, 1, 1], [], []>} : vector<64x8xbf16>, vector<8x8xbf16>, vector<64x8xf32> -> vector<64x8xf32>
    %233 = arith.addf %226, %232 : vector<64x8xf32>
    %c2_209 = arith.constant 2 : index
    %c3_210 = arith.constant 3 : index
    %c0_211 = arith.constant 0 : index
    %234 = vector.load %arg32[%c2_209, %c3_210, %c0_211] : memref<12x12x32xf32, #tpu.memory_space<vmem>>, vector<8x8x8xf32>
    %235 = vector.shape_cast %234 : vector<8x8x8xf32> to vector<64x8xf32>
    %236 = arith.truncf %235 : vector<64x8xf32> to vector<64x8xbf16>
    %c5_212 = arith.constant 5 : index
    %c0_213 = arith.constant 0 : index
    %c0_214 = arith.constant 0 : index
    %237 = vector.load %arg6[%c5_212, %c0_213, %c0_214] : memref<9x8x8xbf16, #tpu.memory_space<vmem>>, vector<1x8x8xbf16>
    %238 = vector.shape_cast %237 : vector<1x8x8xbf16> to vector<8x8xbf16>
    %cst_215 = arith.constant dense<0.000000e+00> : vector<64x8xf32>
    %239 = tpu.matmul %236, %238, %cst_215 {dimension_numbers = #tpu.dot_dimension_numbers<[1], [0], [0], [1], [0, 0, 1, 1], [], []>} : vector<64x8xbf16>, vector<8x8xbf16>, vector<64x8xf32> -> vector<64x8xf32>
    %240 = arith.addf %233, %239 : vector<64x8xf32>
    %c3_216 = arith.constant 3 : index
    %c1_217 = arith.constant 1 : index
    %c0_218 = arith.constant 0 : index
    %241 = vector.load %arg32[%c3_216, %c1_217, %c0_218] : memref<12x12x32xf32, #tpu.memory_space<vmem>>, vector<8x8x8xf32>
    %242 = vector.shape_cast %241 : vector<8x8x8xf32> to vector<64x8xf32>
    %243 = arith.truncf %242 : vector<64x8xf32> to vector<64x8xbf16>
    %c6_219 = arith.constant 6 : index
    %c0_220 = arith.constant 0 : index
    %c0_221 = arith.constant 0 : index
    %244 = vector.load %arg6[%c6_219, %c0_220, %c0_221] : memref<9x8x8xbf16, #tpu.memory_space<vmem>>, vector<1x8x8xbf16>
    %245 = vector.shape_cast %244 : vector<1x8x8xbf16> to vector<8x8xbf16>
    %cst_222 = arith.constant dense<0.000000e+00> : vector<64x8xf32>
    %246 = tpu.matmul %243, %245, %cst_222 {dimension_numbers = #tpu.dot_dimension_numbers<[1], [0], [0], [1], [0, 0, 1, 1], [], []>} : vector<64x8xbf16>, vector<8x8xbf16>, vector<64x8xf32> -> vector<64x8xf32>
    %247 = arith.addf %240, %246 : vector<64x8xf32>
    %c3_223 = arith.constant 3 : index
    %c2_224 = arith.constant 2 : index
    %c0_225 = arith.constant 0 : index
    %248 = vector.load %arg32[%c3_223, %c2_224, %c0_225] : memref<12x12x32xf32, #tpu.memory_space<vmem>>, vector<8x8x8xf32>
    %249 = vector.shape_cast %248 : vector<8x8x8xf32> to vector<64x8xf32>
    %250 = arith.truncf %249 : vector<64x8xf32> to vector<64x8xbf16>
    %c7_226 = arith.constant 7 : index
    %c0_227 = arith.constant 0 : index
    %c0_228 = arith.constant 0 : index
    %251 = vector.load %arg6[%c7_226, %c0_227, %c0_228] : memref<9x8x8xbf16, #tpu.memory_space<vmem>>, vector<1x8x8xbf16>
    %252 = vector.shape_cast %251 : vector<1x8x8xbf16> to vector<8x8xbf16>
    %cst_229 = arith.constant dense<0.000000e+00> : vector<64x8xf32>
    %253 = tpu.matmul %250, %252, %cst_229 {dimension_numbers = #tpu.dot_dimension_numbers<[1], [0], [0], [1], [0, 0, 1, 1], [], []>} : vector<64x8xbf16>, vector<8x8xbf16>, vector<64x8xf32> -> vector<64x8xf32>
    %254 = arith.addf %247, %253 : vector<64x8xf32>
    %c3_230 = arith.constant 3 : index
    %c3_231 = arith.constant 3 : index
    %c0_232 = arith.constant 0 : index
    %255 = vector.load %arg32[%c3_230, %c3_231, %c0_232] : memref<12x12x32xf32, #tpu.memory_space<vmem>>, vector<8x8x8xf32>
    %256 = vector.shape_cast %255 : vector<8x8x8xf32> to vector<64x8xf32>
    %257 = arith.truncf %256 : vector<64x8xf32> to vector<64x8xbf16>
    %c8_233 = arith.constant 8 : index
    %c0_234 = arith.constant 0 : index
    %c0_235 = arith.constant 0 : index
    %258 = vector.load %arg6[%c8_233, %c0_234, %c0_235] : memref<9x8x8xbf16, #tpu.memory_space<vmem>>, vector<1x8x8xbf16>
    %259 = vector.shape_cast %258 : vector<1x8x8xbf16> to vector<8x8xbf16>
    %cst_236 = arith.constant dense<0.000000e+00> : vector<64x8xf32>
    %260 = tpu.matmul %257, %259, %cst_236 {dimension_numbers = #tpu.dot_dimension_numbers<[1], [0], [0], [1], [0, 0, 1, 1], [], []>} : vector<64x8xbf16>, vector<8x8xbf16>, vector<64x8xf32> -> vector<64x8xf32>
    %261 = arith.addf %254, %260 : vector<64x8xf32>
    %c0_237 = arith.constant 0 : index
    %c0_238 = arith.constant 0 : index
    %262 = vector.load %arg7[%c0_237, %c0_238] : memref<1x8xf32, #tpu.memory_space<vmem>>, vector<1x8xf32>
    %263 = vector.broadcast %262 : vector<1x8xf32> to vector<64x8xf32>
    %264 = arith.addf %261, %263 : vector<64x8xf32>
    %cst_239 = arith.constant 0.000000e+00 : f32
    %265 = vector.broadcast %cst_239 : f32 to vector<64x8xf32>
    %266 = arith.maximumf %264, %265 : vector<64x8xf32>
    %267 = arith.truncf %266 : vector<64x8xf32> to vector<64x8xbf16>
    %c0_240 = arith.constant 0 : index
    %c0_241 = arith.constant 0 : index
    %268 = vector.load %arg8[%c0_240, %c0_241] : memref<8x32xbf16, #tpu.memory_space<vmem>>, vector<8x32xbf16>
    %cst_242 = arith.constant dense<0.000000e+00> : vector<64x32xf32>
    %269 = tpu.matmul %267, %268, %cst_242 {dimension_numbers = #tpu.dot_dimension_numbers<[1], [0], [0], [1], [0, 0, 1, 1], [], []>} : vector<64x8xbf16>, vector<8x32xbf16>, vector<64x32xf32> -> vector<64x32xf32>
    %c0_243 = arith.constant 0 : index
    %c0_244 = arith.constant 0 : index
    %270 = vector.load %arg9[%c0_243, %c0_244] : memref<1x32xf32, #tpu.memory_space<vmem>>, vector<1x32xf32>
    %271 = vector.broadcast %270 : vector<1x32xf32> to vector<64x32xf32>
    %272 = arith.addf %269, %271 : vector<64x32xf32>
    %273 = arith.addf %272, %187 : vector<64x32xf32>
    %cst_245 = arith.constant 0.000000e+00 : f32
    %274 = vector.broadcast %cst_245 : f32 to vector<64x32xf32>
    %275 = arith.maximumf %273, %274 : vector<64x32xf32>
    %276 = arith.truncf %275 : vector<64x32xf32> to vector<64x32xbf16>
    %c0_246 = arith.constant 0 : index
    %c0_247 = arith.constant 0 : index
    %277 = vector.load %arg10[%c0_246, %c0_247] : memref<32x8xbf16, #tpu.memory_space<vmem>>, vector<32x8xbf16>
    %cst_248 = arith.constant dense<0.000000e+00> : vector<64x8xf32>
    %278 = tpu.matmul %276, %277, %cst_248 {dimension_numbers = #tpu.dot_dimension_numbers<[1], [0], [0], [1], [0, 0, 1, 1], [], []>} : vector<64x32xbf16>, vector<32x8xbf16>, vector<64x8xf32> -> vector<64x8xf32>
    %c0_249 = arith.constant 0 : index
    %c0_250 = arith.constant 0 : index
    %279 = vector.load %arg11[%c0_249, %c0_250] : memref<1x8xf32, #tpu.memory_space<vmem>>, vector<1x8xf32>
    %280 = vector.broadcast %279 : vector<1x8xf32> to vector<64x8xf32>
    %281 = arith.addf %278, %280 : vector<64x8xf32>
    %cst_251 = arith.constant 0.000000e+00 : f32
    %282 = vector.broadcast %cst_251 : f32 to vector<64x8xf32>
    %283 = arith.maximumf %281, %282 : vector<64x8xf32>
    %284 = vector.shape_cast %283 : vector<64x8xf32> to vector<8x8x8xf32>
    %c2_252 = arith.constant 2 : index
    %c2_253 = arith.constant 2 : index
    %c0_254 = arith.constant 0 : index
    %285 = vector.load %arg32[%c2_252, %c2_253, %c0_254] : memref<12x12x32xf32, #tpu.memory_space<vmem>>, vector<8x8x8xf32>
    tpu.vector_store %arg32[%c2_252, %c2_253, %c0_254], %284 {strides = array<i32>} : memref<12x12x32xf32, #tpu.memory_space<vmem>>, vector<8x8x8xf32>,
    %cst_255 = arith.constant 0.000000e+00 : f32
    %286 = vector.broadcast %cst_255 : f32 to vector<64x8xf32>
    %c1_256 = arith.constant 1 : index
    %c1_257 = arith.constant 1 : index
    %c0_258 = arith.constant 0 : index
    %287 = vector.load %arg32[%c1_256, %c1_257, %c0_258] : memref<12x12x32xf32, #tpu.memory_space<vmem>>, vector<8x8x8xf32>
    %288 = vector.shape_cast %287 : vector<8x8x8xf32> to vector<64x8xf32>
    %289 = arith.truncf %288 : vector<64x8xf32> to vector<64x8xbf16>
    %c0_259 = arith.constant 0 : index
    %c0_260 = arith.constant 0 : index
    %c0_261 = arith.constant 0 : index
    %290 = vector.load %arg12[%c0_259, %c0_260, %c0_261] : memref<9x8x8xbf16, #tpu.memory_space<vmem>>, vector<1x8x8xbf16>
    %291 = vector.shape_cast %290 : vector<1x8x8xbf16> to vector<8x8xbf16>
    %cst_262 = arith.constant dense<0.000000e+00> : vector<64x8xf32>
    %292 = tpu.matmul %289, %291, %cst_262 {dimension_numbers = #tpu.dot_dimension_numbers<[1], [0], [0], [1], [0, 0, 1, 1], [], []>} : vector<64x8xbf16>, vector<8x8xbf16>, vector<64x8xf32> -> vector<64x8xf32>
    %293 = arith.addf %286, %292 : vector<64x8xf32>
    %c1_263 = arith.constant 1 : index
    %c2_264 = arith.constant 2 : index
    %c0_265 = arith.constant 0 : index
    %294 = vector.load %arg32[%c1_263, %c2_264, %c0_265] : memref<12x12x32xf32, #tpu.memory_space<vmem>>, vector<8x8x8xf32>
    %295 = vector.shape_cast %294 : vector<8x8x8xf32> to vector<64x8xf32>
    %296 = arith.truncf %295 : vector<64x8xf32> to vector<64x8xbf16>
    %c1_266 = arith.constant 1 : index
    %c0_267 = arith.constant 0 : index
    %c0_268 = arith.constant 0 : index
    %297 = vector.load %arg12[%c1_266, %c0_267, %c0_268] : memref<9x8x8xbf16, #tpu.memory_space<vmem>>, vector<1x8x8xbf16>
    %298 = vector.shape_cast %297 : vector<1x8x8xbf16> to vector<8x8xbf16>
    %cst_269 = arith.constant dense<0.000000e+00> : vector<64x8xf32>
    %299 = tpu.matmul %296, %298, %cst_269 {dimension_numbers = #tpu.dot_dimension_numbers<[1], [0], [0], [1], [0, 0, 1, 1], [], []>} : vector<64x8xbf16>, vector<8x8xbf16>, vector<64x8xf32> -> vector<64x8xf32>
    %300 = arith.addf %293, %299 : vector<64x8xf32>
    %c1_270 = arith.constant 1 : index
    %c3_271 = arith.constant 3 : index
    %c0_272 = arith.constant 0 : index
    %301 = vector.load %arg32[%c1_270, %c3_271, %c0_272] : memref<12x12x32xf32, #tpu.memory_space<vmem>>, vector<8x8x8xf32>
    %302 = vector.shape_cast %301 : vector<8x8x8xf32> to vector<64x8xf32>
    %303 = arith.truncf %302 : vector<64x8xf32> to vector<64x8xbf16>
    %c2_273 = arith.constant 2 : index
    %c0_274 = arith.constant 0 : index
    %c0_275 = arith.constant 0 : index
    %304 = vector.load %arg12[%c2_273, %c0_274, %c0_275] : memref<9x8x8xbf16, #tpu.memory_space<vmem>>, vector<1x8x8xbf16>
    %305 = vector.shape_cast %304 : vector<1x8x8xbf16> to vector<8x8xbf16>
    %cst_276 = arith.constant dense<0.000000e+00> : vector<64x8xf32>
    %306 = tpu.matmul %303, %305, %cst_276 {dimension_numbers = #tpu.dot_dimension_numbers<[1], [0], [0], [1], [0, 0, 1, 1], [], []>} : vector<64x8xbf16>, vector<8x8xbf16>, vector<64x8xf32> -> vector<64x8xf32>
    %307 = arith.addf %300, %306 : vector<64x8xf32>
    %c2_277 = arith.constant 2 : index
    %c1_278 = arith.constant 1 : index
    %c0_279 = arith.constant 0 : index
    %308 = vector.load %arg32[%c2_277, %c1_278, %c0_279] : memref<12x12x32xf32, #tpu.memory_space<vmem>>, vector<8x8x8xf32>
    %309 = vector.shape_cast %308 : vector<8x8x8xf32> to vector<64x8xf32>
    %310 = arith.truncf %309 : vector<64x8xf32> to vector<64x8xbf16>
    %c3_280 = arith.constant 3 : index
    %c0_281 = arith.constant 0 : index
    %c0_282 = arith.constant 0 : index
    %311 = vector.load %arg12[%c3_280, %c0_281, %c0_282] : memref<9x8x8xbf16, #tpu.memory_space<vmem>>, vector<1x8x8xbf16>
    %312 = vector.shape_cast %311 : vector<1x8x8xbf16> to vector<8x8xbf16>
    %cst_283 = arith.constant dense<0.000000e+00> : vector<64x8xf32>
    %313 = tpu.matmul %310, %312, %cst_283 {dimension_numbers = #tpu.dot_dimension_numbers<[1], [0], [0], [1], [0, 0, 1, 1], [], []>} : vector<64x8xbf16>, vector<8x8xbf16>, vector<64x8xf32> -> vector<64x8xf32>
    %314 = arith.addf %307, %313 : vector<64x8xf32>
    %c2_284 = arith.constant 2 : index
    %c2_285 = arith.constant 2 : index
    %c0_286 = arith.constant 0 : index
    %315 = vector.load %arg32[%c2_284, %c2_285, %c0_286] : memref<12x12x32xf32, #tpu.memory_space<vmem>>, vector<8x8x8xf32>
    %316 = vector.shape_cast %315 : vector<8x8x8xf32> to vector<64x8xf32>
    %317 = arith.truncf %316 : vector<64x8xf32> to vector<64x8xbf16>
    %c4_287 = arith.constant 4 : index
    %c0_288 = arith.constant 0 : index
    %c0_289 = arith.constant 0 : index
    %318 = vector.load %arg12[%c4_287, %c0_288, %c0_289] : memref<9x8x8xbf16, #tpu.memory_space<vmem>>, vector<1x8x8xbf16>
    %319 = vector.shape_cast %318 : vector<1x8x8xbf16> to vector<8x8xbf16>
    %cst_290 = arith.constant dense<0.000000e+00> : vector<64x8xf32>
    %320 = tpu.matmul %317, %319, %cst_290 {dimension_numbers = #tpu.dot_dimension_numbers<[1], [0], [0], [1], [0, 0, 1, 1], [], []>} : vector<64x8xbf16>, vector<8x8xbf16>, vector<64x8xf32> -> vector<64x8xf32>
    %321 = arith.addf %314, %320 : vector<64x8xf32>
    %c2_291 = arith.constant 2 : index
    %c3_292 = arith.constant 3 : index
    %c0_293 = arith.constant 0 : index
    %322 = vector.load %arg32[%c2_291, %c3_292, %c0_293] : memref<12x12x32xf32, #tpu.memory_space<vmem>>, vector<8x8x8xf32>
    %323 = vector.shape_cast %322 : vector<8x8x8xf32> to vector<64x8xf32>
    %324 = arith.truncf %323 : vector<64x8xf32> to vector<64x8xbf16>
    %c5_294 = arith.constant 5 : index
    %c0_295 = arith.constant 0 : index
    %c0_296 = arith.constant 0 : index
    %325 = vector.load %arg12[%c5_294, %c0_295, %c0_296] : memref<9x8x8xbf16, #tpu.memory_space<vmem>>, vector<1x8x8xbf16>
    %326 = vector.shape_cast %325 : vector<1x8x8xbf16> to vector<8x8xbf16>
    %cst_297 = arith.constant dense<0.000000e+00> : vector<64x8xf32>
    %327 = tpu.matmul %324, %326, %cst_297 {dimension_numbers = #tpu.dot_dimension_numbers<[1], [0], [0], [1], [0, 0, 1, 1], [], []>} : vector<64x8xbf16>, vector<8x8xbf16>, vector<64x8xf32> -> vector<64x8xf32>
    %328 = arith.addf %321, %327 : vector<64x8xf32>
    %c3_298 = arith.constant 3 : index
    %c1_299 = arith.constant 1 : index
    %c0_300 = arith.constant 0 : index
    %329 = vector.load %arg32[%c3_298, %c1_299, %c0_300] : memref<12x12x32xf32, #tpu.memory_space<vmem>>, vector<8x8x8xf32>
    %330 = vector.shape_cast %329 : vector<8x8x8xf32> to vector<64x8xf32>
    %331 = arith.truncf %330 : vector<64x8xf32> to vector<64x8xbf16>
    %c6_301 = arith.constant 6 : index
    %c0_302 = arith.constant 0 : index
    %c0_303 = arith.constant 0 : index
    %332 = vector.load %arg12[%c6_301, %c0_302, %c0_303] : memref<9x8x8xbf16, #tpu.memory_space<vmem>>, vector<1x8x8xbf16>
    %333 = vector.shape_cast %332 : vector<1x8x8xbf16> to vector<8x8xbf16>
    %cst_304 = arith.constant dense<0.000000e+00> : vector<64x8xf32>
    %334 = tpu.matmul %331, %333, %cst_304 {dimension_numbers = #tpu.dot_dimension_numbers<[1], [0], [0], [1], [0, 0, 1, 1], [], []>} : vector<64x8xbf16>, vector<8x8xbf16>, vector<64x8xf32> -> vector<64x8xf32>
    %335 = arith.addf %328, %334 : vector<64x8xf32>
    %c3_305 = arith.constant 3 : index
    %c2_306 = arith.constant 2 : index
    %c0_307 = arith.constant 0 : index
    %336 = vector.load %arg32[%c3_305, %c2_306, %c0_307] : memref<12x12x32xf32, #tpu.memory_space<vmem>>, vector<8x8x8xf32>
    %337 = vector.shape_cast %336 : vector<8x8x8xf32> to vector<64x8xf32>
    %338 = arith.truncf %337 : vector<64x8xf32> to vector<64x8xbf16>
    %c7_308 = arith.constant 7 : index
    %c0_309 = arith.constant 0 : index
    %c0_310 = arith.constant 0 : index
    %339 = vector.load %arg12[%c7_308, %c0_309, %c0_310] : memref<9x8x8xbf16, #tpu.memory_space<vmem>>, vector<1x8x8xbf16>
    %340 = vector.shape_cast %339 : vector<1x8x8xbf16> to vector<8x8xbf16>
    %cst_311 = arith.constant dense<0.000000e+00> : vector<64x8xf32>
    %341 = tpu.matmul %338, %340, %cst_311 {dimension_numbers = #tpu.dot_dimension_numbers<[1], [0], [0], [1], [0, 0, 1, 1], [], []>} : vector<64x8xbf16>, vector<8x8xbf16>, vector<64x8xf32> -> vector<64x8xf32>
    %342 = arith.addf %335, %341 : vector<64x8xf32>
    %c3_312 = arith.constant 3 : index
    %c3_313 = arith.constant 3 : index
    %c0_314 = arith.constant 0 : index
    %343 = vector.load %arg32[%c3_312, %c3_313, %c0_314] : memref<12x12x32xf32, #tpu.memory_space<vmem>>, vector<8x8x8xf32>
    %344 = vector.shape_cast %343 : vector<8x8x8xf32> to vector<64x8xf32>
    %345 = arith.truncf %344 : vector<64x8xf32> to vector<64x8xbf16>
    %c8_315 = arith.constant 8 : index
    %c0_316 = arith.constant 0 : index
    %c0_317 = arith.constant 0 : index
    %346 = vector.load %arg12[%c8_315, %c0_316, %c0_317] : memref<9x8x8xbf16, #tpu.memory_space<vmem>>, vector<1x8x8xbf16>
    %347 = vector.shape_cast %346 : vector<1x8x8xbf16> to vector<8x8xbf16>
    %cst_318 = arith.constant dense<0.000000e+00> : vector<64x8xf32>
    %348 = tpu.matmul %345, %347, %cst_318 {dimension_numbers = #tpu.dot_dimension_numbers<[1], [0], [0], [1], [0, 0, 1, 1], [], []>} : vector<64x8xbf16>, vector<8x8xbf16>, vector<64x8xf32> -> vector<64x8xf32>
    %349 = arith.addf %342, %348 : vector<64x8xf32>
    %c0_319 = arith.constant 0 : index
    %c0_320 = arith.constant 0 : index
    %350 = vector.load %arg13[%c0_319, %c0_320] : memref<1x8xf32, #tpu.memory_space<vmem>>, vector<1x8xf32>
    %351 = vector.broadcast %350 : vector<1x8xf32> to vector<64x8xf32>
    %352 = arith.addf %349, %351 : vector<64x8xf32>
    %cst_321 = arith.constant 0.000000e+00 : f32
    %353 = vector.broadcast %cst_321 : f32 to vector<64x8xf32>
    %354 = arith.maximumf %352, %353 : vector<64x8xf32>
    %355 = arith.truncf %354 : vector<64x8xf32> to vector<64x8xbf16>
    %c0_322 = arith.constant 0 : index
    %c0_323 = arith.constant 0 : index
    %356 = vector.load %arg14[%c0_322, %c0_323] : memref<8x32xbf16, #tpu.memory_space<vmem>>, vector<8x32xbf16>
    %cst_324 = arith.constant dense<0.000000e+00> : vector<64x32xf32>
    %357 = tpu.matmul %355, %356, %cst_324 {dimension_numbers = #tpu.dot_dimension_numbers<[1], [0], [0], [1], [0, 0, 1, 1], [], []>} : vector<64x8xbf16>, vector<8x32xbf16>, vector<64x32xf32> -> vector<64x32xf32>
    %c0_325 = arith.constant 0 : index
    %c0_326 = arith.constant 0 : index
    %358 = vector.load %arg15[%c0_325, %c0_326] : memref<1x32xf32, #tpu.memory_space<vmem>>, vector<1x32xf32>
    %359 = vector.broadcast %358 : vector<1x32xf32> to vector<64x32xf32>
    %360 = arith.addf %357, %359 : vector<64x32xf32>
    %361 = arith.addf %360, %275 : vector<64x32xf32>
    %cst_327 = arith.constant 0.000000e+00 : f32
    %362 = vector.broadcast %cst_327 : f32 to vector<64x32xf32>
    %363 = arith.maximumf %361, %362 : vector<64x32xf32>
    %364 = vector.shape_cast %363 : vector<64x32xf32> to vector<8x8x32xf32>
    %c2_328 = arith.constant 2 : index
    %c2_329 = arith.constant 2 : index
    %c0_330 = arith.constant 0 : index
    %365 = vector.load %arg32[%c2_328, %c2_329, %c0_330] : memref<12x12x32xf32, #tpu.memory_space<vmem>>, vector<8x8x32xf32>
    tpu.vector_store %arg32[%c2_328, %c2_329, %c0_330], %364 {strides = array<i32>} : memref<12x12x32xf32, #tpu.memory_space<vmem>>, vector<8x8x32xf32>,
    %cst_331 = arith.constant 0.000000e+00 : f32
    %366 = vector.broadcast %cst_331 : f32 to vector<64x8xf32>
    %c1_332 = arith.constant 1 : index
    %c1_333 = arith.constant 1 : index
    %c0_334 = arith.constant 0 : index
    %367 = vector.load %arg32[%c1_332, %c1_333, %c0_334] : memref<12x12x32xf32, #tpu.memory_space<vmem>>, vector<8x8x32xf32>
    %368 = vector.shape_cast %367 : vector<8x8x32xf32> to vector<64x32xf32>
    %369 = arith.truncf %368 : vector<64x32xf32> to vector<64x32xbf16>
    %c0_335 = arith.constant 0 : index
    %c0_336 = arith.constant 0 : index
    %c0_337 = arith.constant 0 : index
    %370 = vector.load %arg16[%c0_335, %c0_336, %c0_337] : memref<9x32x8xbf16, #tpu.memory_space<vmem>>, vector<1x32x8xbf16>
    %371 = vector.shape_cast %370 : vector<1x32x8xbf16> to vector<32x8xbf16>
    %cst_338 = arith.constant dense<0.000000e+00> : vector<64x8xf32>
    %372 = tpu.matmul %369, %371, %cst_338 {dimension_numbers = #tpu.dot_dimension_numbers<[1], [0], [0], [1], [0, 0, 1, 1], [], []>} : vector<64x32xbf16>, vector<32x8xbf16>, vector<64x8xf32> -> vector<64x8xf32>
    %373 = arith.addf %366, %372 : vector<64x8xf32>
    %c1_339 = arith.constant 1 : index
    %c2_340 = arith.constant 2 : index
    %c0_341 = arith.constant 0 : index
    %374 = vector.load %arg32[%c1_339, %c2_340, %c0_341] : memref<12x12x32xf32, #tpu.memory_space<vmem>>, vector<8x8x32xf32>
    %375 = vector.shape_cast %374 : vector<8x8x32xf32> to vector<64x32xf32>
    %376 = arith.truncf %375 : vector<64x32xf32> to vector<64x32xbf16>
    %c1_342 = arith.constant 1 : index
    %c0_343 = arith.constant 0 : index
    %c0_344 = arith.constant 0 : index
    %377 = vector.load %arg16[%c1_342, %c0_343, %c0_344] : memref<9x32x8xbf16, #tpu.memory_space<vmem>>, vector<1x32x8xbf16>
    %378 = vector.shape_cast %377 : vector<1x32x8xbf16> to vector<32x8xbf16>
    %cst_345 = arith.constant dense<0.000000e+00> : vector<64x8xf32>
    %379 = tpu.matmul %376, %378, %cst_345 {dimension_numbers = #tpu.dot_dimension_numbers<[1], [0], [0], [1], [0, 0, 1, 1], [], []>} : vector<64x32xbf16>, vector<32x8xbf16>, vector<64x8xf32> -> vector<64x8xf32>
    %380 = arith.addf %373, %379 : vector<64x8xf32>
    %c1_346 = arith.constant 1 : index
    %c3_347 = arith.constant 3 : index
    %c0_348 = arith.constant 0 : index
    %381 = vector.load %arg32[%c1_346, %c3_347, %c0_348] : memref<12x12x32xf32, #tpu.memory_space<vmem>>, vector<8x8x32xf32>
    %382 = vector.shape_cast %381 : vector<8x8x32xf32> to vector<64x32xf32>
    %383 = arith.truncf %382 : vector<64x32xf32> to vector<64x32xbf16>
    %c2_349 = arith.constant 2 : index
    %c0_350 = arith.constant 0 : index
    %c0_351 = arith.constant 0 : index
    %384 = vector.load %arg16[%c2_349, %c0_350, %c0_351] : memref<9x32x8xbf16, #tpu.memory_space<vmem>>, vector<1x32x8xbf16>
    %385 = vector.shape_cast %384 : vector<1x32x8xbf16> to vector<32x8xbf16>
    %cst_352 = arith.constant dense<0.000000e+00> : vector<64x8xf32>
    %386 = tpu.matmul %383, %385, %cst_352 {dimension_numbers = #tpu.dot_dimension_numbers<[1], [0], [0], [1], [0, 0, 1, 1], [], []>} : vector<64x32xbf16>, vector<32x8xbf16>, vector<64x8xf32> -> vector<64x8xf32>
    %387 = arith.addf %380, %386 : vector<64x8xf32>
    %c2_353 = arith.constant 2 : index
    %c1_354 = arith.constant 1 : index
    %c0_355 = arith.constant 0 : index
    %388 = vector.load %arg32[%c2_353, %c1_354, %c0_355] : memref<12x12x32xf32, #tpu.memory_space<vmem>>, vector<8x8x32xf32>
    %389 = vector.shape_cast %388 : vector<8x8x32xf32> to vector<64x32xf32>
    %390 = arith.truncf %389 : vector<64x32xf32> to vector<64x32xbf16>
    %c3_356 = arith.constant 3 : index
    %c0_357 = arith.constant 0 : index
    %c0_358 = arith.constant 0 : index
    %391 = vector.load %arg16[%c3_356, %c0_357, %c0_358] : memref<9x32x8xbf16, #tpu.memory_space<vmem>>, vector<1x32x8xbf16>
    %392 = vector.shape_cast %391 : vector<1x32x8xbf16> to vector<32x8xbf16>
    %cst_359 = arith.constant dense<0.000000e+00> : vector<64x8xf32>
    %393 = tpu.matmul %390, %392, %cst_359 {dimension_numbers = #tpu.dot_dimension_numbers<[1], [0], [0], [1], [0, 0, 1, 1], [], []>} : vector<64x32xbf16>, vector<32x8xbf16>, vector<64x8xf32> -> vector<64x8xf32>
    %394 = arith.addf %387, %393 : vector<64x8xf32>
    %c2_360 = arith.constant 2 : index
    %c2_361 = arith.constant 2 : index
    %c0_362 = arith.constant 0 : index
    %395 = vector.load %arg32[%c2_360, %c2_361, %c0_362] : memref<12x12x32xf32, #tpu.memory_space<vmem>>, vector<8x8x32xf32>
    %396 = vector.shape_cast %395 : vector<8x8x32xf32> to vector<64x32xf32>
    %397 = arith.truncf %396 : vector<64x32xf32> to vector<64x32xbf16>
    %c4_363 = arith.constant 4 : index
    %c0_364 = arith.constant 0 : index
    %c0_365 = arith.constant 0 : index
    %398 = vector.load %arg16[%c4_363, %c0_364, %c0_365] : memref<9x32x8xbf16, #tpu.memory_space<vmem>>, vector<1x32x8xbf16>
    %399 = vector.shape_cast %398 : vector<1x32x8xbf16> to vector<32x8xbf16>
    %cst_366 = arith.constant dense<0.000000e+00> : vector<64x8xf32>
    %400 = tpu.matmul %397, %399, %cst_366 {dimension_numbers = #tpu.dot_dimension_numbers<[1], [0], [0], [1], [0, 0, 1, 1], [], []>} : vector<64x32xbf16>, vector<32x8xbf16>, vector<64x8xf32> -> vector<64x8xf32>
    %401 = arith.addf %394, %400 : vector<64x8xf32>
    %c2_367 = arith.constant 2 : index
    %c3_368 = arith.constant 3 : index
    %c0_369 = arith.constant 0 : index
    %402 = vector.load %arg32[%c2_367, %c3_368, %c0_369] : memref<12x12x32xf32, #tpu.memory_space<vmem>>, vector<8x8x32xf32>
    %403 = vector.shape_cast %402 : vector<8x8x32xf32> to vector<64x32xf32>
    %404 = arith.truncf %403 : vector<64x32xf32> to vector<64x32xbf16>
    %c5_370 = arith.constant 5 : index
    %c0_371 = arith.constant 0 : index
    %c0_372 = arith.constant 0 : index
    %405 = vector.load %arg16[%c5_370, %c0_371, %c0_372] : memref<9x32x8xbf16, #tpu.memory_space<vmem>>, vector<1x32x8xbf16>
    %406 = vector.shape_cast %405 : vector<1x32x8xbf16> to vector<32x8xbf16>
    %cst_373 = arith.constant dense<0.000000e+00> : vector<64x8xf32>
    %407 = tpu.matmul %404, %406, %cst_373 {dimension_numbers = #tpu.dot_dimension_numbers<[1], [0], [0], [1], [0, 0, 1, 1], [], []>} : vector<64x32xbf16>, vector<32x8xbf16>, vector<64x8xf32> -> vector<64x8xf32>
    %408 = arith.addf %401, %407 : vector<64x8xf32>
    %c3_374 = arith.constant 3 : index
    %c1_375 = arith.constant 1 : index
    %c0_376 = arith.constant 0 : index
    %409 = vector.load %arg32[%c3_374, %c1_375, %c0_376] : memref<12x12x32xf32, #tpu.memory_space<vmem>>, vector<8x8x32xf32>
    %410 = vector.shape_cast %409 : vector<8x8x32xf32> to vector<64x32xf32>
    %411 = arith.truncf %410 : vector<64x32xf32> to vector<64x32xbf16>
    %c6_377 = arith.constant 6 : index
    %c0_378 = arith.constant 0 : index
    %c0_379 = arith.constant 0 : index
    %412 = vector.load %arg16[%c6_377, %c0_378, %c0_379] : memref<9x32x8xbf16, #tpu.memory_space<vmem>>, vector<1x32x8xbf16>
    %413 = vector.shape_cast %412 : vector<1x32x8xbf16> to vector<32x8xbf16>
    %cst_380 = arith.constant dense<0.000000e+00> : vector<64x8xf32>
    %414 = tpu.matmul %411, %413, %cst_380 {dimension_numbers = #tpu.dot_dimension_numbers<[1], [0], [0], [1], [0, 0, 1, 1], [], []>} : vector<64x32xbf16>, vector<32x8xbf16>, vector<64x8xf32> -> vector<64x8xf32>
    %415 = arith.addf %408, %414 : vector<64x8xf32>
    %c3_381 = arith.constant 3 : index
    %c2_382 = arith.constant 2 : index
    %c0_383 = arith.constant 0 : index
    %416 = vector.load %arg32[%c3_381, %c2_382, %c0_383] : memref<12x12x32xf32, #tpu.memory_space<vmem>>, vector<8x8x32xf32>
    %417 = vector.shape_cast %416 : vector<8x8x32xf32> to vector<64x32xf32>
    %418 = arith.truncf %417 : vector<64x32xf32> to vector<64x32xbf16>
    %c7_384 = arith.constant 7 : index
    %c0_385 = arith.constant 0 : index
    %c0_386 = arith.constant 0 : index
    %419 = vector.load %arg16[%c7_384, %c0_385, %c0_386] : memref<9x32x8xbf16, #tpu.memory_space<vmem>>, vector<1x32x8xbf16>
    %420 = vector.shape_cast %419 : vector<1x32x8xbf16> to vector<32x8xbf16>
    %cst_387 = arith.constant dense<0.000000e+00> : vector<64x8xf32>
    %421 = tpu.matmul %418, %420, %cst_387 {dimension_numbers = #tpu.dot_dimension_numbers<[1], [0], [0], [1], [0, 0, 1, 1], [], []>} : vector<64x32xbf16>, vector<32x8xbf16>, vector<64x8xf32> -> vector<64x8xf32>
    %422 = arith.addf %415, %421 : vector<64x8xf32>
    %c3_388 = arith.constant 3 : index
    %c3_389 = arith.constant 3 : index
    %c0_390 = arith.constant 0 : index
    %423 = vector.load %arg32[%c3_388, %c3_389, %c0_390] : memref<12x12x32xf32, #tpu.memory_space<vmem>>, vector<8x8x32xf32>
    %424 = vector.shape_cast %423 : vector<8x8x32xf32> to vector<64x32xf32>
    %425 = arith.truncf %424 : vector<64x32xf32> to vector<64x32xbf16>
    %c8_391 = arith.constant 8 : index
    %c0_392 = arith.constant 0 : index
    %c0_393 = arith.constant 0 : index
    %426 = vector.load %arg16[%c8_391, %c0_392, %c0_393] : memref<9x32x8xbf16, #tpu.memory_space<vmem>>, vector<1x32x8xbf16>
    %427 = vector.shape_cast %426 : vector<1x32x8xbf16> to vector<32x8xbf16>
    %cst_394 = arith.constant dense<0.000000e+00> : vector<64x8xf32>
    %428 = tpu.matmul %425, %427, %cst_394 {dimension_numbers = #tpu.dot_dimension_numbers<[1], [0], [0], [1], [0, 0, 1, 1], [], []>} : vector<64x32xbf16>, vector<32x8xbf16>, vector<64x8xf32> -> vector<64x8xf32>
    %429 = arith.addf %422, %428 : vector<64x8xf32>
    %c0_395 = arith.constant 0 : index
    %c0_396 = arith.constant 0 : index
    %430 = vector.load %arg17[%c0_395, %c0_396] : memref<1x8xf32, #tpu.memory_space<vmem>>, vector<1x8xf32>
    %431 = vector.broadcast %430 : vector<1x8xf32> to vector<64x8xf32>
    %432 = arith.addf %429, %431 : vector<64x8xf32>
    %cst_397 = arith.constant 0.000000e+00 : f32
    %433 = vector.broadcast %cst_397 : f32 to vector<64x8xf32>
    %434 = arith.maximumf %432, %433 : vector<64x8xf32>
    %435 = vector.shape_cast %434 : vector<64x8xf32> to vector<8x8x8xf32>
    %c2_398 = arith.constant 2 : index
    %c2_399 = arith.constant 2 : index
    %c0_400 = arith.constant 0 : index
    %436 = vector.load %arg32[%c2_398, %c2_399, %c0_400] : memref<12x12x32xf32, #tpu.memory_space<vmem>>, vector<8x8x8xf32>
    tpu.vector_store %arg32[%c2_398, %c2_399, %c0_400], %435 {strides = array<i32>} : memref<12x12x32xf32, #tpu.memory_space<vmem>>, vector<8x8x8xf32>,
    %437 = vector.shape_cast %4 : vector<64x2xf32> to vector<8x8x2xf32>
    %c2_401 = arith.constant 2 : index
    %c2_402 = arith.constant 2 : index
    %c8_403 = arith.constant 8 : index
    %438 = vector.load %arg32[%c2_401, %c2_402, %c8_403] : memref<12x12x32xf32, #tpu.memory_space<vmem>>, vector<8x8x2xf32>
    tpu.vector_store %arg32[%c2_401, %c2_402, %c8_403], %437 {strides = array<i32>} : memref<12x12x32xf32, #tpu.memory_space<vmem>>, vector<8x8x2xf32>,
    %cst_404 = arith.constant 0.000000e+00 : f32
    %439 = vector.broadcast %cst_404 : f32 to vector<64x8xf32>
    %c0_405 = arith.constant 0 : index
    %c0_406 = arith.constant 0 : index
    %c0_407 = arith.constant 0 : index
    %440 = vector.load %arg32[%c0_405, %c0_406, %c0_407] : memref<12x12x32xf32, #tpu.memory_space<vmem>>, vector<8x8x10xf32>
    %441 = vector.shape_cast %440 : vector<8x8x10xf32> to vector<64x10xf32>
    %442 = arith.truncf %441 : vector<64x10xf32> to vector<64x10xbf16>
    %c0_408 = arith.constant 0 : index
    %c0_409 = arith.constant 0 : index
    %c0_410 = arith.constant 0 : index
    %443 = vector.load %arg18[%c0_408, %c0_409, %c0_410] : memref<25x10x8xbf16, #tpu.memory_space<vmem>>, vector<1x10x8xbf16>
    %444 = vector.shape_cast %443 : vector<1x10x8xbf16> to vector<10x8xbf16>
    %cst_411 = arith.constant dense<0.000000e+00> : vector<64x8xf32>
    %445 = tpu.matmul %442, %444, %cst_411 {dimension_numbers = #tpu.dot_dimension_numbers<[1], [0], [0], [1], [0, 0, 1, 1], [], []>} : vector<64x10xbf16>, vector<10x8xbf16>, vector<64x8xf32> -> vector<64x8xf32>
    %446 = arith.addf %439, %445 : vector<64x8xf32>
    %c0_412 = arith.constant 0 : index
    %c1_413 = arith.constant 1 : index
    %c0_414 = arith.constant 0 : index
    %447 = vector.load %arg32[%c0_412, %c1_413, %c0_414] : memref<12x12x32xf32, #tpu.memory_space<vmem>>, vector<8x8x10xf32>
    %448 = vector.shape_cast %447 : vector<8x8x10xf32> to vector<64x10xf32>
    %449 = arith.truncf %448 : vector<64x10xf32> to vector<64x10xbf16>
    %c1_415 = arith.constant 1 : index
    %c0_416 = arith.constant 0 : index
    %c0_417 = arith.constant 0 : index
    %450 = vector.load %arg18[%c1_415, %c0_416, %c0_417] : memref<25x10x8xbf16, #tpu.memory_space<vmem>>, vector<1x10x8xbf16>
    %451 = vector.shape_cast %450 : vector<1x10x8xbf16> to vector<10x8xbf16>
    %cst_418 = arith.constant dense<0.000000e+00> : vector<64x8xf32>
    %452 = tpu.matmul %449, %451, %cst_418 {dimension_numbers = #tpu.dot_dimension_numbers<[1], [0], [0], [1], [0, 0, 1, 1], [], []>} : vector<64x10xbf16>, vector<10x8xbf16>, vector<64x8xf32> -> vector<64x8xf32>
    %453 = arith.addf %446, %452 : vector<64x8xf32>
    %c0_419 = arith.constant 0 : index
    %c2_420 = arith.constant 2 : index
    %c0_421 = arith.constant 0 : index
    %454 = vector.load %arg32[%c0_419, %c2_420, %c0_421] : memref<12x12x32xf32, #tpu.memory_space<vmem>>, vector<8x8x10xf32>
    %455 = vector.shape_cast %454 : vector<8x8x10xf32> to vector<64x10xf32>
    %456 = arith.truncf %455 : vector<64x10xf32> to vector<64x10xbf16>
    %c2_422 = arith.constant 2 : index
    %c0_423 = arith.constant 0 : index
    %c0_424 = arith.constant 0 : index
    %457 = vector.load %arg18[%c2_422, %c0_423, %c0_424] : memref<25x10x8xbf16, #tpu.memory_space<vmem>>, vector<1x10x8xbf16>
    %458 = vector.shape_cast %457 : vector<1x10x8xbf16> to vector<10x8xbf16>
    %cst_425 = arith.constant dense<0.000000e+00> : vector<64x8xf32>
    %459 = tpu.matmul %456, %458, %cst_425 {dimension_numbers = #tpu.dot_dimension_numbers<[1], [0], [0], [1], [0, 0, 1, 1], [], []>} : vector<64x10xbf16>, vector<10x8xbf16>, vector<64x8xf32> -> vector<64x8xf32>
    %460 = arith.addf %453, %459 : vector<64x8xf32>
    %c0_426 = arith.constant 0 : index
    %c3_427 = arith.constant 3 : index
    %c0_428 = arith.constant 0 : index
    %461 = vector.load %arg32[%c0_426, %c3_427, %c0_428] : memref<12x12x32xf32, #tpu.memory_space<vmem>>, vector<8x8x10xf32>
    %462 = vector.shape_cast %461 : vector<8x8x10xf32> to vector<64x10xf32>
    %463 = arith.truncf %462 : vector<64x10xf32> to vector<64x10xbf16>
    %c3_429 = arith.constant 3 : index
    %c0_430 = arith.constant 0 : index
    %c0_431 = arith.constant 0 : index
    %464 = vector.load %arg18[%c3_429, %c0_430, %c0_431] : memref<25x10x8xbf16, #tpu.memory_space<vmem>>, vector<1x10x8xbf16>
    %465 = vector.shape_cast %464 : vector<1x10x8xbf16> to vector<10x8xbf16>
    %cst_432 = arith.constant dense<0.000000e+00> : vector<64x8xf32>
    %466 = tpu.matmul %463, %465, %cst_432 {dimension_numbers = #tpu.dot_dimension_numbers<[1], [0], [0], [1], [0, 0, 1, 1], [], []>} : vector<64x10xbf16>, vector<10x8xbf16>, vector<64x8xf32> -> vector<64x8xf32>
    %467 = arith.addf %460, %466 : vector<64x8xf32>
    %c0_433 = arith.constant 0 : index
    %c4_434 = arith.constant 4 : index
    %c0_435 = arith.constant 0 : index
    %468 = vector.load %arg32[%c0_433, %c4_434, %c0_435] : memref<12x12x32xf32, #tpu.memory_space<vmem>>, vector<8x8x10xf32>
    %469 = vector.shape_cast %468 : vector<8x8x10xf32> to vector<64x10xf32>
    %470 = arith.truncf %469 : vector<64x10xf32> to vector<64x10xbf16>
    %c4_436 = arith.constant 4 : index
    %c0_437 = arith.constant 0 : index
    %c0_438 = arith.constant 0 : index
    %471 = vector.load %arg18[%c4_436, %c0_437, %c0_438] : memref<25x10x8xbf16, #tpu.memory_space<vmem>>, vector<1x10x8xbf16>
    %472 = vector.shape_cast %471 : vector<1x10x8xbf16> to vector<10x8xbf16>
    %cst_439 = arith.constant dense<0.000000e+00> : vector<64x8xf32>
    %473 = tpu.matmul %470, %472, %cst_439 {dimension_numbers = #tpu.dot_dimension_numbers<[1], [0], [0], [1], [0, 0, 1, 1], [], []>} : vector<64x10xbf16>, vector<10x8xbf16>, vector<64x8xf32> -> vector<64x8xf32>
    %474 = arith.addf %467, %473 : vector<64x8xf32>
    %c1_440 = arith.constant 1 : index
    %c0_441 = arith.constant 0 : index
    %c0_442 = arith.constant 0 : index
    %475 = vector.load %arg32[%c1_440, %c0_441, %c0_442] : memref<12x12x32xf32, #tpu.memory_space<vmem>>, vector<8x8x10xf32>
    %476 = vector.shape_cast %475 : vector<8x8x10xf32> to vector<64x10xf32>
    %477 = arith.truncf %476 : vector<64x10xf32> to vector<64x10xbf16>
    %c5_443 = arith.constant 5 : index
    %c0_444 = arith.constant 0 : index
    %c0_445 = arith.constant 0 : index
    %478 = vector.load %arg18[%c5_443, %c0_444, %c0_445] : memref<25x10x8xbf16, #tpu.memory_space<vmem>>, vector<1x10x8xbf16>
    %479 = vector.shape_cast %478 : vector<1x10x8xbf16> to vector<10x8xbf16>
    %cst_446 = arith.constant dense<0.000000e+00> : vector<64x8xf32>
    %480 = tpu.matmul %477, %479, %cst_446 {dimension_numbers = #tpu.dot_dimension_numbers<[1], [0], [0], [1], [0, 0, 1, 1], [], []>} : vector<64x10xbf16>, vector<10x8xbf16>, vector<64x8xf32> -> vector<64x8xf32>
    %481 = arith.addf %474, %480 : vector<64x8xf32>
    %c1_447 = arith.constant 1 : index
    %c1_448 = arith.constant 1 : index
    %c0_449 = arith.constant 0 : index
    %482 = vector.load %arg32[%c1_447, %c1_448, %c0_449] : memref<12x12x32xf32, #tpu.memory_space<vmem>>, vector<8x8x10xf32>
    %483 = vector.shape_cast %482 : vector<8x8x10xf32> to vector<64x10xf32>
    %484 = arith.truncf %483 : vector<64x10xf32> to vector<64x10xbf16>
    %c6_450 = arith.constant 6 : index
    %c0_451 = arith.constant 0 : index
    %c0_452 = arith.constant 0 : index
    %485 = vector.load %arg18[%c6_450, %c0_451, %c0_452] : memref<25x10x8xbf16, #tpu.memory_space<vmem>>, vector<1x10x8xbf16>
    %486 = vector.shape_cast %485 : vector<1x10x8xbf16> to vector<10x8xbf16>
    %cst_453 = arith.constant dense<0.000000e+00> : vector<64x8xf32>
    %487 = tpu.matmul %484, %486, %cst_453 {dimension_numbers = #tpu.dot_dimension_numbers<[1], [0], [0], [1], [0, 0, 1, 1], [], []>} : vector<64x10xbf16>, vector<10x8xbf16>, vector<64x8xf32> -> vector<64x8xf32>
    %488 = arith.addf %481, %487 : vector<64x8xf32>
    %c1_454 = arith.constant 1 : index
    %c2_455 = arith.constant 2 : index
    %c0_456 = arith.constant 0 : index
    %489 = vector.load %arg32[%c1_454, %c2_455, %c0_456] : memref<12x12x32xf32, #tpu.memory_space<vmem>>, vector<8x8x10xf32>
    %490 = vector.shape_cast %489 : vector<8x8x10xf32> to vector<64x10xf32>
    %491 = arith.truncf %490 : vector<64x10xf32> to vector<64x10xbf16>
    %c7_457 = arith.constant 7 : index
    %c0_458 = arith.constant 0 : index
    %c0_459 = arith.constant 0 : index
    %492 = vector.load %arg18[%c7_457, %c0_458, %c0_459] : memref<25x10x8xbf16, #tpu.memory_space<vmem>>, vector<1x10x8xbf16>
    %493 = vector.shape_cast %492 : vector<1x10x8xbf16> to vector<10x8xbf16>
    %cst_460 = arith.constant dense<0.000000e+00> : vector<64x8xf32>
    %494 = tpu.matmul %491, %493, %cst_460 {dimension_numbers = #tpu.dot_dimension_numbers<[1], [0], [0], [1], [0, 0, 1, 1], [], []>} : vector<64x10xbf16>, vector<10x8xbf16>, vector<64x8xf32> -> vector<64x8xf32>
    %495 = arith.addf %488, %494 : vector<64x8xf32>
    %c1_461 = arith.constant 1 : index
    %c3_462 = arith.constant 3 : index
    %c0_463 = arith.constant 0 : index
    %496 = vector.load %arg32[%c1_461, %c3_462, %c0_463] : memref<12x12x32xf32, #tpu.memory_space<vmem>>, vector<8x8x10xf32>
    %497 = vector.shape_cast %496 : vector<8x8x10xf32> to vector<64x10xf32>
    %498 = arith.truncf %497 : vector<64x10xf32> to vector<64x10xbf16>
    %c8_464 = arith.constant 8 : index
    %c0_465 = arith.constant 0 : index
    %c0_466 = arith.constant 0 : index
    %499 = vector.load %arg18[%c8_464, %c0_465, %c0_466] : memref<25x10x8xbf16, #tpu.memory_space<vmem>>, vector<1x10x8xbf16>
    %500 = vector.shape_cast %499 : vector<1x10x8xbf16> to vector<10x8xbf16>
    %cst_467 = arith.constant dense<0.000000e+00> : vector<64x8xf32>
    %501 = tpu.matmul %498, %500, %cst_467 {dimension_numbers = #tpu.dot_dimension_numbers<[1], [0], [0], [1], [0, 0, 1, 1], [], []>} : vector<64x10xbf16>, vector<10x8xbf16>, vector<64x8xf32> -> vector<64x8xf32>
    %502 = arith.addf %495, %501 : vector<64x8xf32>
    %c1_468 = arith.constant 1 : index
    %c4_469 = arith.constant 4 : index
    %c0_470 = arith.constant 0 : index
    %503 = vector.load %arg32[%c1_468, %c4_469, %c0_470] : memref<12x12x32xf32, #tpu.memory_space<vmem>>, vector<8x8x10xf32>
    %504 = vector.shape_cast %503 : vector<8x8x10xf32> to vector<64x10xf32>
    %505 = arith.truncf %504 : vector<64x10xf32> to vector<64x10xbf16>
    %c9_471 = arith.constant 9 : index
    %c0_472 = arith.constant 0 : index
    %c0_473 = arith.constant 0 : index
    %506 = vector.load %arg18[%c9_471, %c0_472, %c0_473] : memref<25x10x8xbf16, #tpu.memory_space<vmem>>, vector<1x10x8xbf16>
    %507 = vector.shape_cast %506 : vector<1x10x8xbf16> to vector<10x8xbf16>
    %cst_474 = arith.constant dense<0.000000e+00> : vector<64x8xf32>
    %508 = tpu.matmul %505, %507, %cst_474 {dimension_numbers = #tpu.dot_dimension_numbers<[1], [0], [0], [1], [0, 0, 1, 1], [], []>} : vector<64x10xbf16>, vector<10x8xbf16>, vector<64x8xf32> -> vector<64x8xf32>
    %509 = arith.addf %502, %508 : vector<64x8xf32>
    %c2_475 = arith.constant 2 : index
    %c0_476 = arith.constant 0 : index
    %c0_477 = arith.constant 0 : index
    %510 = vector.load %arg32[%c2_475, %c0_476, %c0_477] : memref<12x12x32xf32, #tpu.memory_space<vmem>>, vector<8x8x10xf32>
    %511 = vector.shape_cast %510 : vector<8x8x10xf32> to vector<64x10xf32>
    %512 = arith.truncf %511 : vector<64x10xf32> to vector<64x10xbf16>
    %c10_478 = arith.constant 10 : index
    %c0_479 = arith.constant 0 : index
    %c0_480 = arith.constant 0 : index
    %513 = vector.load %arg18[%c10_478, %c0_479, %c0_480] : memref<25x10x8xbf16, #tpu.memory_space<vmem>>, vector<1x10x8xbf16>
    %514 = vector.shape_cast %513 : vector<1x10x8xbf16> to vector<10x8xbf16>
    %cst_481 = arith.constant dense<0.000000e+00> : vector<64x8xf32>
    %515 = tpu.matmul %512, %514, %cst_481 {dimension_numbers = #tpu.dot_dimension_numbers<[1], [0], [0], [1], [0, 0, 1, 1], [], []>} : vector<64x10xbf16>, vector<10x8xbf16>, vector<64x8xf32> -> vector<64x8xf32>
    %516 = arith.addf %509, %515 : vector<64x8xf32>
    %c2_482 = arith.constant 2 : index
    %c1_483 = arith.constant 1 : index
    %c0_484 = arith.constant 0 : index
    %517 = vector.load %arg32[%c2_482, %c1_483, %c0_484] : memref<12x12x32xf32, #tpu.memory_space<vmem>>, vector<8x8x10xf32>
    %518 = vector.shape_cast %517 : vector<8x8x10xf32> to vector<64x10xf32>
    %519 = arith.truncf %518 : vector<64x10xf32> to vector<64x10xbf16>
    %c11_485 = arith.constant 11 : index
    %c0_486 = arith.constant 0 : index
    %c0_487 = arith.constant 0 : index
    %520 = vector.load %arg18[%c11_485, %c0_486, %c0_487] : memref<25x10x8xbf16, #tpu.memory_space<vmem>>, vector<1x10x8xbf16>
    %521 = vector.shape_cast %520 : vector<1x10x8xbf16> to vector<10x8xbf16>
    %cst_488 = arith.constant dense<0.000000e+00> : vector<64x8xf32>
    %522 = tpu.matmul %519, %521, %cst_488 {dimension_numbers = #tpu.dot_dimension_numbers<[1], [0], [0], [1], [0, 0, 1, 1], [], []>} : vector<64x10xbf16>, vector<10x8xbf16>, vector<64x8xf32> -> vector<64x8xf32>
    %523 = arith.addf %516, %522 : vector<64x8xf32>
    %c2_489 = arith.constant 2 : index
    %c2_490 = arith.constant 2 : index
    %c0_491 = arith.constant 0 : index
    %524 = vector.load %arg32[%c2_489, %c2_490, %c0_491] : memref<12x12x32xf32, #tpu.memory_space<vmem>>, vector<8x8x10xf32>
    %525 = vector.shape_cast %524 : vector<8x8x10xf32> to vector<64x10xf32>
    %526 = arith.truncf %525 : vector<64x10xf32> to vector<64x10xbf16>
    %c12_492 = arith.constant 12 : index
    %c0_493 = arith.constant 0 : index
    %c0_494 = arith.constant 0 : index
    %527 = vector.load %arg18[%c12_492, %c0_493, %c0_494] : memref<25x10x8xbf16, #tpu.memory_space<vmem>>, vector<1x10x8xbf16>
    %528 = vector.shape_cast %527 : vector<1x10x8xbf16> to vector<10x8xbf16>
    %cst_495 = arith.constant dense<0.000000e+00> : vector<64x8xf32>
    %529 = tpu.matmul %526, %528, %cst_495 {dimension_numbers = #tpu.dot_dimension_numbers<[1], [0], [0], [1], [0, 0, 1, 1], [], []>} : vector<64x10xbf16>, vector<10x8xbf16>, vector<64x8xf32> -> vector<64x8xf32>
    %530 = arith.addf %523, %529 : vector<64x8xf32>
    %c2_496 = arith.constant 2 : index
    %c3_497 = arith.constant 3 : index
    %c0_498 = arith.constant 0 : index
    %531 = vector.load %arg32[%c2_496, %c3_497, %c0_498] : memref<12x12x32xf32, #tpu.memory_space<vmem>>, vector<8x8x10xf32>
    %532 = vector.shape_cast %531 : vector<8x8x10xf32> to vector<64x10xf32>
    %533 = arith.truncf %532 : vector<64x10xf32> to vector<64x10xbf16>
    %c13_499 = arith.constant 13 : index
    %c0_500 = arith.constant 0 : index
    %c0_501 = arith.constant 0 : index
    %534 = vector.load %arg18[%c13_499, %c0_500, %c0_501] : memref<25x10x8xbf16, #tpu.memory_space<vmem>>, vector<1x10x8xbf16>
    %535 = vector.shape_cast %534 : vector<1x10x8xbf16> to vector<10x8xbf16>
    %cst_502 = arith.constant dense<0.000000e+00> : vector<64x8xf32>
    %536 = tpu.matmul %533, %535, %cst_502 {dimension_numbers = #tpu.dot_dimension_numbers<[1], [0], [0], [1], [0, 0, 1, 1], [], []>} : vector<64x10xbf16>, vector<10x8xbf16>, vector<64x8xf32> -> vector<64x8xf32>
    %537 = arith.addf %530, %536 : vector<64x8xf32>
    %c2_503 = arith.constant 2 : index
    %c4_504 = arith.constant 4 : index
    %c0_505 = arith.constant 0 : index
    %538 = vector.load %arg32[%c2_503, %c4_504, %c0_505] : memref<12x12x32xf32, #tpu.memory_space<vmem>>, vector<8x8x10xf32>
    %539 = vector.shape_cast %538 : vector<8x8x10xf32> to vector<64x10xf32>
    %540 = arith.truncf %539 : vector<64x10xf32> to vector<64x10xbf16>
    %c14_506 = arith.constant 14 : index
    %c0_507 = arith.constant 0 : index
    %c0_508 = arith.constant 0 : index
    %541 = vector.load %arg18[%c14_506, %c0_507, %c0_508] : memref<25x10x8xbf16, #tpu.memory_space<vmem>>, vector<1x10x8xbf16>
    %542 = vector.shape_cast %541 : vector<1x10x8xbf16> to vector<10x8xbf16>
    %cst_509 = arith.constant dense<0.000000e+00> : vector<64x8xf32>
    %543 = tpu.matmul %540, %542, %cst_509 {dimension_numbers = #tpu.dot_dimension_numbers<[1], [0], [0], [1], [0, 0, 1, 1], [], []>} : vector<64x10xbf16>, vector<10x8xbf16>, vector<64x8xf32> -> vector<64x8xf32>
    %544 = arith.addf %537, %543 : vector<64x8xf32>
    %c3_510 = arith.constant 3 : index
    %c0_511 = arith.constant 0 : index
    %c0_512 = arith.constant 0 : index
    %545 = vector.load %arg32[%c3_510, %c0_511, %c0_512] : memref<12x12x32xf32, #tpu.memory_space<vmem>>, vector<8x8x10xf32>
    %546 = vector.shape_cast %545 : vector<8x8x10xf32> to vector<64x10xf32>
    %547 = arith.truncf %546 : vector<64x10xf32> to vector<64x10xbf16>
    %c15_513 = arith.constant 15 : index
    %c0_514 = arith.constant 0 : index
    %c0_515 = arith.constant 0 : index
    %548 = vector.load %arg18[%c15_513, %c0_514, %c0_515] : memref<25x10x8xbf16, #tpu.memory_space<vmem>>, vector<1x10x8xbf16>
    %549 = vector.shape_cast %548 : vector<1x10x8xbf16> to vector<10x8xbf16>
    %cst_516 = arith.constant dense<0.000000e+00> : vector<64x8xf32>
    %550 = tpu.matmul %547, %549, %cst_516 {dimension_numbers = #tpu.dot_dimension_numbers<[1], [0], [0], [1], [0, 0, 1, 1], [], []>} : vector<64x10xbf16>, vector<10x8xbf16>, vector<64x8xf32> -> vector<64x8xf32>
    %551 = arith.addf %544, %550 : vector<64x8xf32>
    %c3_517 = arith.constant 3 : index
    %c1_518 = arith.constant 1 : index
    %c0_519 = arith.constant 0 : index
    %552 = vector.load %arg32[%c3_517, %c1_518, %c0_519] : memref<12x12x32xf32, #tpu.memory_space<vmem>>, vector<8x8x10xf32>
    %553 = vector.shape_cast %552 : vector<8x8x10xf32> to vector<64x10xf32>
    %554 = arith.truncf %553 : vector<64x10xf32> to vector<64x10xbf16>
    %c16_520 = arith.constant 16 : index
    %c0_521 = arith.constant 0 : index
    %c0_522 = arith.constant 0 : index
    %555 = vector.load %arg18[%c16_520, %c0_521, %c0_522] : memref<25x10x8xbf16, #tpu.memory_space<vmem>>, vector<1x10x8xbf16>
    %556 = vector.shape_cast %555 : vector<1x10x8xbf16> to vector<10x8xbf16>
    %cst_523 = arith.constant dense<0.000000e+00> : vector<64x8xf32>
    %557 = tpu.matmul %554, %556, %cst_523 {dimension_numbers = #tpu.dot_dimension_numbers<[1], [0], [0], [1], [0, 0, 1, 1], [], []>} : vector<64x10xbf16>, vector<10x8xbf16>, vector<64x8xf32> -> vector<64x8xf32>
    %558 = arith.addf %551, %557 : vector<64x8xf32>
    %c3_524 = arith.constant 3 : index
    %c2_525 = arith.constant 2 : index
    %c0_526 = arith.constant 0 : index
    %559 = vector.load %arg32[%c3_524, %c2_525, %c0_526] : memref<12x12x32xf32, #tpu.memory_space<vmem>>, vector<8x8x10xf32>
    %560 = vector.shape_cast %559 : vector<8x8x10xf32> to vector<64x10xf32>
    %561 = arith.truncf %560 : vector<64x10xf32> to vector<64x10xbf16>
    %c17_527 = arith.constant 17 : index
    %c0_528 = arith.constant 0 : index
    %c0_529 = arith.constant 0 : index
    %562 = vector.load %arg18[%c17_527, %c0_528, %c0_529] : memref<25x10x8xbf16, #tpu.memory_space<vmem>>, vector<1x10x8xbf16>
    %563 = vector.shape_cast %562 : vector<1x10x8xbf16> to vector<10x8xbf16>
    %cst_530 = arith.constant dense<0.000000e+00> : vector<64x8xf32>
    %564 = tpu.matmul %561, %563, %cst_530 {dimension_numbers = #tpu.dot_dimension_numbers<[1], [0], [0], [1], [0, 0, 1, 1], [], []>} : vector<64x10xbf16>, vector<10x8xbf16>, vector<64x8xf32> -> vector<64x8xf32>
    %565 = arith.addf %558, %564 : vector<64x8xf32>
    %c3_531 = arith.constant 3 : index
    %c3_532 = arith.constant 3 : index
    %c0_533 = arith.constant 0 : index
    %566 = vector.load %arg32[%c3_531, %c3_532, %c0_533] : memref<12x12x32xf32, #tpu.memory_space<vmem>>, vector<8x8x10xf32>
    %567 = vector.shape_cast %566 : vector<8x8x10xf32> to vector<64x10xf32>
    %568 = arith.truncf %567 : vector<64x10xf32> to vector<64x10xbf16>
    %c18_534 = arith.constant 18 : index
    %c0_535 = arith.constant 0 : index
    %c0_536 = arith.constant 0 : index
    %569 = vector.load %arg18[%c18_534, %c0_535, %c0_536] : memref<25x10x8xbf16, #tpu.memory_space<vmem>>, vector<1x10x8xbf16>
    %570 = vector.shape_cast %569 : vector<1x10x8xbf16> to vector<10x8xbf16>
    %cst_537 = arith.constant dense<0.000000e+00> : vector<64x8xf32>
    %571 = tpu.matmul %568, %570, %cst_537 {dimension_numbers = #tpu.dot_dimension_numbers<[1], [0], [0], [1], [0, 0, 1, 1], [], []>} : vector<64x10xbf16>, vector<10x8xbf16>, vector<64x8xf32> -> vector<64x8xf32>
    %572 = arith.addf %565, %571 : vector<64x8xf32>
    %c3_538 = arith.constant 3 : index
    %c4_539 = arith.constant 4 : index
    %c0_540 = arith.constant 0 : index
    %573 = vector.load %arg32[%c3_538, %c4_539, %c0_540] : memref<12x12x32xf32, #tpu.memory_space<vmem>>, vector<8x8x10xf32>
    %574 = vector.shape_cast %573 : vector<8x8x10xf32> to vector<64x10xf32>
    %575 = arith.truncf %574 : vector<64x10xf32> to vector<64x10xbf16>
    %c19_541 = arith.constant 19 : index
    %c0_542 = arith.constant 0 : index
    %c0_543 = arith.constant 0 : index
    %576 = vector.load %arg18[%c19_541, %c0_542, %c0_543] : memref<25x10x8xbf16, #tpu.memory_space<vmem>>, vector<1x10x8xbf16>
    %577 = vector.shape_cast %576 : vector<1x10x8xbf16> to vector<10x8xbf16>
    %cst_544 = arith.constant dense<0.000000e+00> : vector<64x8xf32>
    %578 = tpu.matmul %575, %577, %cst_544 {dimension_numbers = #tpu.dot_dimension_numbers<[1], [0], [0], [1], [0, 0, 1, 1], [], []>} : vector<64x10xbf16>, vector<10x8xbf16>, vector<64x8xf32> -> vector<64x8xf32>
    %579 = arith.addf %572, %578 : vector<64x8xf32>
    %c4_545 = arith.constant 4 : index
    %c0_546 = arith.constant 0 : index
    %c0_547 = arith.constant 0 : index
    %580 = vector.load %arg32[%c4_545, %c0_546, %c0_547] : memref<12x12x32xf32, #tpu.memory_space<vmem>>, vector<8x8x10xf32>
    %581 = vector.shape_cast %580 : vector<8x8x10xf32> to vector<64x10xf32>
    %582 = arith.truncf %581 : vector<64x10xf32> to vector<64x10xbf16>
    %c20_548 = arith.constant 20 : index
    %c0_549 = arith.constant 0 : index
    %c0_550 = arith.constant 0 : index
    %583 = vector.load %arg18[%c20_548, %c0_549, %c0_550] : memref<25x10x8xbf16, #tpu.memory_space<vmem>>, vector<1x10x8xbf16>
    %584 = vector.shape_cast %583 : vector<1x10x8xbf16> to vector<10x8xbf16>
    %cst_551 = arith.constant dense<0.000000e+00> : vector<64x8xf32>
    %585 = tpu.matmul %582, %584, %cst_551 {dimension_numbers = #tpu.dot_dimension_numbers<[1], [0], [0], [1], [0, 0, 1, 1], [], []>} : vector<64x10xbf16>, vector<10x8xbf16>, vector<64x8xf32> -> vector<64x8xf32>
    %586 = arith.addf %579, %585 : vector<64x8xf32>
    %c4_552 = arith.constant 4 : index
    %c1_553 = arith.constant 1 : index
    %c0_554 = arith.constant 0 : index
    %587 = vector.load %arg32[%c4_552, %c1_553, %c0_554] : memref<12x12x32xf32, #tpu.memory_space<vmem>>, vector<8x8x10xf32>
    %588 = vector.shape_cast %587 : vector<8x8x10xf32> to vector<64x10xf32>
    %589 = arith.truncf %588 : vector<64x10xf32> to vector<64x10xbf16>
    %c21_555 = arith.constant 21 : index
    %c0_556 = arith.constant 0 : index
    %c0_557 = arith.constant 0 : index
    %590 = vector.load %arg18[%c21_555, %c0_556, %c0_557] : memref<25x10x8xbf16, #tpu.memory_space<vmem>>, vector<1x10x8xbf16>
    %591 = vector.shape_cast %590 : vector<1x10x8xbf16> to vector<10x8xbf16>
    %cst_558 = arith.constant dense<0.000000e+00> : vector<64x8xf32>
    %592 = tpu.matmul %589, %591, %cst_558 {dimension_numbers = #tpu.dot_dimension_numbers<[1], [0], [0], [1], [0, 0, 1, 1], [], []>} : vector<64x10xbf16>, vector<10x8xbf16>, vector<64x8xf32> -> vector<64x8xf32>
    %593 = arith.addf %586, %592 : vector<64x8xf32>
    %c4_559 = arith.constant 4 : index
    %c2_560 = arith.constant 2 : index
    %c0_561 = arith.constant 0 : index
    %594 = vector.load %arg32[%c4_559, %c2_560, %c0_561] : memref<12x12x32xf32, #tpu.memory_space<vmem>>, vector<8x8x10xf32>
    %595 = vector.shape_cast %594 : vector<8x8x10xf32> to vector<64x10xf32>
    %596 = arith.truncf %595 : vector<64x10xf32> to vector<64x10xbf16>
    %c22_562 = arith.constant 22 : index
    %c0_563 = arith.constant 0 : index
    %c0_564 = arith.constant 0 : index
    %597 = vector.load %arg18[%c22_562, %c0_563, %c0_564] : memref<25x10x8xbf16, #tpu.memory_space<vmem>>, vector<1x10x8xbf16>
    %598 = vector.shape_cast %597 : vector<1x10x8xbf16> to vector<10x8xbf16>
    %cst_565 = arith.constant dense<0.000000e+00> : vector<64x8xf32>
    %599 = tpu.matmul %596, %598, %cst_565 {dimension_numbers = #tpu.dot_dimension_numbers<[1], [0], [0], [1], [0, 0, 1, 1], [], []>} : vector<64x10xbf16>, vector<10x8xbf16>, vector<64x8xf32> -> vector<64x8xf32>
    %600 = arith.addf %593, %599 : vector<64x8xf32>
    %c4_566 = arith.constant 4 : index
    %c3_567 = arith.constant 3 : index
    %c0_568 = arith.constant 0 : index
    %601 = vector.load %arg32[%c4_566, %c3_567, %c0_568] : memref<12x12x32xf32, #tpu.memory_space<vmem>>, vector<8x8x10xf32>
    %602 = vector.shape_cast %601 : vector<8x8x10xf32> to vector<64x10xf32>
    %603 = arith.truncf %602 : vector<64x10xf32> to vector<64x10xbf16>
    %c23_569 = arith.constant 23 : index
    %c0_570 = arith.constant 0 : index
    %c0_571 = arith.constant 0 : index
    %604 = vector.load %arg18[%c23_569, %c0_570, %c0_571] : memref<25x10x8xbf16, #tpu.memory_space<vmem>>, vector<1x10x8xbf16>
    %605 = vector.shape_cast %604 : vector<1x10x8xbf16> to vector<10x8xbf16>
    %cst_572 = arith.constant dense<0.000000e+00> : vector<64x8xf32>
    %606 = tpu.matmul %603, %605, %cst_572 {dimension_numbers = #tpu.dot_dimension_numbers<[1], [0], [0], [1], [0, 0, 1, 1], [], []>} : vector<64x10xbf16>, vector<10x8xbf16>, vector<64x8xf32> -> vector<64x8xf32>
    %607 = arith.addf %600, %606 : vector<64x8xf32>
    %c4_573 = arith.constant 4 : index
    %c4_574 = arith.constant 4 : index
    %c0_575 = arith.constant 0 : index
    %608 = vector.load %arg32[%c4_573, %c4_574, %c0_575] : memref<12x12x32xf32, #tpu.memory_space<vmem>>, vector<8x8x10xf32>
    %609 = vector.shape_cast %608 : vector<8x8x10xf32> to vector<64x10xf32>
    %610 = arith.truncf %609 : vector<64x10xf32> to vector<64x10xbf16>
    %c24_576 = arith.constant 24 : index
    %c0_577 = arith.constant 0 : index
    %c0_578 = arith.constant 0 : index
    %611 = vector.load %arg18[%c24_576, %c0_577, %c0_578] : memref<25x10x8xbf16, #tpu.memory_space<vmem>>, vector<1x10x8xbf16>
    %612 = vector.shape_cast %611 : vector<1x10x8xbf16> to vector<10x8xbf16>
    %cst_579 = arith.constant dense<0.000000e+00> : vector<64x8xf32>
    %613 = tpu.matmul %610, %612, %cst_579 {dimension_numbers = #tpu.dot_dimension_numbers<[1], [0], [0], [1], [0, 0, 1, 1], [], []>} : vector<64x10xbf16>, vector<10x8xbf16>, vector<64x8xf32> -> vector<64x8xf32>
    %614 = arith.addf %607, %613 : vector<64x8xf32>
    %c0_580 = arith.constant 0 : index
    %c0_581 = arith.constant 0 : index
    %615 = vector.load %arg19[%c0_580, %c0_581] : memref<1x8xf32, #tpu.memory_space<vmem>>, vector<1x8xf32>
    %616 = vector.broadcast %615 : vector<1x8xf32> to vector<64x8xf32>
    %617 = arith.addf %614, %616 : vector<64x8xf32>
    %cst_582 = arith.constant 0.000000e+00 : f32
    %618 = vector.broadcast %cst_582 : f32 to vector<64x8xf32>
    %619 = arith.maximumf %617, %618 : vector<64x8xf32>
    %620 = arith.truncf %619 : vector<64x8xf32> to vector<64x8xbf16>
    %c0_583 = arith.constant 0 : index
    %c0_584 = arith.constant 0 : index
    %621 = vector.load %arg20[%c0_583, %c0_584] : memref<8x4xbf16, #tpu.memory_space<vmem>>, vector<8x4xbf16>
    %cst_585 = arith.constant dense<0.000000e+00> : vector<64x4xf32>
    %622 = tpu.matmul %620, %621, %cst_585 {dimension_numbers = #tpu.dot_dimension_numbers<[1], [0], [0], [1], [0, 0, 1, 1], [], []>} : vector<64x8xbf16>, vector<8x4xbf16>, vector<64x4xf32> -> vector<64x4xf32>
    %c0_586 = arith.constant 0 : index
    %c0_587 = arith.constant 0 : index
    %623 = vector.load %arg21[%c0_586, %c0_587] : memref<1x4xf32, #tpu.memory_space<vmem>>, vector<1x4xf32>
    %624 = vector.broadcast %623 : vector<1x4xf32> to vector<64x4xf32>
    %625 = arith.addf %622, %624 : vector<64x4xf32>
    %cst_588 = arith.constant 0.000000e+00 : f32
    %626 = vector.broadcast %cst_588 : f32 to vector<64x4xf32>
    %627 = arith.maximumf %625, %626 : vector<64x4xf32>
    %628 = arith.truncf %627 : vector<64x4xf32> to vector<64x4xbf16>
    %c0_589 = arith.constant 0 : index
    %c0_590 = arith.constant 0 : index
    %629 = vector.load %arg22[%c0_589, %c0_590] : memref<4x1xbf16, #tpu.memory_space<vmem>>, vector<4x1xbf16>
    %cst_591 = arith.constant dense<0.000000e+00> : vector<64x1xf32>
    %630 = tpu.matmul %628, %629, %cst_591 {dimension_numbers = #tpu.dot_dimension_numbers<[1], [0], [0], [1], [0, 0, 1, 1], [], []>} : vector<64x4xbf16>, vector<4x1xbf16>, vector<64x1xf32> -> vector<64x1xf32>
    %c0_592 = arith.constant 0 : index
    %c0_593 = arith.constant 0 : index
    %631 = vector.load %arg23[%c0_592, %c0_593] : memref<1x1xf32, #tpu.memory_space<vmem>>, vector<1x1xf32>
    %632 = vector.broadcast %631 : vector<1x1xf32> to vector<64x1xf32>
    %633 = arith.addf %630, %632 : vector<64x1xf32>
    %cst_594 = arith.constant dense<0xFF800000> : vector<1xf32>
    %634 = vector.multi_reduction <maximumf>, %633, %cst_594 [0] : vector<64x1xf32> to vector<1xf32>
    %635 = vector.shape_cast %634 : vector<1xf32> to vector<1x1xf32>
    %636 = vector.broadcast %635 : vector<1x1xf32> to vector<64x1xf32>
    %637 = arith.subf %633, %636 : vector<64x1xf32>
    %638 = math.exp %637 : vector<64x1xf32>
    %cst_595 = arith.constant dense<0.000000e+00> : vector<1xf32>
    %639 = vector.multi_reduction <add>, %638, %cst_595 [0] : vector<64x1xf32> to vector<1xf32>
    %640 = vector.shape_cast %639 : vector<1xf32> to vector<1x1xf32>
    %641 = vector.broadcast %640 : vector<1x1xf32> to vector<64x1xf32>
    %642 = arith.divf %638, %641 : vector<64x1xf32>
    %c0_596 = arith.constant 0 : index
    %c0_597 = arith.constant 0 : index
    %c0_598 = arith.constant 0 : index
    %643 = vector.load %arg30[%c0_596, %c0_597, %c0_598] : memref<1x64x1xf32, #tpu.memory_space<vmem>>, vector<1x64x1xf32>
    %644 = vector.shape_cast %643 : vector<1x64x1xf32> to vector<64x1xf32>
    %645 = vector.shape_cast %642 : vector<64x1xf32> to vector<1x64x1xf32>
    tpu.vector_store %arg30[%c0_596, %c0_597, %c0_598], %645 {strides = array<i32>} : memref<1x64x1xf32, #tpu.memory_space<vmem>>, vector<1x64x1xf32>,
    %646 = arith.truncf %619 : vector<64x8xf32> to vector<64x8xbf16>
    %c0_599 = arith.constant 0 : index
    %c0_600 = arith.constant 0 : index
    %647 = vector.load %arg24[%c0_599, %c0_600] : memref<8x1xbf16, #tpu.memory_space<vmem>>, vector<8x1xbf16>
    %cst_601 = arith.constant dense<0.000000e+00> : vector<64x1xf32>
    %648 = tpu.matmul %646, %647, %cst_601 {dimension_numbers = #tpu.dot_dimension_numbers<[1], [0], [0], [1], [0, 0, 1, 1], [], []>} : vector<64x8xbf16>, vector<8x1xbf16>, vector<64x1xf32> -> vector<64x1xf32>
    %c0_602 = arith.constant 0 : index
    %c0_603 = arith.constant 0 : index
    %649 = vector.load %arg25[%c0_602, %c0_603] : memref<1x1xf32, #tpu.memory_space<vmem>>, vector<1x1xf32>
    %650 = vector.broadcast %649 : vector<1x1xf32> to vector<64x1xf32>
    %651 = arith.addf %648, %650 : vector<64x1xf32>
    %cst_604 = arith.constant 0.000000e+00 : f32
    %652 = vector.broadcast %cst_604 : f32 to vector<64x1xf32>
    %653 = arith.maximumf %651, %652 : vector<64x1xf32>
    %c0_605 = arith.constant 0 : index
    %c0_606 = arith.constant 0 : index
    %654 = vector.load %arg26[%c0_605, %c0_606] : memref<64x64xbf16, #tpu.memory_space<vmem>>, vector<64x64xbf16>
    %655 = arith.truncf %653 : vector<64x1xf32> to vector<64x1xbf16>
    %cst_607 = arith.constant dense<0.000000e+00> : vector<64x1xf32>
    %656 = tpu.matmul %654, %655, %cst_607 {dimension_numbers = #tpu.dot_dimension_numbers<[1], [0], [0], [1], [0, 0, 1, 1], [], []>} : vector<64x64xbf16>, vector<64x1xbf16>, vector<64x1xf32> -> vector<64x1xf32>
    %c0_608 = arith.constant 0 : index
    %c0_609 = arith.constant 0 : index
    %657 = vector.load %arg27[%c0_608, %c0_609] : memref<64x1xf32, #tpu.memory_space<vmem>>, vector<64x1xf32>
    %658 = arith.addf %656, %657 : vector<64x1xf32>
    %cst_610 = arith.constant 0.000000e+00 : f32
    %659 = vector.broadcast %cst_610 : f32 to vector<64x1xf32>
    %660 = arith.maximumf %658, %659 : vector<64x1xf32>
    %c0_611 = arith.constant 0 : index
    %c0_612 = arith.constant 0 : index
    %661 = vector.load %arg28[%c0_611, %c0_612] : memref<1x64xbf16, #tpu.memory_space<vmem>>, vector<1x64xbf16>
    %662 = arith.truncf %660 : vector<64x1xf32> to vector<64x1xbf16>
    %cst_613 = arith.constant dense<0.000000e+00> : vector<1x1xf32>
    %663 = tpu.matmul %661, %662, %cst_613 {dimension_numbers = #tpu.dot_dimension_numbers<[1], [0], [0], [1], [0, 0, 1, 1], [], []>} : vector<1x64xbf16>, vector<64x1xbf16>, vector<1x1xf32> -> vector<1x1xf32>
    %c0_614 = arith.constant 0 : index
    %c0_615 = arith.constant 0 : index
    %664 = vector.load %arg29[%c0_614, %c0_615] : memref<1x1xf32, #tpu.memory_space<vmem>>, vector<1x1xf32>
    %665 = arith.addf %663, %664 : vector<1x1xf32>
    %666 = math.tanh %665 : vector<1x1xf32>
    %c0_616 = arith.constant 0 : index
    %c0_617 = arith.constant 0 : index
    %c0_618 = arith.constant 0 : index
    %667 = vector.load %arg31[%c0_616, %c0_617, %c0_618] : memref<1x1x1xf32, #tpu.memory_space<vmem>>, vector<1x1x1xf32>
    %668 = vector.shape_cast %667 : vector<1x1x1xf32> to vector<1x1xf32>
    %669 = vector.shape_cast %666 : vector<1x1xf32> to vector<1x1x1xf32>
    tpu.vector_store %arg31[%c0_616, %c0_617, %c0_618], %669 {strides = array<i32>} : memref<1x1x1xf32, #tpu.memory_space<vmem>>, vector<1x1x1xf32>,
    return
  }
  func.func @transform_0(%arg0: i32) -> (i32, i32, i32, i32) {
    %c0_i32 = arith.constant 0 : i32
    %c0_i32_0 = arith.constant 0 : i32
    %c0_i32_1 = arith.constant 0 : i32
    %c0_i32_2 = arith.constant 0 : i32
    return %arg0, %c0_i32, %c0_i32_0, %c0_i32_1 : i32, i32, i32, i32
  }
  func.func @transform_1(%arg0: i32) -> (i32, i32, i32) {
    %c0_i32 = arith.constant 0 : i32
    %c0_i32_0 = arith.constant 0 : i32
    %c0_i32_1 = arith.constant 0 : i32
    %c0_i32_2 = arith.constant 0 : i32
    return %c0_i32, %c0_i32_0, %c0_i32_1 : i32, i32, i32
  }
  func.func @transform_2(%arg0: i32) -> (i32, i32) {
    %c0_i32 = arith.constant 0 : i32
    %c0_i32_0 = arith.constant 0 : i32
    %c0_i32_1 = arith.constant 0 : i32
    return %c0_i32, %c0_i32_0 : i32, i32
  }
  func.func @transform_3(%arg0: i32) -> (i32, i32) {
    %c0_i32 = arith.constant 0 : i32
    %c0_i32_0 = arith.constant 0 : i32
    %c0_i32_1 = arith.constant 0 : i32
    return %c0_i32, %c0_i32_0 : i32, i32
  }
  func.func @transform_4(%arg0: i32) -> (i32, i32) {
    %c0_i32 = arith.constant 0 : i32
    %c0_i32_0 = arith.constant 0 : i32
    %c0_i32_1 = arith.constant 0 : i32
    return %c0_i32, %c0_i32_0 : i32, i32
  }
  func.func @transform_5(%arg0: i32) -> (i32, i32, i32) {
    %c0_i32 = arith.constant 0 : i32
    %c0_i32_0 = arith.constant 0 : i32
    %c0_i32_1 = arith.constant 0 : i32
    %c0_i32_2 = arith.constant 0 : i32
    return %c0_i32, %c0_i32_0, %c0_i32_1 : i32, i32, i32
  }
  func.func @transform_6(%arg0: i32) -> (i32, i32) {
    %c0_i32 = arith.constant 0 : i32
    %c0_i32_0 = arith.constant 0 : i32
    %c0_i32_1 = arith.constant 0 : i32
    return %c0_i32, %c0_i32_0 : i32, i32
  }
  func.func @transform_7(%arg0: i32) -> (i32, i32) {
    %c0_i32 = arith.constant 0 : i32
    %c0_i32_0 = arith.constant 0 : i32
    %c0_i32_1 = arith.constant 0 : i32
    return %c0_i32, %c0_i32_0 : i32, i32
  }
  func.func @transform_8(%arg0: i32) -> (i32, i32) {
    %c0_i32 = arith.constant 0 : i32
    %c0_i32_0 = arith.constant 0 : i32
    %c0_i32_1 = arith.constant 0 : i32
    return %c0_i32, %c0_i32_0 : i32, i32
  }
  func.func @transform_9(%arg0: i32) -> (i32, i32) {
    %c0_i32 = arith.constant 0 : i32
    %c0_i32_0 = arith.constant 0 : i32
    %c0_i32_1 = arith.constant 0 : i32
    return %c0_i32, %c0_i32_0 : i32, i32
  }
  func.func @transform_10(%arg0: i32) -> (i32, i32) {
    %c0_i32 = arith.constant 0 : i32
    %c0_i32_0 = arith.constant 0 : i32
    %c0_i32_1 = arith.constant 0 : i32
    return %c0_i32, %c0_i32_0 : i32, i32
  }
  func.func @transform_11(%arg0: i32) -> (i32, i32, i32) {
    %c0_i32 = arith.constant 0 : i32
    %c0_i32_0 = arith.constant 0 : i32
    %c0_i32_1 = arith.constant 0 : i32
    %c0_i32_2 = arith.constant 0 : i32
    return %c0_i32, %c0_i32_0, %c0_i32_1 : i32, i32, i32
  }
  func.func @transform_12(%arg0: i32) -> (i32, i32) {
    %c0_i32 = arith.constant 0 : i32
    %c0_i32_0 = arith.constant 0 : i32
    %c0_i32_1 = arith.constant 0 : i32
    return %c0_i32, %c0_i32_0 : i32, i32
  }
  func.func @transform_13(%arg0: i32) -> (i32, i32) {
    %c0_i32 = arith.constant 0 : i32
    %c0_i32_0 = arith.constant 0 : i32
    %c0_i32_1 = arith.constant 0 : i32
    return %c0_i32, %c0_i32_0 : i32, i32
  }
  func.func @transform_14(%arg0: i32) -> (i32, i32) {
    %c0_i32 = arith.constant 0 : i32
    %c0_i32_0 = arith.constant 0 : i32
    %c0_i32_1 = arith.constant 0 : i32
    return %c0_i32, %c0_i32_0 : i32, i32
  }
  func.func @transform_15(%arg0: i32) -> (i32, i32, i32) {
    %c0_i32 = arith.constant 0 : i32
    %c0_i32_0 = arith.constant 0 : i32
    %c0_i32_1 = arith.constant 0 : i32
    %c0_i32_2 = arith.constant 0 : i32
    return %c0_i32, %c0_i32_0, %c0_i32_1 : i32, i32, i32
  }
  func.func @transform_16(%arg0: i32) -> (i32, i32) {
    %c0_i32 = arith.constant 0 : i32
    %c0_i32_0 = arith.constant 0 : i32
    %c0_i32_1 = arith.constant 0 : i32
    return %c0_i32, %c0_i32_0 : i32, i32
  }
  func.func @transform_17(%arg0: i32) -> (i32, i32, i32) {
    %c0_i32 = arith.constant 0 : i32
    %c0_i32_0 = arith.constant 0 : i32
    %c0_i32_1 = arith.constant 0 : i32
    %c0_i32_2 = arith.constant 0 : i32
    return %c0_i32, %c0_i32_0, %c0_i32_1 : i32, i32, i32
  }
  func.func @transform_18(%arg0: i32) -> (i32, i32) {
    %c0_i32 = arith.constant 0 : i32
    %c0_i32_0 = arith.constant 0 : i32
    %c0_i32_1 = arith.constant 0 : i32
    return %c0_i32, %c0_i32_0 : i32, i32
  }
  func.func @transform_19(%arg0: i32) -> (i32, i32) {
    %c0_i32 = arith.constant 0 : i32
    %c0_i32_0 = arith.constant 0 : i32
    %c0_i32_1 = arith.constant 0 : i32
    return %c0_i32, %c0_i32_0 : i32, i32
  }
  func.func @transform_20(%arg0: i32) -> (i32, i32) {
    %c0_i32 = arith.constant 0 : i32
    %c0_i32_0 = arith.constant 0 : i32
    %c0_i32_1 = arith.constant 0 : i32
    return %c0_i32, %c0_i32_0 : i32, i32
  }
  func.func @transform_21(%arg0: i32) -> (i32, i32) {
    %c0_i32 = arith.constant 0 : i32
    %c0_i32_0 = arith.constant 0 : i32
    %c0_i32_1 = arith.constant 0 : i32
    return %c0_i32, %c0_i32_0 : i32, i32
  }
  func.func @transform_22(%arg0: i32) -> (i32, i32) {
    %c0_i32 = arith.constant 0 : i32
    %c0_i32_0 = arith.constant 0 : i32
    %c0_i32_1 = arith.constant 0 : i32
    return %c0_i32, %c0_i32_0 : i32, i32
  }
  func.func @transform_23(%arg0: i32) -> (i32, i32) {
    %c0_i32 = arith.constant 0 : i32
    %c0_i32_0 = arith.constant 0 : i32
    %c0_i32_1 = arith.constant 0 : i32
    return %c0_i32, %c0_i32_0 : i32, i32
  }
  func.func @transform_24(%arg0: i32) -> (i32, i32) {
    %c0_i32 = arith.constant 0 : i32
    %c0_i32_0 = arith.constant 0 : i32
    %c0_i32_1 = arith.constant 0 : i32
    return %c0_i32, %c0_i32_0 : i32, i32
  }
  func.func @transform_25(%arg0: i32) -> (i32, i32) {
    %c0_i32 = arith.constant 0 : i32
    %c0_i32_0 = arith.constant 0 : i32
    %c0_i32_1 = arith.constant 0 : i32
    return %c0_i32, %c0_i32_0 : i32, i32
  }
  func.func @transform_26(%arg0: i32) -> (i32, i32) {
    %c0_i32 = arith.constant 0 : i32
    %c0_i32_0 = arith.constant 0 : i32
    %c0_i32_1 = arith.constant 0 : i32
    return %c0_i32, %c0_i32_0 : i32, i32
  }
  func.func @transform_27(%arg0: i32) -> (i32, i32) {
    %c0_i32 = arith.constant 0 : i32
    %c0_i32_0 = arith.constant 0 : i32
    %c0_i32_1 = arith.constant 0 : i32
    return %c0_i32, %c0_i32_0 : i32, i32
  }
  func.func @transform_28(%arg0: i32) -> (i32, i32) {
    %c0_i32 = arith.constant 0 : i32
    %c0_i32_0 = arith.constant 0 : i32
    %c0_i32_1 = arith.constant 0 : i32
    return %c0_i32, %c0_i32_0 : i32, i32
  }
  func.func @transform_29(%arg0: i32) -> (i32, i32, i32) {
    %c0_i32 = arith.constant 0 : i32
    %c0_i32_0 = arith.constant 0 : i32
    %c0_i32_1 = arith.constant 0 : i32
    return %arg0, %c0_i32, %c0_i32_0 : i32, i32, i32
  }
  func.func @transform_30(%arg0: i32) -> (i32, i32, i32) {
    %c0_i32 = arith.constant 0 : i32
    %c0_i32_0 = arith.constant 0 : i32
    %c0_i32_1 = arith.constant 0 : i32
    return %arg0, %c0_i32, %c0_i32_0 : i32, i32, i32
  }
}

</mosaic_0001>

<bundles_post_ra>
// kernel: conv_skip_nn_forward.1
= control target key start
LH: loop header
LB: loop body
LE: loop exit
PB: predicated region body
PF: predicated region fallthrough
CT: control target
= control target key end

     0   :  { %s12945_s6 = smov 1   ;;  %s12946_s10 = smov 2   ;;  %s14801_s0 = inlined_call_operand.smem [shape: u32[31], index: -1, kind: input, shape index: {}] }
   0x1   :  { %s12986_s5 = sld [smem:[%s14801_s0]]   ;;  %s12947_s14 = smov 3  }
   0x2   :  { %s12991_s9 = sld [smem:[%s14801_s0 + %s12945_s6]]   ;;  %s12948_s18 = smov 4  }
   0x3   :  { %s12996_s13 = sld [smem:[%s14801_s0 + %s12946_s10]]   ;;  %s12949_s22 = smov 5  }
   0x4   :  { %s13001_s17 = sld [smem:[%s14801_s0 + %s12947_s14]]   ;;  %s12950_s26 = smov 6  }
   0x5   :  { %s13006_s21 = sld [smem:[%s14801_s0 + %s12948_s18]]   ;;  %s12951_s30 = smov 7  }
   0x6   :  { %s13011_s25 = sld [smem:[%s14801_s0 + %s12949_s22]]   ;;  %s12952_s4 = smov 8  }
   0x7   :  { %s13016_s29 = sld [smem:[%s14801_s0 + %s12950_s26]]   ;;  %s12953_s10 = smov 9  }
   0x8   :  { %s13021_s3 = sld [smem:[%s14801_s0 + %s12951_s30]]   ;;  %s12954_s15 = smov 10  }
   0x9   :  { %s13026_s8 = sld [smem:[%s14801_s0 + %s12952_s4]]   ;;  %s12955_s20 = smov 11  }
   0xa   :  { %s13031_s14 = sld [smem:[%s14801_s0 + %s12953_s10]]   ;;  %s12956_s26 = smov 12  }
   0xb   :  { %s13036_s19 = sld [smem:[%s14801_s0 + %s12954_s15]]   ;;  %s12957_s1 = smov 13  }
   0xc   :  { %s13041_s24 = sld [smem:[%s14801_s0 + %s12955_s20]]   ;;  %s12958_s7 = smov 14  }
   0xd   :  { %s13046_s30 = sld [smem:[%s14801_s0 + %s12956_s26]]   ;;  %s12959_s15 = smov 15  }
   0xe   :  { %s13051_s6 = sld [smem:[%s14801_s0 + %s12957_s1]]   ;;  %s12960_s22 = smov 16  }
   0xf   :  { %s13056_s12 = sld [smem:[%s14801_s0 + %s12958_s7]]   ;;  %s12961_s28 = smov 17  }
  0x10   :  { %s13061_s20 = sld [smem:[%s14801_s0 + %s12959_s15]]   ;;  %s12962_s7 = smov 18  }
  0x11   :  { %s13066_s27 = sld [smem:[%s14801_s0 + %s12960_s22]]   ;;  %s12963_s15 = smov 19  }
  0x12   :  { %s13071_s4 = sld [smem:[%s14801_s0 + %s12961_s28]]   ;;  %s12964_s22 = smov 20  }
  0x13   :  { %14811 = sst [smem:[#allocation6_spill]] %s13046_s30  ;;  %s12965_s28 = smov 21  }
  0x14   :  { %s12967_s16 = smov 23   ;;  %s12968_s23 = smov 25  }
  0x15   :  { %14812 = sst [smem:[#allocation7_spill]] %s13056_s12  ;;  %s12969_s1 = smov 26  }
  0x16   :  { %14813 = sst [smem:[#allocation8_spill]] %s13061_s20  ;;  %s12970_s10 = smov 27  }
  0x17   :  { %14814 = sst [smem:[#allocation9_spill]] %s13066_s27 }
  0x18   :  { %14815 = sst [smem:[#allocation10_spill]] %s13071_s4 }
  0x19   :  { %s13076_s12 = sld [smem:[%s14801_s0 + %s12962_s7]]   ;;  %s12966_s7 = smov 22  }
  0x1a   :  { %s13081_s20 = sld [smem:[%s14801_s0 + %s12963_s15]]  }
  0x1b   :  { %s13086_s27 = sld [smem:[%s14801_s0 + %s12964_s22]]  }
  0x1c   :  { %s13091_s4 = sld [smem:[%s14801_s0 + %s12965_s28]]  }
  0x1d   :  { %s13114_s30 = sld [smem:[%s14801_s0 + %s12970_s10]]  }
  0x1f   :  { %14816 = sst [smem:[#allocation11_spill]] %s13076_s12 }
  0x20   :  { %14817 = sst [smem:[#allocation12_spill]] %s13081_s20 }
  0x21   :  { %14818 = sst [smem:[#allocation13_spill]] %s13086_s27 }
  0x22   :  { %14819 = sst [smem:[#allocation14_spill]] %s13091_s4 }
  0x23   :  { %s10295_s12 = sld [smem:[%s14801_s0 + %s12966_s7]]   ;;  %s12974_s7 = smov 28  }
  0x24   :  { %s13099_s20 = sld [smem:[%s14801_s0 + %s12967_s16]]   ;;  %s12971_s16 = smov 29  }
  0x25   :  { %s13104_s27 = sld [smem:[%s14801_s0 + %s12968_s23]]   ;;  %s12972_s23 = smov 30  }
  0x26   :  { %s13109_s4 = sld [smem:[%s14801_s0 + %s12969_s1]]   ;;  %s12973_s1 = smov 24  }
  0x27   :  { %14822 = sst [smem:[#allocation17_spill]] %s13114_s30 }
  0x28   :  { %s10297_s10 = sld [smem:[%s14801_s0 + %s12973_s1]]  }
  0x29   :  { %v67_v0 = vstv %s10295_s12  ;;  %s10301_s15 = sld [smem:[%s14801_s0 + %s12974_s7]]  }
  0x2a   :  { %14820 = sst [smem:[#allocation15_spill]] %s13099_s20  ;;  %68 = vst [vmem:[#allocation3] sm:$0x1] %v67_v0 }
  0x2b   :  { %14821 = sst [smem:[#allocation16_spill]] %s13104_s27 }
  0x2c   :  { %s13119_s20 = sld [smem:[%s14801_s0 + %s12971_s16]]   ;;  %s13132_s16 = smov 0  }
  0x2d   :  { %s13124_s27 = sld [smem:[%s14801_s0 + %s12972_s23]]  }
  0x2e   :  { %v69_v1 = vstv %s10297_s10 }
  0x2f   :  { %70 = vst [vmem:[#allocation4] sm:$0x1] %v69_v1  ;;  %v71_v2 = vstv %s10301_s15 }
  0x30   :  { %72 = vst [vmem:[#allocation5] sm:$0x1] %v71_v2 }
  0x31 LB: > { %s10304_s12 = sadd.s32 4294967295, %s12943_s16   ;;  %p10308_p0 = scmp.ge.s32.totalorder %s12943_s16, 1  ;;  %s12943_s16 = sphi %s13132_s16, %s78_s16  }
  0x32   : > { %p852_p1 = scmp.lt.s32.totalorder %s12943_s16, 3 }
  0x34   : > { %p853_p2 = pnand %p10308_p0, %p852_p1 }
  0x36   : > { %856 = sbr.rel (%p853_p2) target bundleno = 4097 (0x1001), region = 136 }
  0x3d   : > { %vm1030_vm0 = vcmask 1040384   ;;  %v10347_v3 = vld [vmem:[%s12991_s9 + $0x7] sm:$0x1]  ;;  %p13141_p3 = scmp.lt.s32.totalorder %s10304_s12, 1  ;;  %vm947_vm1 = vcmask 261120   ;;  %vm949_vm2 = vcmask 257024  }
  0x3e   : > { %12758 = vmatprep.subr.msk.bf16.mxu0 %vm1030_vm0, %v10347_v3  ;;  %v1717_v4 = vsel %vm1030_vm0, %v10347_v3, 0  ;;  %v14805_v5 = vmov 0.0   ;;  %v10352_v6 = vld [vmem:[%s12991_s9 + $0x8] sm:$0x1]  ;;  %vm982_vm3 = vcmask 15360   ;;  %vm3711_vm4 = vcmask 1043456  }
  0x3f   : > { %951 = vst.msk [vmem:[#allocation2 + $0x10] sm:$0xff] %vm947_vm1, %v14805_v5  ;;  %953 = vst.msk [vmem:[#allocation2 + $0x20] sm:$0xff] %vm947_vm1, %v14805_v5  ;;  %11356 = vmatpush3.bf16.msra.mxu0 %v1717_v4  ;;  %s14846_s12 = smov (!%p13141_p3, %s10304_s12), 1  ;;  %v10313_v7 = vld [vmem:[%s12991_s9 + $0x1] sm:$0x1]  ;;  %v1819_v29 = vsel %vm1030_vm0, %v10352_v6, 0 }
  0x40   : > { %948 = vst.msk [vmem:[#allocation2] sm:$0xff] %vm947_vm1, %v14805_v5  ;;  %955 = vst.msk [vmem:[#allocation2 + $0x30] sm:$0xff] %vm947_vm1, %v14805_v5  ;;  %12759 = vmatprep.subr.msk.bf16.mxu0 %vm1030_vm0, %v10352_v6  ;;  %s10839_s30 = sshll.u32 %s14846_s12, 6  ;;  %12751 = vmatprep.subr.msk.bf16.mxu1 %vm1030_vm0, %v10313_v7  ;;  %v1032_v8 = vsel %vm1030_vm0, %v10313_v7, 0  ;;  %v1003_v9 = vld [vmem:[%s12991_s9] sm:$0x1] }
  0x41   : > { %957 = vst.msk [vmem:[#allocation2 + $0x40] sm:$0xff] %vm947_vm1, %v14805_v5  ;;  %959 = vst.msk [vmem:[#allocation2 + $0x50] sm:$0xff] %vm947_vm1, %v14805_v5  ;;  %s937_s18 = scalar_lea.vmem %s12986_s5, %s10839_s30  ;;  %11286 = vmatpush3.bf16.msra.mxu1 %v1032_v8  ;;  %v10357_v31 = vld [vmem:[%s12991_s9 + $0x9] sm:$0x1]  ;;  %v1112_v43 = vsel %vm1030_vm0, %v1003_v9, 0  ;;  %vm3663_vm5 = vcmask 64512  }
  0x42   : > { %961 = vst.msk [vmem:[#allocation2 + $0x60] sm:$0xff] %vm947_vm1, %v14805_v5  ;;  %963 = vst.msk [vmem:[#allocation2 + $0x70] sm:$0xff] %vm947_vm1, %v14805_v5  ;;  %v13209_v10 = vld [vmem:[%s937_s18] sm:$0xff]  ;;  %v13211_v11 = vld [vmem:[%s937_s18 + $0x8] sm:$0xff]  ;;  %12752 = vmatprep.subr.msk.bf16.mxu1 %vm1030_vm0, %v1003_v9  ;;  %v1921_v52 = vsel %vm1030_vm0, %v10357_v31, 0  ;;  %s14828_s23 = sld [smem:[#allocation6_spill]] }
  0x43   : > { %965 = vst.msk [vmem:[#allocation2 + $0x80] sm:$0xff] %vm947_vm1, %v14805_v5  ;;  %967 = vst.msk [vmem:[#allocation2 + $0x90] sm:$0xff] %vm947_vm1, %v14805_v5  ;;  %v13213_v12 = vld [vmem:[%s937_s18 + $0x10] sm:$0xff]  ;;  %v13221_v13 = vld [vmem:[%s937_s18 + $0x18] sm:$0xff]  ;;  %s14829_s22 = sld [smem:[#allocation8_spill]]  ;;  %s14830_s26 = sld [smem:[#allocation7_spill]] }
  0x44   : > { %969 = vst.msk [vmem:[#allocation2 + $0xa0] sm:$0xff] %vm947_vm1, %v14805_v5  ;;  %971 = vst.msk [vmem:[#allocation2 + $0xb0] sm:$0xff] %vm947_vm1, %v14805_v5  ;;  %v13223_v14 = vld [vmem:[%s937_s18 + $0x20] sm:$0xff]  ;;  %v13225_v15 = vld [vmem:[%s937_s18 + $0x28] sm:$0xff]  ;;  %s12976_s1 = smov 8   ;;  %s14835_s28 = sld [smem:[#allocation10_spill]] }
  0x45   : > { %952 = vst.msk [vmem:[#allocation2 + $0x18] sm:$0xf] %vm949_vm2, %v14805_v5  ;;  %954 = vst.msk [vmem:[#allocation2 + $0x28] sm:$0xf] %vm949_vm2, %v14805_v5  ;;  %v13232_v16 = vld [vmem:[%s937_s18 + $0x30] sm:$0xff]  ;;  %v13236_v17 = vld [vmem:[%s937_s18 + $0x38] sm:$0xff]  ;;  %6917 = vrot.lane.b32.xlu1 %v13213_v12, %s12976_s1  ;;  %6913 = vrot.lane.b32.xlu0 %v13209_v10, %s12976_s1 }
  0x46   : > { %956 = vst.msk [vmem:[#allocation2 + $0x38] sm:$0xf] %vm949_vm2, %v14805_v5  ;;  %958 = vst.msk [vmem:[#allocation2 + $0x48] sm:$0xf] %vm949_vm2, %v14805_v5  ;;  %v10322_v45 = vld [vmem:[%s12991_s9 + $0x2] sm:$0x1] }
  0x47   : > { %960 = vst.msk [vmem:[#allocation2 + $0x58] sm:$0xf] %vm949_vm2, %v14805_v5  ;;  %962 = vst.msk [vmem:[#allocation2 + $0x68] sm:$0xf] %vm949_vm2, %v14805_v5  ;;  %v991_v50 = vld [vmem:[#allocation2] sm:$0xff]  ;;  %v13323_v51 = vld [vmem:[#allocation2 + $0x10] sm:$0xff] }
  0x48   : > { %964 = vst.msk [vmem:[#allocation2 + $0x78] sm:$0xf] %vm949_vm2, %v14805_v5  ;;  %966 = vst.msk [vmem:[#allocation2 + $0x88] sm:$0xf] %vm949_vm2, %v14805_v5  ;;  %v10362_v57 = vld [vmem:[%s12991_s9 + $0xa] sm:$0x1]  ;;  %v999_v59 = vpack.c.bf16 %v13323_v51, %v991_v50 }
  0x49   : > { %968 = vst.msk [vmem:[#allocation2 + $0x98] sm:$0xf] %vm949_vm2, %v14805_v5  ;;  %950 = vst.msk [vmem:[#allocation2 + $0x8] sm:$0xf] %vm949_vm2, %v14805_v5  ;;  %v10327_v9 = vld [vmem:[%s12991_s9 + $0x3] sm:$0x1]  ;;  %6919 = vrot.lane.b32.xlu1 %v13221_v13, %s12976_s1  ;;  %6915 = vrot.lane.b32.xlu0 %v13211_v11, %s12976_s1 }
  0x4a   : > { %970 = vst.msk [vmem:[#allocation2 + $0xa8] sm:$0xf] %vm949_vm2, %v14805_v5  ;;  %972 = vst.msk [vmem:[#allocation2 + $0xb8] sm:$0xf] %vm949_vm2, %v14805_v5  ;;  %s14836_s2 = sld [smem:[#allocation9_spill]]  ;;  %vm6993_vm6 = vcmask 1044480  }
  0x4b   : > { %983 = vst.msk [vmem:[#allocation2 + $0x22] sm:$0xff] %vm982_vm3, %v13209_v10  ;;  %984 = vst.msk [vmem:[#allocation2 + $0x32] sm:$0xff] %vm982_vm3, %v13211_v11  ;;  %v12875_v10 = vld [vmem:[%s14829_s22 + $0x30] sm:$0xff]   ;;  %vm6980_vm7 = vcmask 80896   ;;  %vm6937_vm8 = vcmask 80960   ;;  %s14837_s10 = sld [smem:[#allocation12_spill]] }
  0x4c   : > { %985 = vst.msk [vmem:[#allocation2 + $0x42] sm:$0xff] %vm982_vm3, %v13213_v12  ;;  %14824 = vst [vmem:[#allocation18_spill] sm:$0xff] %v13223_v14  ;;  %v13242_v19 = vld [vmem:[#allocation2 + $0x11] sm:$0xff]  ;;  %s14838_s7 = sld [smem:[#allocation14_spill]]  ;;  %s14839_s11 = sld [smem:[#allocation11_spill]]  ;;  %vm9779_vm9 = vcmask 1041408  }
  0x4d   : > { %14825 = vst [vmem:[#allocation19_spill] sm:$0xff] %v13225_v15  ;;  %986 = vst.msk [vmem:[#allocation2 + $0x52] sm:$0xff] %vm982_vm3, %v13221_v13  ;;  %v13245_v21 = vld [vmem:[#allocation2 + $0x12] sm:$0xff]  ;;  %s14840_s15 = sld [smem:[#allocation15_spill]]  ;;  %s14841_s0 = sld [smem:[#allocation13_spill]]  ;;  %vm9766_vm10 = vcmask 31744  }
  0x4e   : > { %987 = vst.msk [vmem:[#allocation2 + $0x62] sm:$0xff] %vm982_vm3, %v13223_v14  ;;  %14826 = vst [vmem:[#allocation20_spill] sm:$0xff] %v13232_v16  ;;  %v13279_v34 = vld [vmem:[#allocation2 + $0x13] sm:$0xff]  ;;  %s14842_s18 = sld [smem:[#allocation16_spill]]  ;;  %vm10056_vm11 = vcmask 523264   ;;  %vm9848_vm12 = vcmask 7168  }
  0x4f   : > { %988 = vst.msk [vmem:[#allocation2 + $0x72] sm:$0xff] %vm982_vm3, %v13225_v15  ;;  %14827 = vst [vmem:[#allocation21_spill] sm:$0xff] %v13236_v17  ;;  %v13347_v61 = vld [vmem:[#allocation2 + $0x14] sm:$0xff]  ;;  %vm12977_vm13 = vmmov 0   ;;  %vm10192_vm14 = vcmask 0  }
  0x50   : > { %989 = vst.msk [vmem:[#allocation2 + $0x82] sm:$0xff] %vm982_vm3, %v13232_v16  ;;  %990 = vst.msk [vmem:[#allocation2 + $0x92] sm:$0xff] %vm982_vm3, %v13236_v17  ;;  %v1004_v18 = vld [vmem:[#allocation2 + $0x1] sm:$0xff]  ;;  %v1308_v16 = vsel %vm1030_vm0, %v10327_v9, 0 }
  0x51   : > { %v1012_v20 = vpack.c.bf16 %v13242_v19, %v1004_v18  ;;  %v1281_v14 = vld [vmem:[#allocation2 + $0x3] sm:$0xff] }
  0x52   : > { %v13248_v22 = vld [vmem:[#allocation2 + $0x22] sm:$0xff]  ;;  %v13250_v23 = vld [vmem:[#allocation2 + $0x32] sm:$0xff] }
  0x53   : > { %11287 = vmatprep.mubr.msk.bf16.mxu1 %vm982_vm3, %v1012_v20  ;;  %v13252_v24 = vld [vmem:[#allocation2 + $0x42] sm:$0xff]  ;;  %v1698_v25 = vpack.c.bf16 %v13248_v22, %v13245_v21  ;;  %v13292_v39 = vld [vmem:[#allocation2 + $0x31] sm:$0xff] }
  0x54   : > { %v13258_v26 = vpack.c.bf16 %v13252_v24, %v13250_v23  ;;  %v13260_v27 = vld [vmem:[#allocation2 + $0x52] sm:$0xff]  ;;  %v13281_v35 = vld [vmem:[#allocation2 + $0x23] sm:$0xff] }
  0x55   : > { %v13262_v28 = vld [vmem:[#allocation2 + $0x62] sm:$0xff]  ;;  %11357 = vmatprep.mubr.msk.bf16.mxu0 %vm982_vm3, %v1698_v25  ;;  %v1800_v37 = vpack.c.bf16 %v13281_v35, %v13279_v34  ;;  %v13296_v41 = vld [vmem:[#allocation2 + $0x51] sm:$0xff]  ;;  %v1206_v25 = vsel %vm1030_vm0, %v10322_v45, 0  ;;  %v13442_v15 = vpack.c.bf16 %v13260_v27, %v13252_v24 }
  0x56   : > { %v13267_v30 = vpack.c.bf16 %v13262_v28, %v13260_v27  ;;  %11358 = vmatmul.mubr.msk.bf16.vlgmr.msra.gmra.mrb[0].mxu0 %vm982_vm3, %v13258_v26  ;;  %v13275_v32 = vld [vmem:[#allocation2 + $0x72] sm:$0xff]  ;;  %v13290_v38 = vld [vmem:[#allocation2 + $0x21] sm:$0xff] }
  0x57   : > { %11366 = vmatpush3.bf16.msra.mxu0 %v1819_v29  ;;  %v13277_v33 = vld [vmem:[#allocation2 + $0x82] sm:$0xff]  ;;  %v13300_v42 = vpack.c.bf16 %v13292_v39, %v13290_v38  ;;  %v13311_v46 = vld [vmem:[#allocation2 + $0x33] sm:$0xff]  ;;  %v2023_v29 = vsel %vm1030_vm0, %v10362_v57, 0 }
  0x58   : > { %11361 = vmatprep.mubr.msk.bf16.mxu0 %vm982_vm3, %v13267_v30  ;;  %12760 = vmatprep.subr.msk.bf16.mxu0 %vm1030_vm0, %v10357_v31  ;;  %v13286_v36 = vpack.c.bf16 %v13277_v33, %v13275_v32  ;;  %v13294_v40 = vld [vmem:[#allocation2 + $0x41] sm:$0xff]  ;;  %v13317_v48 = vld [vmem:[#allocation2 + $0x53] sm:$0xff]  ;;  %v2310_v27 = vpack.c.bf16 %v13311_v46, %v13281_v35 }
  0x59   : > { %v13307_v44 = vpack.c.bf16 %v13296_v41, %v13294_v40  ;;  %v13313_v47 = vld [vmem:[#allocation2 + $0x43] sm:$0xff]  ;;  %11288 = vmatmul.mubr.msk.bf16.vlgmr.msra.gmra.mrb[0].mxu1 %vm982_vm3, %v13300_v42  ;;  %v13328_v54 = vld [vmem:[#allocation2 + $0x71] sm:$0xff] }
  0x5a   : > { %v13319_v49 = vld [vmem:[#allocation2 + $0x63] sm:$0xff]  ;;  %11296 = vmatpush3.bf16.msra.mxu1 %v1112_v43  ;;  %v13333_v55 = vpack.c.bf16 %v13313_v47, %v13311_v46  ;;  %v13340_v58 = vld [vmem:[#allocation2 + $0x73] sm:$0xff]  ;;  %v10377_v46 = vld [vmem:[%s12991_s9 + $0xd] sm:$0x1] }
  0x5b   : > { %11291 = vmatprep.mubr.msk.bf16.mxu1 %vm982_vm3, %v13307_v44  ;;  %v13326_v53 = vld [vmem:[#allocation2 + $0x61] sm:$0xff]  ;;  %12753 = vmatprep.subr.msk.bf16.mxu1 %vm1030_vm0, %v10322_v45  ;;  %v13337_v56 = vpack.c.bf16 %v13319_v49, %v13317_v48  ;;  %v13362_v1 = vld [vmem:[#allocation2 + $0x30] sm:$0xff] }
  0x5c   : > { %v13345_v60 = vld [vmem:[#allocation2 + $0x83] sm:$0xff]  ;;  %v13351_v62 = vpack.c.bf16 %v13328_v54, %v13326_v53  ;;  %v13371_v4 = vld [vmem:[#allocation2 + $0x50] sm:$0xff] }
  0x5d   : > { %v13355_v63 = vld [vmem:[#allocation2 + $0x24] sm:$0xff]  ;;  %v13367_v2 = vpack.c.bf16 %v13345_v60, %v13340_v58  ;;  %v13375_v7 = vld [vmem:[#allocation2 + $0x34] sm:$0xff] }
  0x5e   : > { %11362 = vmatmul.mubr.msk.bf16.gmra.mrb[4].mxu0 %vm982_vm3, %v13286_v36  ;;  %v13360_v0 = vld [vmem:[#allocation2 + $0x20] sm:$0xff]  ;;  %v1902_v6 = vpack.c.bf16 %v13355_v63, %v13347_v61  ;;  %v13382_v18 = vld [vmem:[#allocation2 + $0x54] sm:$0xff] }
  0x5f   : > { %11367 = vmatprep.mubr.msk.bf16.mxu0 %vm982_vm3, %v1800_v37  ;;  %v13369_v3 = vld [vmem:[#allocation2 + $0x40] sm:$0xff]  ;;  %v2004_v20 = vpack.c.bf16 %v13362_v1, %v13360_v0  ;;  %v13415_v5 = vld [vmem:[#allocation2 + $0x74] sm:$0xff] }
  0x60   : > { %v13377_v8 = vld [vmem:[#allocation2 + $0x44] sm:$0xff]  ;;  %v13393_v37 = vpack.c.bf16 %v13371_v4, %v13369_v3 }
  0x61   : > { %11292 = vmatmul.mubr.msk.bf16.gmra.mrb[4].mxu1 %vm982_vm3, %v13351_v62  ;;  %v13389_v31 = vld [vmem:[#allocation2 + $0x64] sm:$0xff]  ;;  %v13404_v45 = vpack.c.bf16 %v13377_v8, %v13375_v7 }
  0x62   : > { %11297 = vmatprep.mubr.msk.bf16.mxu1 %vm982_vm3, %v999_v59  ;;  %v1179_v43 = vld [vmem:[#allocation2 + $0x2] sm:$0xff]  ;;  %v10367_v59 = vld [vmem:[%s12991_s9 + $0xb] sm:$0x1] }
  0x63   : > { %v13396_v50 = vld [vmem:[#allocation2 + $0x60] sm:$0xff] }
  0x64   : > { %v13423_v17 = vld [vmem:[#allocation2 + $0x84] sm:$0xff] }
  0x65   : > { %v13459_v24 = vld [vmem:[#allocation2 + $0x80] sm:$0xff] }
  0x66   : > { %11368 = vmatmul.mubr.msk.bf16.vlgmr.msra.gmra.mrb[0].mxu0 %vm982_vm3, %v13333_v55  ;;  %v14831_v12 = vld [vmem:[#allocation18_spill] sm:$0xff] }
  0x67   : > { %11376 = vmatpush3.bf16.msra.mxu0 %v1921_v52  ;;  %11371 = vmatprep.mubr.msk.bf16.mxu0 %vm982_vm3, %v13337_v56  ;;  %v13398_v52 = vld [vmem:[#allocation2 + $0x70] sm:$0xff] }
  0x68   : > { %12761 = vmatprep.subr.msk.bf16.mxu0 %vm1030_vm0, %v10362_v57  ;;  %v13409_v57 = vpack.c.bf16 %v13389_v31, %v13382_v18  ;;  %6921 = vrot.lane.b32.xlu0 %v14831_v12, %s12976_s1 }
  0x69   : > { %11298 = vmatmul.mubr.msk.bf16.vlgmr.msra.gmra.mrb[0].mxu1 %vm982_vm3, %v2004_v20 }
  0x6a   : > { %11301 = vmatprep.mubr.msk.bf16.mxu1 %vm982_vm3, %v13393_v37  ;;  %11306 = vmatpush3.bf16.msra.mxu1 %v1206_v25  ;;  %v13419_v25 = vpack.c.bf16 %v13398_v52, %v13396_v50 }
  0x6b   : > { %12754 = vmatprep.subr.msk.bf16.mxu1 %vm1030_vm0, %v10327_v9  ;;  %v1383_v9 = vld [vmem:[#allocation2 + $0x4] sm:$0xff] }
  0x6e   : > { %11372 = vmatmul.mubr.msk.bf16.gmra.mrb[4].mxu0 %vm982_vm3, %v13367_v2 }
  0x6f   : > { %11377 = vmatprep.mubr.msk.bf16.mxu0 %vm982_vm3, %v1902_v6  ;;  %v1187_v6 = vpack.c.bf16 %v13245_v21, %v1179_v43  ;;  %v13431_v21 = vpack.c.bf16 %v13423_v17, %v13415_v5  ;;  %v2208_v43 = vpack.c.bf16 %v13250_v23, %v13248_v22  ;;  %v1289_v22 = vpack.c.bf16 %v13279_v34, %v1281_v14  ;;  %v10337_v34 = vld [vmem:[%s12991_s9 + $0x5] sm:$0x1] }
  0x70   : > { %v13455_v23 = vpack.c.bf16 %v13275_v32, %v13262_v28  ;;  %v13480_v32 = vpack.c.bf16 %v13317_v48, %v13313_v47  ;;  %v2104_v47 = vld [vmem:[#allocation2 + $0x81] sm:$0xff]  ;;  %v13498_v48 = vld [vmem:[#allocation2 + $0x91] sm:$0xff] }
  0x71   : > { %11302 = vmatmul.mubr.msk.bf16.gmra.mrb[4].mxu1 %vm982_vm3, %v13419_v25 }
  0x72   : > { %11307 = vmatprep.mubr.msk.bf16.mxu1 %vm982_vm3, %v1187_v6  ;;  %v10332_v6 = vld [vmem:[%s12991_s9 + $0x4] sm:$0x1] }
  0x73   : > { %v1410_v28 = vsel %vm1030_vm0, %v10332_v6, 0 }
  0x76   : > { %11378 = vmatmul.mubr.msk.bf16.vlgmr.msra.gmra.mrb[0].mxu0 %vm982_vm3, %v13404_v45 }
  0x77   : > { %11386 = vmatpush3.bf16.msra.mxu0 %v2023_v29  ;;  %11381 = vmatprep.mubr.msk.bf16.mxu0 %vm982_vm3, %v13409_v57  ;;  %v2125_v29 = vsel %vm1030_vm0, %v10367_v59, 0 }
  0x78   : > { %12762 = vmatprep.subr.msk.bf16.mxu0 %vm1030_vm0, %v10367_v59  ;;  %v10372_v59 = vld [vmem:[%s12991_s9 + $0xc] sm:$0x1] }
  0x79   : > { %11308 = vmatmul.mubr.msk.bf16.vlgmr.msra.gmra.mrb[0].mxu1 %vm982_vm3, %v2208_v43  ;;  %v2227_v35 = vsel %vm1030_vm0, %v10372_v59, 0 }
  0x7a   : > { %11311 = vmatprep.mubr.msk.bf16.mxu1 %vm982_vm3, %v13442_v15  ;;  %11316 = vmatpush3.bf16.msra.mxu1 %v1308_v16  ;;  %v13461_v16 = vld [vmem:[#allocation2 + $0x90] sm:$0xff] }
  0x7b   : > { %12755 = vmatprep.subr.msk.bf16.mxu1 %vm1030_vm0, %v10332_v6  ;;  %v13469_v14 = vpack.c.bf16 %v13461_v16, %v13459_v24  ;;  %v10342_v6 = vld [vmem:[%s12991_s9 + $0x6] sm:$0x1] }
  0x7e   : > { %11382 = vmatmul.mubr.msk.bf16.gmra.mrb[4].mxu0 %vm982_vm3, %v13431_v21 }
  0x7f   : > { %11387 = vmatprep.mubr.msk.bf16.mxu0 %vm982_vm3, %v2004_v20  ;;  %v1391_v20 = vpack.c.bf16 %v13347_v61, %v1383_v9  ;;  %v13505_v61 = vpack.c.bf16 %v13498_v48, %v2104_v47  ;;  %v10407_v9 = vld [vmem:[%s12991_s9 + $0x13] sm:$0x1] }
  0x81   : > { %11312 = vmatmul.mubr.msk.bf16.gmra.mrb[4].mxu1 %vm982_vm3, %v13455_v23 }
  0x82   : > { %11317 = vmatprep.mubr.msk.bf16.mxu1 %vm982_vm3, %v1289_v22  ;;  %v1596_v22 = vpack.c.bf16 %v13290_v38, %v13242_v19  ;;  %v2617_v38 = vpack.c.bf16 %v13294_v40, %v13292_v39  ;;  %v2411_v39 = vld [vmem:[#allocation2 + $0x94] sm:$0xff] }
  0x83   : > { %v13589_v40 = vpack.c.bf16 %v2411_v39, %v13423_v17 }
  0x86   : > { %11388 = vmatmul.mubr.msk.bf16.vlgmr.msra.gmra.mrb[0].mxu0 %vm982_vm3, %v13393_v37 }
  0x87   : > { %11396 = vmatpush3.bf16.msra.mxu0 %v2125_v29  ;;  %11391 = vmatprep.mubr.msk.bf16.mxu0 %vm982_vm3, %v13419_v25  ;;  %v13515_v29 = vpack.c.bf16 %v13382_v18, %v13377_v8  ;;  %v13530_v8 = vpack.c.bf16 %v13415_v5, %v13389_v31  ;;  %v13534_v18 = vld [vmem:[#allocation2 + $0x92] sm:$0xff]  ;;  %v2515_v5 = vpack.c.bf16 %v13369_v3, %v13362_v1 }
  0x88   : > { %12763 = vmatprep.subr.msk.bf16.mxu0 %vm1030_vm0, %v10372_v59  ;;  %v2329_v59 = vsel %vm1030_vm0, %v10377_v46, 0  ;;  %v2516_v31 = vpack.c.bf16 %v13396_v50, %v13371_v4  ;;  %v2517_v1 = vpack.c.bf16 %v13459_v24, %v13398_v52  ;;  %v2309_v3 = vld [vmem:[#allocation2 + $0x93] sm:$0xff]  ;;  %v2618_v4 = vpack.c.bf16 %v13326_v53, %v13296_v41  ;;  %v10397_v53 = vld [vmem:[%s12991_s9 + $0x11] sm:$0x1] }
  0x89   : > { %11318 = vmatmul.mubr.msk.bf16.vlgmr.msra.gmra.mrb[0].mxu1 %vm982_vm3, %v2310_v27  ;;  %v13568_v19 = vpack.c.bf16 %v2309_v3, %v13345_v60  ;;  %v10392_v60 = vld [vmem:[%s12991_s9 + $0x10] sm:$0x1]  ;;  %v2619_v52 = vpack.c.bf16 %v2104_v47, %v13328_v54  ;;  %v2514_v54 = vld [vmem:[#allocation2 + $0xa0] sm:$0xff]  ;;  %v2738_v24 = vsel %vm1030_vm0, %v10397_v53, 0 }
  0x8a   : > { %11321 = vmatprep.mubr.msk.bf16.mxu1 %vm982_vm3, %v13480_v32  ;;  %11326 = vmatpush3.bf16.msra.mxu1 %v1410_v28  ;;  %v2636_v41 = vsel %vm1030_vm0, %v10392_v60, 0  ;;  %v2518_v17 = vpack.c.bf16 %v2514_v54, %v13461_v16  ;;  %v13606_v28 = vld [vmem:[#allocation2 + $0xa1] sm:$0xff] }
  0x8b   : > { %12756 = vmatprep.subr.msk.bf16.mxu1 %vm1030_vm0, %v10337_v34  ;;  %v2620_v16 = vpack.c.bf16 %v13606_v28, %v13498_v48  ;;  %v12865_v48 = vld [vmem:[%s13001_s17] sm:$0xff]  }
  0x8e   : > { %11392 = vmatmul.mubr.msk.bf16.gmra.mrb[4].mxu0 %vm982_vm3, %v13469_v14 }
  0x8f   : > { %11397 = vmatprep.mubr.msk.bf16.mxu0 %vm982_vm3, %v13300_v42  ;;  %v13494_v42 = vpack.c.bf16 %v13340_v58, %v13319_v49  ;;  %v2412_v49 = vpack.c.bf16 %v13375_v7, %v13355_v63  ;;  %v1513_v58 = vsel %vm1030_vm0, %v10337_v34, 0  ;;  %v10382_v63 = vld [vmem:[%s12991_s9 + $0xe] sm:$0x1]  ;;  %v1494_v7 = vpack.c.bf16 %v13360_v0, %v13323_v51 }
  0x90   : > { %v13542_v51 = vpack.c.bf16 %v13534_v18, %v13277_v33  ;;  %v1615_v0 = vsel %vm1030_vm0, %v10342_v6, 0  ;;  %v2431_v33 = vsel %vm1030_vm0, %v10382_v63, 0 }
  0x91   : > { %11322 = vmatmul.mubr.msk.bf16.gmra.mrb[4].mxu1 %vm982_vm3, %v13494_v42 }
  0x92   : > { %11327 = vmatprep.mubr.msk.bf16.mxu1 %vm982_vm3, %v1391_v20 }
  0x96   : > { %11398 = vmatmul.mubr.msk.bf16.vlgmr.msra.gmra.mrb[0].mxu0 %vm982_vm3, %v13307_v44 }
  0x97   : > { %11406 = vmatpush3.bf16.msra.mxu0 %v2227_v35  ;;  %11401 = vmatprep.mubr.msk.bf16.mxu0 %vm982_vm3, %v13351_v62  ;;  %v13620_v35 = vld [vmem:[#allocation2 + $0xa2] sm:$0xff] }
  0x98   : > { %12764 = vmatprep.subr.msk.bf16.mxu0 %vm1030_vm0, %v10377_v46  ;;  %v2722_v46 = vpack.c.bf16 %v13620_v35, %v13534_v18 }
  0x99   : > { %11328 = vmatmul.mubr.msk.bf16.vlgmr.msra.gmra.mrb[0].mxu1 %vm982_vm3, %v2412_v49 }
  0x9a   : > { %11331 = vmatprep.mubr.msk.bf16.mxu1 %vm982_vm3, %v13515_v29  ;;  %11336 = vmatpush3.bf16.msra.mxu1 %v1513_v58  ;;  %v10427_v58 = vld [vmem:[%s12991_s9 + $0x17] sm:$0x1] }
  0x9b   : > { %12757 = vmatprep.subr.msk.bf16.mxu1 %vm1030_vm0, %v10342_v6  ;;  %v10432_v6 = vld [vmem:[%s12991_s9 + $0x18] sm:$0x1] }
  0x9e   : > { %11402 = vmatmul.mubr.msk.bf16.gmra.mrb[4].mxu0 %vm982_vm3, %v13505_v61 }
  0x9f   : > { %11407 = vmatprep.mubr.msk.bf16.mxu0 %vm982_vm3, %v2208_v43  ;;  %v10387_v43 = vld [vmem:[%s12991_s9 + $0xf] sm:$0x1] }
  0xa0   : > { %v2534_v50 = vsel %vm1030_vm0, %v10387_v43, 0 }
  0xa1   : > { %11332 = vmatmul.mubr.msk.bf16.gmra.mrb[4].mxu1 %vm982_vm3, %v13530_v8 }
  0xa2   : > { %11337 = vmatprep.mubr.msk.bf16.mxu1 %vm982_vm3, %v1494_v7 }
  0xa6   : > { %11408 = vmatmul.mubr.msk.bf16.vlgmr.msra.gmra.mrb[0].mxu0 %vm982_vm3, %v13442_v15 }
  0xa7   : > { %11416 = vmatpush3.bf16.msra.mxu0 %v2329_v59  ;;  %11411 = vmatprep.mubr.msk.bf16.mxu0 %vm982_vm3, %v13455_v23 }
  0xa8   : > { %12765 = vmatprep.subr.msk.bf16.mxu0 %vm1030_vm0, %v10382_v63 }
  0xa9   : > { %11338 = vmatmul.mubr.msk.bf16.vlgmr.msra.gmra.mrb[0].mxu1 %vm982_vm3, %v2515_v5 }
  0xaa   : > { %11341 = vmatprep.mubr.msk.bf16.mxu1 %vm982_vm3, %v2516_v31  ;;  %11346 = vmatpush3.bf16.msra.mxu1 %v1615_v0 }
  0xab   : > { %11535 = vmatprep.subr.bf16.mxu1 %v12865_v48 }
  0xae   : > { %11412 = vmatmul.mubr.msk.bf16.gmra.mrb[4].mxu0 %vm982_vm3, %v13542_v51 }
  0xaf   : > { %11417 = vmatprep.mubr.msk.bf16.mxu0 %vm982_vm3, %v2310_v27  ;;  %v10402_v27 = vld [vmem:[%s12991_s9 + $0x12] sm:$0x1] }
  0xb0   : > { %v2840_v34 = vsel %vm1030_vm0, %v10402_v27, 0 }
  0xb1   : > { %11342 = vmatmul.mubr.msk.bf16.gmra.mrb[4].mxu1 %vm982_vm3, %v2517_v1 }
  0xb2   : > { %11347 = vmatprep.mubr.msk.bf16.mxu1 %vm982_vm3, %v1596_v22  ;;  %v10437_v22 = vld [vmem:[%s12996_s13] ss:$0 sm:$0xff] }
  0xb6   : > { %11418 = vmatmul.mubr.msk.bf16.vlgmr.msra.gmra.mrb[0].mxu0 %vm982_vm3, %v13480_v32 }
  0xb7   : > { %11426 = vmatpush3.bf16.msra.mxu0 %v2431_v33  ;;  %11421 = vmatprep.mubr.msk.bf16.mxu0 %vm982_vm3, %v13494_v42 }
  0xb8   : > { %12766 = vmatprep.subr.msk.bf16.mxu0 %vm1030_vm0, %v10387_v43 }
  0xb9   : > { %11348 = vmatmul.mubr.msk.bf16.vlgmr.msra.gmra.mrb[0].mxu1 %vm982_vm3, %v2617_v38 }
  0xba   : > { %11351 = vmatprep.mubr.msk.bf16.mxu1 %vm982_vm3, %v2618_v4  ;;  %11536 = vmatpush3.bf16.msra.mxu1 %v12865_v48 }
  0xbe   : > { %11422 = vmatmul.mubr.msk.bf16.gmra.mrb[4].mxu0 %vm982_vm3, %v13568_v19 }
  0xbf   : > { %11427 = vmatprep.mubr.msk.bf16.mxu0 %vm982_vm3, %v2412_v49 }
  0xc1   : > { %11352 = vmatmul.mubr.msk.bf16.gmra.mrb[4].mxu1 %vm982_vm3, %v2619_v52 }
  0xc6   : > { %11428 = vmatmul.mubr.msk.bf16.vlgmr.msra.gmra.mrb[0].mxu0 %vm982_vm3, %v13515_v29 }
  0xc7   : > { %11436 = vmatpush3.bf16.msra.mxu0 %v2534_v50  ;;  %11431 = vmatprep.mubr.msk.bf16.mxu0 %vm982_vm3, %v13530_v8 }
  0xc8   : > { %12767 = vmatprep.subr.msk.bf16.mxu0 %vm1030_vm0, %v10392_v60 }
  0xce   : > { %11432 = vmatmul.mubr.msk.bf16.gmra.mrb[4].mxu0 %vm982_vm3, %v13589_v40 }
  0xcf   : > { %11437 = vmatprep.mubr.msk.bf16.mxu0 %vm982_vm3, %v2515_v5 }
  0xd6   : > { %11438 = vmatmul.mubr.msk.bf16.vlgmr.msra.gmra.mrb[0].mxu0 %vm982_vm3, %v2516_v31 }
  0xd7   : > { %11446 = vmatpush3.bf16.msra.mxu0 %v2636_v41  ;;  %11441 = vmatprep.mubr.msk.bf16.mxu0 %vm982_vm3, %v2517_v1 }
  0xd8   : > { %12768 = vmatprep.subr.msk.bf16.mxu0 %vm1030_vm0, %v10397_v53 }
  0xde   : > { %11442 = vmatmul.mubr.msk.bf16.gmra.mrb[4].mxu0 %vm982_vm3, %v2518_v17 }
  0xdf   : > { %11447 = vmatprep.mubr.msk.bf16.mxu0 %vm982_vm3, %v2617_v38 }
  0xe6   : > { %11448 = vmatmul.mubr.msk.bf16.vlgmr.msra.gmra.mrb[0].mxu0 %vm982_vm3, %v2618_v4 }
  0xe7   : > { %11456 = vmatpush3.bf16.msra.mxu0 %v2738_v24  ;;  %11451 = vmatprep.mubr.msk.bf16.mxu0 %vm982_vm3, %v2619_v52 }
  0xe8   : > { %12769 = vmatprep.subr.msk.bf16.mxu0 %vm1030_vm0, %v10402_v27 }
  0xee   : > { %11452 = vmatmul.mubr.msk.bf16.gmra.mrb[4].mxu0 %vm982_vm3, %v2620_v16 }
  0xef   : > { %11457 = vmatprep.mubr.msk.bf16.mxu0 %vm982_vm3, %v13258_v26  ;;  %v2942_v26 = vsel %vm1030_vm0, %v10407_v9, 0 }
  0xf6   : > { %11458 = vmatmul.mubr.msk.bf16.vlgmr.msra.gmra.mrb[0].mxu0 %vm982_vm3, %v13267_v30  ;;  %v10412_v30 = vld [vmem:[%s12991_s9 + $0x14] sm:$0x1] }
  0xf7   : > { %11466 = vmatpush3.bf16.msra.mxu0 %v2840_v34  ;;  %11461 = vmatprep.mubr.msk.bf16.mxu0 %vm982_vm3, %v13286_v36  ;;  %v13634_v36 = vld [vmem:[#allocation2 + $0xa3] sm:$0xff] }
  0xf8   : > { %12770 = vmatprep.subr.msk.bf16.mxu0 %vm1030_vm0, %v10407_v9  ;;  %v2824_v20 = vpack.c.bf16 %v13634_v36, %v2309_v3 }
  0xfe   : > { %11462 = vmatmul.mubr.msk.bf16.gmra.mrb[4].mxu0 %vm982_vm3, %v2722_v46 }
  0xff   : > { %11467 = vmatprep.mubr.msk.bf16.mxu0 %vm982_vm3, %v13333_v55  ;;  %v3045_v55 = vsel %vm1030_vm0, %v10412_v30, 0 }
 0x106   : > { %11468 = vmatmul.mubr.msk.bf16.vlgmr.msra.gmra.mrb[0].mxu0 %vm982_vm3, %v13337_v56  ;;  %v10417_v56 = vld [vmem:[%s12991_s9 + $0x15] sm:$0x1] }
 0x107   : > { %11476 = vmatpush3.bf16.msra.mxu0 %v2942_v26  ;;  %11471 = vmatprep.mubr.msk.bf16.mxu0 %vm982_vm3, %v13367_v2  ;;  %v2922_v2 = vld [vmem:[#allocation2 + $0xa4] sm:$0xff] }
 0x108   : > { %12771 = vmatprep.subr.msk.bf16.mxu0 %vm1030_vm0, %v10412_v30  ;;  %v2926_v47 = vpack.c.bf16 %v2922_v2, %v2411_v39 }
 0x10e   : > { %11472 = vmatmul.mubr.msk.bf16.gmra.mrb[4].mxu0 %vm982_vm3, %v2824_v20 }
 0x10f   : > { %11477 = vmatprep.mubr.msk.bf16.mxu0 %vm982_vm3, %v13404_v45  ;;  %v3147_v45 = vsel %vm1030_vm0, %v10417_v56, 0 }
 0x116   : > { %11478 = vmatmul.mubr.msk.bf16.vlgmr.msra.gmra.mrb[0].mxu0 %vm982_vm3, %v13409_v57  ;;  %v10422_v57 = vld [vmem:[%s12991_s9 + $0x16] sm:$0x1] }
 0x117   : > { %11486 = vmatpush3.bf16.msra.mxu0 %v3045_v55  ;;  %11481 = vmatprep.mubr.msk.bf16.mxu0 %vm982_vm3, %v13431_v21  ;;  %v3025_v21 = vld [vmem:[#allocation2 + $0xb0] sm:$0xff] }
 0x118   : > { %12772 = vmatprep.subr.msk.bf16.mxu0 %vm1030_vm0, %v10417_v56  ;;  %v3029_v49 = vpack.c.bf16 %v3025_v21, %v2514_v54 }
 0x11e   : > { %11482 = vmatmul.mubr.msk.bf16.gmra.mrb[4].mxu0 %vm982_vm3, %v2926_v47 }
 0x11f   : > { %11487 = vmatprep.mubr.msk.bf16.mxu0 %vm982_vm3, %v13393_v37  ;;  %v3249_v37 = vsel %vm1030_vm0, %v10422_v57, 0 }
 0x126   : > { %11488 = vmatmul.mubr.msk.bf16.vlgmr.msra.gmra.mrb[0].mxu0 %vm982_vm3, %v13419_v25  ;;  %v3127_v25 = vld [vmem:[#allocation2 + $0xb1] sm:$0xff] }
 0x127   : > { %11496 = vmatpush3.bf16.msra.mxu0 %v3147_v45  ;;  %11491 = vmatprep.mubr.msk.bf16.mxu0 %vm982_vm3, %v13469_v14  ;;  %v3131_v14 = vpack.c.bf16 %v3127_v25, %v13606_v28  ;;  %v10445_v25 = vld [vmem:[%s13011_s25 + $0x4] sm:$0xf] }
 0x128   : > { %12773 = vmatprep.subr.msk.bf16.mxu0 %vm1030_vm0, %v10422_v57 }
 0x12e   : > { %11492 = vmatmul.mubr.msk.bf16.gmra.mrb[4].mxu0 %vm982_vm3, %v3029_v49 }
 0x12f   : > { %11497 = vmatprep.mubr.msk.bf16.mxu0 %vm982_vm3, %v13307_v44  ;;  %v3351_v44 = vsel %vm1030_vm0, %v10427_v58, 0 }
 0x136   : > { %11498 = vmatmul.mubr.msk.bf16.vlgmr.msra.gmra.mrb[0].mxu0 %vm982_vm3, %v13351_v62  ;;  %v3229_v62 = vld [vmem:[#allocation2 + $0xb2] sm:$0xff] }
 0x137   : > { %11506 = vmatpush3.bf16.msra.mxu0 %v3249_v37  ;;  %11501 = vmatprep.mubr.msk.bf16.mxu0 %vm982_vm3, %v13505_v61  ;;  %v3233_v61 = vpack.c.bf16 %v3229_v62, %v13620_v35 }
 0x138   : > { %12774 = vmatprep.subr.msk.bf16.mxu0 %vm1030_vm0, %v10427_v58 }
 0x13e   : > { %11502 = vmatmul.mubr.msk.bf16.gmra.mrb[4].mxu0 %vm982_vm3, %v3131_v14  ;;  %v3713_v14 = vsel %vm3711_vm4, %v10445_v25, 0 }
 0x13f   : > { %11507 = vmatprep.mubr.msk.bf16.mxu0 %vm982_vm3, %v13442_v15  ;;  %v3453_v15 = vsel %vm1030_vm0, %v10432_v6, 0 }
 0x146   : > { %11508 = vmatmul.mubr.msk.bf16.vlgmr.msra.gmra.mrb[0].mxu0 %vm982_vm3, %v13455_v23  ;;  %v3331_v23 = vld [vmem:[#allocation2 + $0xb3] sm:$0xff] }
 0x147   : > { %11516 = vmatpush3.bf16.msra.mxu0 %v3351_v44  ;;  %11511 = vmatprep.mubr.msk.bf16.mxu0 %vm982_vm3, %v13542_v51  ;;  %v3335_v59 = vpack.c.bf16 %v3331_v23, %v13634_v36  ;;  %v3684_v44 = vld [vmem:[%s13011_s25] sm:$0xf] }
 0x148   : > { %12775 = vmatprep.subr.msk.bf16.mxu0 %vm1030_vm0, %v10432_v6  ;;  %v10438_v6 = vld [vmem:[%s13006_s21] ss:$0 sm:$0xff] }
 0x14e   : > { %11512 = vmatmul.mubr.msk.bf16.gmra.mrb[4].mxu0 %vm982_vm3, %v3233_v61 }
 0x14f   : > { %11517 = vmatprep.mubr.msk.bf16.mxu0 %vm982_vm3, %v13480_v32  ;;  %v3433_v32 = vld [vmem:[#allocation2 + $0xb4] sm:$0xff] }
 0x156   : > { %11518 = vmatmul.mubr.msk.bf16.vlgmr.msra.gmra.mrb[0].mxu0 %vm982_vm3, %v13494_v42  ;;  %v3437_v42 = vpack.c.bf16 %v3433_v32, %v2922_v2 }
 0x157   : > { %11526 = vmatpush3.bf16.msra.mxu0 %v3453_v15  ;;  %11521 = vmatprep.mubr.msk.bf16.mxu0 %vm982_vm3, %v13568_v19 }
 0x15e   : > { %11522 = vmatmul.mubr.msk.bf16.gmra.mrb[4].mxu0 %vm982_vm3, %v3335_v59 }
 0x15f   : > { %11527 = vmatprep.mubr.msk.bf16.mxu0 %vm982_vm3, %v13515_v29  ;;  %v12866_v29 = vld [vmem:[%s13001_s17 + $0x8] sm:$0xff]  }
 0x160   : > { %11537 = vmatprep.subr.bf16.mxu1 %v12866_v29 }
 0x161   : > { %11538 = vmatpush3.bf16.msra.mxu1 %v12866_v29 }
 0x162   : > { %12776 = vmatprep.subr.msk.bf16.mxu1 %vm3711_vm4, %v10445_v25 }
 0x166   : > { %11528 = vmatmul.mubr.msk.bf16.vlgmr.msra.gmra.mrb[0].mxu0 %vm982_vm3, %v13530_v8 }
 0x167   : > { %11531 = vmatprep.mubr.msk.bf16.mxu0 %vm982_vm3, %v13589_v40 }
 0x16e   : > { %11532 = vmatmul.mubr.msk.bf16.gmra.mrb[4].mxu0 %vm982_vm3, %v3437_v42 }
 0x18c   : > { %v11349_v63 = vpop.f32.mrb[0].mxu1 }
 0x18d   : > { %v1651_v7 = vpop.f32.mrb[1].mxu1 }
 0x18e   : > { %v11350_v18 = vpop.f32.mrb[2].mxu1 }
 0x18f   : > { %v1654_v51 = vpop.f32.mrb[3].mxu1 }
 0x194   : > { %v11353_v5 = vpop.f32.mrb[4].mxu1 }
 0x195   : > { %v1667_v0 = vpop.f32.mrb[5].mxu1 }
 0x196   : > { %v11354_v31 = vpop.f32.mrb[6].mxu1 }
 0x197   : > { %v1670_v33 = vpop.f32.mrb[7].mxu1 }
 0x239   : > { %v11529_v8 = vpop.f32.mrb[0].mxu0 }
 0x23a   : > { %v12175_v43 = vadd.f32 %v11529_v8, %v11349_v63  ;;  %v3489_v1 = vpop.f32.mrb[1].mxu0 }
 0x23b   : > { %v12176_v3 = vadd.f32 %v3489_v1, %v1651_v7  ;;  %v11530_v19 = vpop.f32.mrb[2].mxu0 }
 0x23c   : > { %v12177_v38 = vadd.f32 %v11530_v19, %v11350_v18  ;;  %v3492_v4 = vpop.f32.mrb[3].mxu0  ;;  %v13702_v52 = vadd.f32 %v12175_v43, %v10437_v22 }
 0x23d   : > { %v13700_v50 = vadd.f32 %v12176_v3, %v10437_v22  ;;  %v12178_v60 = vadd.f32 %v3492_v4, %v1654_v51  ;;  %v13754_v3 = vld [vmem:[#allocation2 + $0x12] sm:$0xff] }
 0x23e   : > { %v13704_v39 = vadd.f32 %v12177_v38, %v10437_v22  ;;  %v3545_v24 = vmax.f32 %v13702_v52, 0.0 }
 0x23f   : > { %v13706_v40 = vadd.f32 %v12178_v60, %v10437_v22  ;;  %v3543_v53 = vmax.f32 %v13700_v50, 0.0 }
 0x240   : > { %v3546_v41 = vmax.f32 %v13704_v39, 0.0 }
 0x241   : > { %v3544_v54 = vmax.f32 %v13706_v40, 0.0  ;;  %v11533_v17 = vpop.f32.mrb[4].mxu0 }
 0x242   : > { %v12179_v27 = vadd.f32 %v11533_v17, %v11353_v5  ;;  %v3505_v16 = vpop.f32.mrb[5].mxu0  ;;  %v3552_v26 = vpack.c.bf16 %v3546_v41, %v3545_v24 }
 0x243   : > { %v3551_v34 = vpack.c.bf16 %v3544_v54, %v3543_v53  ;;  %v12180_v9 = vadd.f32 %v3505_v16, %v1667_v0  ;;  %v11534_v46 = vpop.f32.mrb[6].mxu0 }
 0x244   : > { %v12181_v30 = vadd.f32 %v11534_v46, %v11354_v31  ;;  %v3508_v20 = vpop.f32.mrb[7].mxu0  ;;  %v13723_v2 = vadd.f32 %v12179_v27, %v10437_v22  ;;  %v3793_v46 = vsel %vm3711_vm4, %v3684_v44, 0 }
 0x245   : > { %v13720_v55 = vadd.f32 %v12180_v9, %v10437_v22  ;;  %v12182_v56 = vadd.f32 %v3508_v20, %v1670_v33  ;;  %11539 = vmatprep.mubr.msk.bf16.mxu1 %vm947_vm1, %v3551_v34 }
 0x246   : > { %v13725_v47 = vadd.f32 %v12181_v30, %v10437_v22  ;;  %11540 = vmatmul.mubr.msk.bf16.vlgmr.msra.gmra.mrb[8].mxu1 %vm947_vm1, %v3552_v26  ;;  %v3549_v49 = vmax.f32 %v13723_v2, 0.0  ;;  %v10454_v26 = vld [vmem:[%s13011_s25 + $0x8] sm:$0xf] }
 0x247   : > { %v13728_v48 = vadd.f32 %v12182_v56, %v10437_v22  ;;  %v3547_v57 = vmax.f32 %v13720_v55, 0.0  ;;  %11548 = vmatpush3.bf16.msra.mxu1 %v3713_v14 }
 0x248   : > { %v3550_v45 = vmax.f32 %v13725_v47, 0.0  ;;  %12777 = vmatprep.subr.msk.bf16.mxu1 %vm3711_vm4, %v3684_v44  ;;  %v12936_v44 = vld [vmem:[#allocation2 + $0x11] sm:$0xff] }
 0x249   : > { %v3548_v21 = vmax.f32 %v13728_v48, 0.0 }
 0x24a   : > { %v3554_v58 = vpack.c.bf16 %v3550_v45, %v3549_v49 }
 0x24b   : > { %v3553_v37 = vpack.c.bf16 %v3548_v21, %v3547_v57 }
 0x24d   : > { %11543 = vmatprep.mubr.msk.bf16.mxu1 %vm947_vm1, %v3553_v37 }
 0x24e   : > { %11544 = vmatmul.mubr.msk.bf16.gmra.mrb[12].mxu1 %vm947_vm1, %v3554_v58 }
 0x319   : > { %v11541_v62 = vpop.f32.mrb[8].mxu1 }
 0x31a   : > { %v3633_v61 = vadd.f32 %v11541_v62, %v10438_v6  ;;  %v3624_v15 = vpop.f32.mrb[9].mxu1 }
 0x31b   : > { %v3625_v23 = vadd.f32 %v10438_v6, %v3624_v15  ;;  %v11542_v59 = vpop.f32.mrb[10].mxu1 }
 0x31c   : > { %v3657_v32 = vmax.f32 %v3633_v61, 0.0  ;;  %v3636_v42 = vadd.f32 %v11542_v59, %v10438_v6  ;;  %v3627_v63 = vpop.f32.mrb[11].mxu1 }
 0x31d   : > { %v3655_v7 = vmax.f32 %v3625_v23, 0.0  ;;  %v3628_v18 = vadd.f32 %v10438_v6, %v3627_v63  ;;  %v10459_v63 = vld [vmem:[%s13011_s25 + $0xc] sm:$0xf] }
 0x31e   : > { %v3658_v51 = vmax.f32 %v3636_v42, 0.0  ;;  %3666 = vst.msk [vmem:[#allocation2 + $0x42] sm:$0xff] %vm3663_vm5, %v3657_v32  ;;  %v3887_v32 = vsel %vm3711_vm4, %v10454_v26, 0 }
 0x31f   : > { %v3656_v5 = vmax.f32 %v3628_v18, 0.0  ;;  %3664 = vst.msk [vmem:[#allocation2 + $0x22] sm:$0xff] %vm3663_vm5, %v3655_v7  ;;  %v13810_v18 = vld [vmem:[#allocation2 + $0x13] sm:$0xff] }
 0x320   : > { %3667 = vst.msk [vmem:[#allocation2 + $0x52] sm:$0xff] %vm3663_vm5, %v3658_v51 }
 0x321   : > { %v11545_v0 = vpop.f32.mrb[12].mxu1  ;;  %3665 = vst.msk [vmem:[#allocation2 + $0x32] sm:$0xff] %vm3663_vm5, %v3656_v5 }
 0x322   : > { %v3649_v31 = vadd.f32 %v11545_v0, %v10438_v6  ;;  %v3640_v33 = vpop.f32.mrb[13].mxu1 }
 0x323   : > { %v3641_v29 = vadd.f32 %v10438_v6, %v3640_v33  ;;  %v11546_v8 = vpop.f32.mrb[14].mxu1 }
 0x324   : > { %v3661_v43 = vmax.f32 %v3649_v31, 0.0  ;;  %v3652_v22 = vadd.f32 %v11546_v8, %v10438_v6  ;;  %v3643_v1 = vpop.f32.mrb[15].mxu1 }
 0x325   : > { %v3659_v19 = vmax.f32 %v3641_v29, 0.0  ;;  %v3644_v38 = vadd.f32 %v10438_v6, %v3643_v1  ;;  %v13765_v34 = vld [vmem:[#allocation2 + $0x42] sm:$0xff]  ;;  %v3989_v1 = vsel %vm3711_vm4, %v10459_v63, 0 }
 0x326   : > { %v3662_v4 = vmax.f32 %v3652_v22, 0.0  ;;  %v13756_v60 = vld [vmem:[#allocation2 + $0x22] sm:$0xff]  ;;  %3670 = vst.msk [vmem:[#allocation2 + $0x82] sm:$0xff] %vm3663_vm5, %v3661_v43 }
 0x327   : > { %v3660_v17 = vmax.f32 %v3644_v38, 0.0  ;;  %v3693_v27 = vpack.c.bf16 %v13756_v60, %v13754_v3  ;;  %3668 = vst.msk [vmem:[#allocation2 + $0x62] sm:$0xff] %vm3663_vm5, %v3659_v19  ;;  %v13778_v30 = vld [vmem:[#allocation2 + $0x52] sm:$0xff]  ;;  %v3673_v37 = vld [vmem:[#allocation2 + $0x21] sm:$0xff] }
 0x328   : > { %3671 = vst.msk [vmem:[#allocation2 + $0x92] sm:$0xff] %vm3663_vm5, %v3662_v4  ;;  %v13763_v16 = vld [vmem:[#allocation2 + $0x32] sm:$0xff]  ;;  %v3680_v6 = vpack.c.bf16 %v3673_v37, %v12936_v44  ;;  %v3675_v15 = vld [vmem:[#allocation2 + $0x41] sm:$0xff] }
 0x329   : > { %11549 = vmatprep.mubr.msk.bf16.mxu1 %vm3663_vm5, %v3693_v27  ;;  %3669 = vst.msk [vmem:[#allocation2 + $0x72] sm:$0xff] %vm3663_vm5, %v3660_v17  ;;  %v13771_v9 = vpack.c.bf16 %v13765_v34, %v13763_v16  ;;  %v3674_v62 = vld [vmem:[#allocation2 + $0x31] sm:$0xff]  ;;  %v3861_v51 = vld [vmem:[#allocation2 + $0x23] sm:$0xff] }
 0x32a   : > { %v13799_v23 = vpack.c.bf16 %v3675_v15, %v3674_v62  ;;  %v3676_v59 = vld [vmem:[#allocation2 + $0x51] sm:$0xff]  ;;  %v3868_v31 = vpack.c.bf16 %v3861_v51, %v13810_v18  ;;  %v3863_v8 = vld [vmem:[#allocation2 + $0x43] sm:$0xff] }
 0x32b   : > { %11550 = vmatmul.mubr.msk.bf16.vlgmr.msra.gmra.mrb[16].mxu1 %vm3663_vm5, %v13771_v9  ;;  %v3862_v33 = vld [vmem:[#allocation2 + $0x33] sm:$0xff] }
 0x32c   : > { %11558 = vmatpush3.bf16.msra.mxu1 %v3793_v46  ;;  %v13818_v43 = vpack.c.bf16 %v3863_v8, %v3862_v33  ;;  %v3864_v22 = vld [vmem:[#allocation2 + $0x53] sm:$0xff]  ;;  %v3970_v46 = vpack.c.bf16 %v3674_v62, %v3673_v37  ;;  %v4072_v37 = vpack.c.bf16 %v13763_v16, %v13756_v60  ;;  %v4073_v62 = vpack.c.bf16 %v13778_v30, %v13765_v34 }
 0x32d   : > { %12778 = vmatprep.subr.msk.bf16.mxu1 %vm3711_vm4, %v10454_v26  ;;  %v13788_v25 = vld [vmem:[#allocation2 + $0x82] sm:$0xff]  ;;  %v10464_v38 = vld [vmem:[%s13011_s25 + $0x10] sm:$0xf]  ;;  %v3971_v26 = vpack.c.bf16 %v3676_v59, %v3675_v15  ;;  %v4175_v34 = vpack.c.bf16 %v3864_v22, %v3863_v8 }
 0x32e   : > { %v13780_v20 = vld [vmem:[#allocation2 + $0x62] sm:$0xff]  ;;  %v4091_v44 = vsel %vm3711_vm4, %v10464_v38, 0 }
 0x32f   : > { %v13784_v56 = vpack.c.bf16 %v13780_v20, %v13778_v30  ;;  %v3677_v61 = vld [vmem:[#allocation2 + $0x61] sm:$0xff]  ;;  %v4071_v60 = vld [vmem:[#allocation2 + $0x92] sm:$0xff] }
 0x330   : > { %v13786_v58 = vld [vmem:[#allocation2 + $0x72] sm:$0xff]  ;;  %v13802_v42 = vpack.c.bf16 %v3677_v61, %v3676_v59  ;;  %v3679_v5 = vld [vmem:[#allocation2 + $0x81] sm:$0xff]  ;;  %v4075_v16 = vpack.c.bf16 %v4071_v60, %v13788_v25 }
 0x331   : > { %11553 = vmatprep.mubr.msk.bf16.mxu1 %vm3663_vm5, %v13784_v56  ;;  %v13794_v14 = vpack.c.bf16 %v13788_v25, %v13786_v58  ;;  %v3678_v7 = vld [vmem:[#allocation2 + $0x71] sm:$0xff]  ;;  %v3865_v29 = vld [vmem:[#allocation2 + $0x63] sm:$0xff]  ;;  %v4074_v15 = vpack.c.bf16 %v13786_v58, %v13780_v20  ;;  %v10479_v58 = vld [vmem:[%s13011_s25 + $0x1c] sm:$0xf] }
 0x332   : > { %v13812_v0 = vpack.c.bf16 %v3679_v5, %v3678_v7  ;;  %v13821_v19 = vpack.c.bf16 %v3865_v29, %v3864_v22  ;;  %v3866_v4 = vld [vmem:[#allocation2 + $0x73] sm:$0xff]  ;;  %v3867_v17 = vld [vmem:[#allocation2 + $0x83] sm:$0xff] }
 0x333   : > { %11554 = vmatmul.mubr.msk.bf16.gmra.mrb[20].mxu1 %vm3663_vm5, %v13794_v14  ;;  %v3871_v27 = vpack.c.bf16 %v3867_v17, %v3866_v4  ;;  %v10474_v59 = vld [vmem:[%s13011_s25 + $0x18] sm:$0xf]  ;;  %v4176_v20 = vpack.c.bf16 %v3866_v4, %v3865_v29  ;;  %v4601_v8 = vld [vmem:[%s13021_s3] sm:$0xf] }
 0x334   : > { %11559 = vmatprep.mubr.msk.bf16.mxu1 %vm3663_vm5, %v3680_v6  ;;  %v3972_v6 = vpack.c.bf16 %v3678_v7, %v3677_v61  ;;  %v4174_v7 = vpack.c.bf16 %v3862_v33, %v3861_v51  ;;  %v4295_v30 = vsel %vm3711_vm4, %v10474_v59, 0  ;;  %v4173_v25 = vld [vmem:[#allocation2 + $0x93] sm:$0xff]  ;;  %v10484_v33 = vld [vmem:[%s13011_s25 + $0x20] sm:$0xf] }
 0x335   : > { %v4177_v51 = vpack.c.bf16 %v4173_v25, %v3867_v17 }
 0x33b   : > { %11560 = vmatmul.mubr.msk.bf16.vlgmr.msra.gmra.mrb[16].mxu1 %vm3663_vm5, %v13799_v23 }
 0x33c   : > { %11563 = vmatprep.mubr.msk.bf16.mxu1 %vm3663_vm5, %v13802_v42  ;;  %11568 = vmatpush3.bf16.msra.mxu1 %v3887_v32  ;;  %v10469_v32 = vld [vmem:[%s13011_s25 + $0x14] sm:$0xf] }
 0x33d   : > { %12779 = vmatprep.subr.msk.bf16.mxu1 %vm3711_vm4, %v10459_v63  ;;  %v3969_v63 = vld [vmem:[#allocation2 + $0x91] sm:$0xff]  ;;  %v4193_v61 = vsel %vm3711_vm4, %v10469_v32, 0 }
 0x33e   : > { %v4279_v29 = vpack.c.bf16 %v13606_v28, %v3969_v63  ;;  %v4381_v28 = vpack.c.bf16 %v13620_v35, %v4071_v60  ;;  %v10489_v35 = vld [vmem:[%s13016_s29] ss:$0 sm:$0xff] }
 0x343   : > { %11564 = vmatmul.mubr.msk.bf16.gmra.mrb[20].mxu1 %vm3663_vm5, %v13812_v0 }
 0x344   : > { %11569 = vmatprep.mubr.msk.bf16.mxu1 %vm3663_vm5, %v3868_v31  ;;  %v3973_v31 = vpack.c.bf16 %v3969_v63, %v3679_v5  ;;  %v4397_v5 = vsel %vm3711_vm4, %v10479_v58, 0 }
 0x34b   : > { %11570 = vmatmul.mubr.msk.bf16.vlgmr.msra.gmra.mrb[16].mxu1 %vm3663_vm5, %v13818_v43 }
 0x34c   : > { %11573 = vmatprep.mubr.msk.bf16.mxu1 %vm3663_vm5, %v13821_v19  ;;  %11578 = vmatpush3.bf16.msra.mxu1 %v3989_v1 }
 0x34d   : > { %12780 = vmatprep.subr.msk.bf16.mxu1 %vm3711_vm4, %v10464_v38 }
 0x353   : > { %11574 = vmatmul.mubr.msk.bf16.gmra.mrb[20].mxu1 %vm3663_vm5, %v3871_v27 }
 0x354   : > { %11579 = vmatprep.mubr.msk.bf16.mxu1 %vm3663_vm5, %v3970_v46 }
 0x35b   : > { %11580 = vmatmul.mubr.msk.bf16.vlgmr.msra.gmra.mrb[16].mxu1 %vm3663_vm5, %v3971_v26 }
 0x35c   : > { %11583 = vmatprep.mubr.msk.bf16.mxu1 %vm3663_vm5, %v3972_v6  ;;  %11588 = vmatpush3.bf16.msra.mxu1 %v4091_v44 }
 0x35d   : > { %12781 = vmatprep.subr.msk.bf16.mxu1 %vm3711_vm4, %v10469_v32 }
 0x363   : > { %11584 = vmatmul.mubr.msk.bf16.gmra.mrb[20].mxu1 %vm3663_vm5, %v3973_v31 }
 0x364   : > { %11589 = vmatprep.mubr.msk.bf16.mxu1 %vm3663_vm5, %v4072_v37 }
 0x36b   : > { %11590 = vmatmul.mubr.msk.bf16.vlgmr.msra.gmra.mrb[16].mxu1 %vm3663_vm5, %v4073_v62 }
 0x36c   : > { %11593 = vmatprep.mubr.msk.bf16.mxu1 %vm3663_vm5, %v4074_v15  ;;  %11598 = vmatpush3.bf16.msra.mxu1 %v4193_v61 }
 0x36d   : > { %12782 = vmatprep.subr.msk.bf16.mxu1 %vm3711_vm4, %v10474_v59 }
 0x373   : > { %11594 = vmatmul.mubr.msk.bf16.gmra.mrb[20].mxu1 %vm3663_vm5, %v4075_v16 }
 0x374   : > { %11599 = vmatprep.mubr.msk.bf16.mxu1 %vm3663_vm5, %v4174_v7 }
 0x37b   : > { %11600 = vmatmul.mubr.msk.bf16.vlgmr.msra.gmra.mrb[16].mxu1 %vm3663_vm5, %v4175_v34 }
 0x37c   : > { %11603 = vmatprep.mubr.msk.bf16.mxu1 %vm3663_vm5, %v4176_v20  ;;  %11608 = vmatpush3.bf16.msra.mxu1 %v4295_v30  ;;  %v12868_v20 = vld [vmem:[%s13031_s14 + $0x8] sm:$0xff]  }
 0x37d   : > { %12783 = vmatprep.subr.msk.bf16.mxu1 %vm3711_vm4, %v10479_v58  ;;  %v10490_v58 = vld [vmem:[%s13026_s8] ss:$0 sm:$0xff] }
 0x383   : > { %11604 = vmatmul.mubr.msk.bf16.gmra.mrb[20].mxu1 %vm3663_vm5, %v4177_v51 }
 0x384   : > { %11609 = vmatprep.mubr.msk.bf16.mxu1 %vm3663_vm5, %v13799_v23  ;;  %v4499_v23 = vsel %vm3711_vm4, %v10484_v33, 0 }
 0x38b   : > { %11610 = vmatmul.mubr.msk.bf16.vlgmr.msra.gmra.mrb[16].mxu1 %vm3663_vm5, %v13802_v42 }
 0x38c   : > { %11613 = vmatprep.mubr.msk.bf16.mxu1 %vm3663_vm5, %v13812_v0  ;;  %11618 = vmatpush3.bf16.msra.mxu1 %v4397_v5 }
 0x38d   : > { %12784 = vmatprep.subr.msk.bf16.mxu1 %vm3711_vm4, %v10484_v33 }
 0x393   : > { %11614 = vmatmul.mubr.msk.bf16.gmra.mrb[20].mxu1 %vm3663_vm5, %v4279_v29 }
 0x394   : > { %11619 = vmatprep.mubr.msk.bf16.mxu1 %vm3663_vm5, %v13771_v9  ;;  %v4622_v9 = vsel %vm3711_vm4, %v4601_v8, 0 }
 0x39b   : > { %11620 = vmatmul.mubr.msk.bf16.vlgmr.msra.gmra.mrb[16].mxu1 %vm3663_vm5, %v13784_v56  ;;  %v4483_v56 = vpack.c.bf16 %v13634_v36, %v4173_v25 }
 0x39c   : > { %11623 = vmatprep.mubr.msk.bf16.mxu1 %vm3663_vm5, %v13794_v14  ;;  %11628 = vmatpush3.bf16.msra.mxu1 %v4499_v23  ;;  %v12867_v14 = vld [vmem:[%s13031_s14] sm:$0xff]  }
 0x39d   : > { %12785 = vmatprep.subr.msk.bf16.mxu1 %vm3711_vm4, %v4601_v8 }
 0x3a3   : > { %11624 = vmatmul.mubr.msk.bf16.gmra.mrb[20].mxu1 %vm3663_vm5, %v4381_v28 }
 0x3a4   : > { %11629 = vmatprep.mubr.msk.bf16.mxu1 %vm3663_vm5, %v13818_v43 }
 0x3ab   : > { %11630 = vmatmul.mubr.msk.bf16.vlgmr.msra.gmra.mrb[16].mxu1 %vm3663_vm5, %v13821_v19 }
 0x3ac   : > { %11633 = vmatprep.mubr.msk.bf16.mxu1 %vm3663_vm5, %v3871_v27  ;;  %11638 = vmatpush3.bf16.msra.mxu1 %v4622_v9 }
 0x3ad   : > { %11647 = vmatprep.subr.bf16.mxu1 %v12867_v14 }
 0x3b3   : > { %11634 = vmatmul.mubr.msk.bf16.gmra.mrb[20].mxu1 %vm3663_vm5, %v4483_v56 }
 0x47e   : > { %v11631_v42 = vpop.f32.mrb[16].mxu1 }
 0x47f   : > { %v4583_v0 = vadd.f32 %v11631_v42, %v10489_v35  ;;  %v4535_v22 = vpop.f32.mrb[17].mxu1 }
 0x480   : > { %v4581_v1 = vadd.f32 %v10489_v35, %v4535_v22  ;;  %v11632_v43 = vpop.f32.mrb[18].mxu1 }
 0x481   : > { %v4584_v38 = vadd.f32 %v11632_v43, %v10489_v35  ;;  %v4538_v4 = vpop.f32.mrb[19].mxu1  ;;  %v4591_v46 = vmax.f32 %v4583_v0, 0.0 }
 0x482   : > { %v4582_v17 = vadd.f32 %v10489_v35, %v4538_v4  ;;  %v4589_v26 = vmax.f32 %v4581_v1, 0.0 }
 0x483   : > { %v4592_v19 = vmax.f32 %v4584_v38, 0.0 }
 0x484   : > { %v4590_v27 = vmax.f32 %v4582_v17, 0.0 }
 0x485   : > { %v4598_v44 = vpack.c.bf16 %v4592_v19, %v4591_v46 }
 0x486   : > { %v4597_v6 = vpack.c.bf16 %v4590_v27, %v4589_v26  ;;  %v11635_v36 = vpop.f32.mrb[20].mxu1  ;;  %v4837_v26 = vld [vmem:[%s13041_s24] sm:$0xf] }
 0x487   : > { %v4587_v32 = vadd.f32 %v11635_v36, %v10489_v35  ;;  %v4551_v63 = vpop.f32.mrb[21].mxu1  ;;  %v10495_v27 = vld [vmem:[%s13036_s19] ss:$0 sm:$0xff] }
 0x488   : > { %v4585_v31 = vadd.f32 %v10489_v35, %v4551_v63  ;;  %v11636_v37 = vpop.f32.mrb[22].mxu1  ;;  %11639 = vmatprep.mubr.msk.bf16.mxu1 %vm3663_vm5, %v4597_v6 }
 0x489   : > { %v4588_v62 = vadd.f32 %v11636_v37, %v10489_v35  ;;  %v4554_v61 = vpop.f32.mrb[23].mxu1  ;;  %11640 = vmatmul.mubr.msk.bf16.vlgmr.msra.gmra.mrb[24].mxu1 %vm3663_vm5, %v4598_v44  ;;  %v4595_v59 = vmax.f32 %v4587_v32, 0.0 }
 0x48a   : > { %v4586_v15 = vadd.f32 %v10489_v35, %v4554_v61  ;;  %11648 = vmatpush3.bf16.msra.mxu1 %v12867_v14  ;;  %v4593_v16 = vmax.f32 %v4585_v31, 0.0 }
 0x48b   : > { %v4596_v60 = vmax.f32 %v4588_v62, 0.0  ;;  %11649 = vmatprep.subr.bf16.mxu1 %v12868_v20 }
 0x48c   : > { %v4594_v7 = vmax.f32 %v4586_v15, 0.0 }
 0x48d   : > { %v4600_v34 = vpack.c.bf16 %v4596_v60, %v4595_v59 }
 0x48e   : > { %v4599_v30 = vpack.c.bf16 %v4594_v7, %v4593_v16  ;;  %11650 = vmatpush3.bf16.msra.mxu1 %v12868_v20 }
 0x490   : > { %11643 = vmatprep.mubr.msk.bf16.mxu1 %vm3663_vm5, %v4599_v30 }
 0x491   : > { %11644 = vmatmul.mubr.msk.bf16.gmra.mrb[28].mxu1 %vm3663_vm5, %v4600_v34 }
 0x55c   : > { %v11641_v25 = vpop.f32.mrb[24].mxu1 }
 0x55d   : > { %v4667_v51 = vadd.f32 %v11641_v25, %v10490_v58  ;;  %v4658_v5 = vpop.f32.mrb[25].mxu1 }
 0x55e   : > { %v4659_v33 = vadd.f32 %v10490_v58, %v4658_v5  ;;  %v11642_v29 = vpop.f32.mrb[26].mxu1 }
 0x55f   : > { %v4670_v23 = vadd.f32 %v11642_v29, %v10490_v58  ;;  %v4661_v8 = vpop.f32.mrb[27].mxu1  ;;  %v13902_v56 = vadd.f32 %v4667_v51, %v3545_v24 }
 0x560   : > { %v13898_v28 = vadd.f32 %v4659_v33, %v3543_v53  ;;  %v4662_v9 = vadd.f32 %v10490_v58, %v4661_v8 }
 0x561   : > { %v13906_v14 = vadd.f32 %v4670_v23, %v3546_v41  ;;  %v4699_v22 = vmax.f32 %v13902_v56, 0.0 }
 0x562   : > { %v13910_v35 = vadd.f32 %v4662_v9, %v3544_v54  ;;  %v4697_v0 = vmax.f32 %v13898_v28, 0.0 }
 0x563   : > { %v4700_v42 = vmax.f32 %v13906_v14, 0.0 }
 0x564   : > { %v4698_v50 = vmax.f32 %v13910_v35, 0.0  ;;  %v11645_v53 = vpop.f32.mrb[28].mxu1 }
 0x565   : > { %v4683_v52 = vadd.f32 %v11645_v53, %v10490_v58  ;;  %v4674_v24 = vpop.f32.mrb[29].mxu1  ;;  %v4706_v54 = vpack.c.bf16 %v4700_v42, %v4699_v22 }
 0x566   : > { %v4705_v39 = vpack.c.bf16 %v4698_v50, %v4697_v0  ;;  %v4675_v41 = vadd.f32 %v10490_v58, %v4674_v24  ;;  %v11646_v40 = vpop.f32.mrb[30].mxu1 }
 0x567   : > { %v4686_v1 = vadd.f32 %v11646_v40, %v10490_v58  ;;  %v4677_v43 = vpop.f32.mrb[31].mxu1  ;;  %v13931_v17 = vadd.f32 %v4683_v52, %v3549_v49 }
 0x568   : > { %v13926_v38 = vadd.f32 %v4675_v41, %v3547_v57  ;;  %v4678_v4 = vadd.f32 %v10490_v58, %v4677_v43  ;;  %11651 = vmatprep.mubr.msk.bf16.mxu1 %vm947_vm1, %v4705_v39  ;;  %v4945_v39 = vsel %vm3711_vm4, %v4837_v26, 0  ;;  %v10511_v41 = vld [vmem:[%s13041_s24 + $0x8] sm:$0xf] }
 0x569   : > { %v13935_v46 = vadd.f32 %v4686_v1, %v3550_v45  ;;  %11652 = vmatmul.mubr.msk.bf16.vlgmr.msra.gmra.mrb[32].mxu1 %vm947_vm1, %v4706_v54  ;;  %v4703_v49 = vmax.f32 %v13931_v17, 0.0  ;;  %v10502_v45 = vld [vmem:[%s13041_s24 + $0x4] sm:$0xf]  ;;  %v13996_v1 = vld [vmem:[#allocation2 + $0x11] sm:$0xff] }
 0x56a   : > { %v13940_v55 = vadd.f32 %v4678_v4, %v3548_v21  ;;  %v4701_v19 = vmax.f32 %v13926_v38, 0.0  ;;  %12786 = vmatprep.subr.msk.bf16.mxu1 %vm3711_vm4, %v10502_v45  ;;  %v4865_v21 = vsel %vm3711_vm4, %v10502_v45, 0 }
 0x56b   : > { %v4704_v57 = vmax.f32 %v13935_v46, 0.0  ;;  %11660 = vmatpush3.bf16.msra.mxu1 %v4865_v21 }
 0x56c   : > { %v4702_v2 = vmax.f32 %v13940_v55, 0.0  ;;  %12787 = vmatprep.subr.msk.bf16.mxu1 %vm3711_vm4, %v4837_v26 }
 0x56d   : > { %v4708_v48 = vpack.c.bf16 %v4704_v57, %v4703_v49 }
 0x56e   : > { %v4707_v47 = vpack.c.bf16 %v4702_v2, %v4701_v19 }
 0x570   : > { %11655 = vmatprep.mubr.msk.bf16.mxu1 %vm947_vm1, %v4707_v47 }
 0x571   : > { %11656 = vmatmul.mubr.msk.bf16.gmra.mrb[36].mxu1 %vm947_vm1, %v4708_v48 }
 0x63c   : > { %v11653_v44 = vpop.f32.mrb[32].mxu1 }
 0x63d   : > { %v4787_v6 = vadd.f32 %v11653_v44, %v10495_v27  ;;  %v4778_v36 = vpop.f32.mrb[33].mxu1 }
 0x63e   : > { %v4779_v32 = vadd.f32 %v10495_v27, %v4778_v36  ;;  %v11654_v63 = vpop.f32.mrb[34].mxu1  ;;  %v5039_v36 = vsel %vm3711_vm4, %v10511_v41, 0 }
 0x63f   : > { %v4811_v31 = vmax.f32 %v4787_v6, 0.0  ;;  %v4790_v37 = vadd.f32 %v11654_v63, %v10495_v27  ;;  %v4781_v62 = vpop.f32.mrb[35].mxu1  ;;  %v10516_v63 = vld [vmem:[%s13041_s24 + $0xc] sm:$0xf] }
 0x640   : > { %v4809_v61 = vmax.f32 %v4779_v32, 0.0  ;;  %v4782_v15 = vadd.f32 %v10495_v27, %v4781_v62 }
 0x641   : > { %4819 = vst.msk [vmem:[#allocation2 + $0x42] sm:$0xff] %vm3663_vm5, %v4811_v31  ;;  %v4812_v59 = vmax.f32 %v4790_v37, 0.0 }
 0x642   : > { %4817 = vst.msk [vmem:[#allocation2 + $0x22] sm:$0xff] %vm3663_vm5, %v4809_v61  ;;  %v4810_v60 = vmax.f32 %v4782_v15, 0.0 }
 0x643   : > { %4820 = vst.msk [vmem:[#allocation2 + $0x52] sm:$0xff] %vm3663_vm5, %v4812_v59 }
 0x644   : > { %4818 = vst.msk [vmem:[#allocation2 + $0x32] sm:$0xff] %vm3663_vm5, %v4810_v60  ;;  %v11657_v16 = vpop.f32.mrb[36].mxu1 }
 0x645   : > { %v4803_v7 = vadd.f32 %v11657_v16, %v10495_v27  ;;  %v4794_v34 = vpop.f32.mrb[37].mxu1 }
 0x646   : > { %v4795_v30 = vadd.f32 %v10495_v27, %v4794_v34  ;;  %v11658_v20 = vpop.f32.mrb[38].mxu1 }
 0x647   : > { %v4815_v58 = vmax.f32 %v4803_v7, 0.0  ;;  %v4806_v25 = vadd.f32 %v11658_v20, %v10495_v27  ;;  %v4797_v51 = vpop.f32.mrb[39].mxu1 }
 0x648   : > { %v4813_v5 = vmax.f32 %v4795_v30, 0.0  ;;  %v4798_v33 = vadd.f32 %v10495_v27, %v4797_v51  ;;  %v13975_v52 = vld [vmem:[#allocation2 + $0x42] sm:$0xff]  ;;  %v5141_v30 = vsel %vm3711_vm4, %v10516_v63, 0 }
 0x649   : > { %4823 = vst.msk [vmem:[#allocation2 + $0x82] sm:$0xff] %vm3663_vm5, %v4815_v58  ;;  %v4816_v29 = vmax.f32 %v4806_v25, 0.0  ;;  %v13967_v23 = vld [vmem:[#allocation2 + $0x22] sm:$0xff]  ;;  %v10521_v58 = vld [vmem:[%s13041_s24 + $0x10] sm:$0xf] }
 0x64a   : > { %4821 = vst.msk [vmem:[#allocation2 + $0x62] sm:$0xff] %vm3663_vm5, %v4813_v5  ;;  %v4814_v8 = vmax.f32 %v4798_v33, 0.0  ;;  %v4846_v9 = vpack.c.bf16 %v13967_v23, %v13754_v3  ;;  %v13988_v3 = vld [vmem:[#allocation2 + $0x52] sm:$0xff]  ;;  %v4826_v43 = vld [vmem:[#allocation2 + $0x21] sm:$0xff] }
 0x64b   : > { %4824 = vst.msk [vmem:[#allocation2 + $0x92] sm:$0xff] %vm3663_vm5, %v4816_v29  ;;  %v13973_v53 = vld [vmem:[#allocation2 + $0x32] sm:$0xff]  ;;  %v4833_v45 = vpack.c.bf16 %v4826_v43, %v13996_v1  ;;  %v4828_v27 = vld [vmem:[#allocation2 + $0x41] sm:$0xff]  ;;  %v5243_v29 = vsel %vm3711_vm4, %v10521_v58, 0 }
 0x64c   : > { %4822 = vst.msk [vmem:[#allocation2 + $0x72] sm:$0xff] %vm3663_vm5, %v4814_v8  ;;  %11661 = vmatprep.mubr.msk.bf16.mxu1 %vm3663_vm5, %v4846_v9  ;;  %v13981_v24 = vpack.c.bf16 %v13975_v52, %v13973_v53  ;;  %v4827_v21 = vld [vmem:[#allocation2 + $0x31] sm:$0xff]  ;;  %v5013_v37 = vld [vmem:[#allocation2 + $0x23] sm:$0xff] }
 0x64d   : > { %v14012_v44 = vpack.c.bf16 %v4828_v27, %v4827_v21  ;;  %v4829_v6 = vld [vmem:[#allocation2 + $0x51] sm:$0xff]  ;;  %v5020_v15 = vpack.c.bf16 %v5013_v37, %v13810_v18  ;;  %v5015_v16 = vld [vmem:[#allocation2 + $0x43] sm:$0xff]  ;;  %v5122_v5 = vpack.c.bf16 %v4827_v21, %v4826_v43  ;;  %v5224_v43 = vpack.c.bf16 %v13973_v53, %v13967_v23 }
 0x64e   : > { %11662 = vmatmul.mubr.msk.bf16.vlgmr.msra.gmra.mrb[40].mxu1 %vm3663_vm5, %v13981_v24  ;;  %v5014_v59 = vld [vmem:[#allocation2 + $0x33] sm:$0xff]  ;;  %v5123_v33 = vpack.c.bf16 %v4829_v6, %v4828_v27 }
 0x64f   : > { %11670 = vmatpush3.bf16.msra.mxu1 %v4945_v39  ;;  %v14029_v7 = vpack.c.bf16 %v5015_v16, %v5014_v59  ;;  %v5016_v34 = vld [vmem:[#allocation2 + $0x53] sm:$0xff] }
 0x650   : > { %12788 = vmatprep.subr.msk.bf16.mxu1 %vm3711_vm4, %v10511_v41  ;;  %v14000_v47 = vld [vmem:[#allocation2 + $0x82] sm:$0xff]  ;;  %v10526_v9 = vld [vmem:[%s13041_s24 + $0x14] sm:$0xf]  ;;  %v10531_v27 = vld [vmem:[%s13041_s24 + $0x18] sm:$0xf] }
 0x651   : > { %v13990_v40 = vld [vmem:[#allocation2 + $0x62] sm:$0xff]  ;;  %v5345_v21 = vsel %vm3711_vm4, %v10526_v9, 0 }
 0x652   : > { %v13994_v54 = vpack.c.bf16 %v13990_v40, %v13988_v3  ;;  %v4830_v26 = vld [vmem:[#allocation2 + $0x61] sm:$0xff]  ;;  %v5121_v39 = vld [vmem:[#allocation2 + $0x91] sm:$0xff] }
 0x653   : > { %v13998_v4 = vld [vmem:[#allocation2 + $0x72] sm:$0xff]  ;;  %v14015_v32 = vpack.c.bf16 %v4830_v26, %v4829_v6  ;;  %v4832_v62 = vld [vmem:[#allocation2 + $0x81] sm:$0xff]  ;;  %v5326_v6 = vpack.c.bf16 %v5014_v59, %v5013_v37  ;;  %v10546_v59 = vld [vmem:[%s14828_s23] ss:$0 sm:$0xff]  ;;  %s942_s23 = scalar_lea.vmem %s13119_s20, %s10839_s30  ;;  %s14844_s30 = sld [smem:[#allocation17_spill]] }
 0x654   : > { %11665 = vmatprep.mubr.msk.bf16.mxu1 %vm3663_vm5, %v13994_v54  ;;  %v14006_v48 = vpack.c.bf16 %v14000_v47, %v13998_v4  ;;  %v4831_v31 = vld [vmem:[#allocation2 + $0x71] sm:$0xff]  ;;  %v5017_v60 = vld [vmem:[#allocation2 + $0x63] sm:$0xff]  ;;  %v5125_v41 = vpack.c.bf16 %v5121_v39, %v4832_v62 }
 0x655   : > { %v14023_v61 = vpack.c.bf16 %v4832_v62, %v4831_v31  ;;  %v14032_v20 = vpack.c.bf16 %v5017_v60, %v5016_v34  ;;  %v5018_v18 = vld [vmem:[#allocation2 + $0x73] sm:$0xff]  ;;  %v5019_v25 = vld [vmem:[#allocation2 + $0x83] sm:$0xff]  ;;  %v5124_v8 = vpack.c.bf16 %v4831_v31, %v4830_v26  ;;  %v5226_v26 = vpack.c.bf16 %v13998_v4, %v13990_v40  ;;  %v10536_v4 = vld [vmem:[%s13041_s24 + $0x1c] sm:$0xf] }
 0x656   : > { %11666 = vmatmul.mubr.msk.bf16.gmra.mrb[44].mxu1 %vm3663_vm5, %v14006_v48  ;;  %v14040_v51 = vpack.c.bf16 %v5019_v25, %v5018_v18  ;;  %v5223_v23 = vld [vmem:[#allocation2 + $0x92] sm:$0xff]  ;;  %v5328_v40 = vpack.c.bf16 %v5018_v18, %v5017_v60  ;;  %v10541_v31 = vld [vmem:[%s13041_s24 + $0x20] sm:$0xf] }
 0x657   : > { %11671 = vmatprep.mubr.msk.bf16.mxu1 %vm3663_vm5, %v4833_v45  ;;  %v5225_v45 = vpack.c.bf16 %v13988_v3, %v13975_v52  ;;  %v5227_v53 = vpack.c.bf16 %v5223_v23, %v14000_v47  ;;  %v5327_v52 = vpack.c.bf16 %v5016_v34, %v5015_v16  ;;  %v5447_v3 = vsel %vm3711_vm4, %v10531_v27, 0  ;;  %v5325_v47 = vld [vmem:[#allocation2 + $0x93] sm:$0xff]  ;;  %v14081_v37 = vld [vmem:[#allocation2 + $0xa1] sm:$0xff] }
 0x658   : > { %v5431_v62 = vpack.c.bf16 %v14081_v37, %v5121_v39 }
 0x65e   : > { %11672 = vmatmul.mubr.msk.bf16.vlgmr.msra.gmra.mrb[40].mxu1 %vm3663_vm5, %v14012_v44 }
 0x65f   : > { %11675 = vmatprep.mubr.msk.bf16.mxu1 %vm3663_vm5, %v14015_v32  ;;  %11680 = vmatpush3.bf16.msra.mxu1 %v5039_v36  ;;  %v5329_v36 = vpack.c.bf16 %v5325_v47, %v5019_v25 }
 0x660   : > { %12789 = vmatprep.subr.msk.bf16.mxu1 %vm3711_vm4, %v10516_v63  ;;  %v5549_v63 = vsel %vm3711_vm4, %v10536_v4, 0 }
 0x666   : > { %11676 = vmatmul.mubr.msk.bf16.gmra.mrb[44].mxu1 %vm3663_vm5, %v14023_v61 }
 0x667   : > { %11681 = vmatprep.mubr.msk.bf16.mxu1 %vm3663_vm5, %v5020_v15  ;;  %v5753_v15 = vld [vmem:[%s13051_s6] sm:$0xf] }
 0x66e   : > { %11682 = vmatmul.mubr.msk.bf16.vlgmr.msra.gmra.mrb[40].mxu1 %vm3663_vm5, %v14029_v7 }
 0x66f   : > { %11685 = vmatprep.mubr.msk.bf16.mxu1 %vm3663_vm5, %v14032_v20  ;;  %11690 = vmatpush3.bf16.msra.mxu1 %v5141_v30 }
 0x670   : > { %12790 = vmatprep.subr.msk.bf16.mxu1 %vm3711_vm4, %v10521_v58 }
 0x676   : > { %11686 = vmatmul.mubr.msk.bf16.gmra.mrb[44].mxu1 %vm3663_vm5, %v14040_v51 }
 0x677   : > { %11691 = vmatprep.mubr.msk.bf16.mxu1 %vm3663_vm5, %v5122_v5 }
 0x67e   : > { %11692 = vmatmul.mubr.msk.bf16.vlgmr.msra.gmra.mrb[40].mxu1 %vm3663_vm5, %v5123_v33 }
 0x67f   : > { %11695 = vmatprep.mubr.msk.bf16.mxu1 %vm3663_vm5, %v5124_v8  ;;  %11700 = vmatpush3.bf16.msra.mxu1 %v5243_v29 }
 0x680   : > { %12791 = vmatprep.subr.msk.bf16.mxu1 %vm3711_vm4, %v10526_v9 }
 0x686   : > { %11696 = vmatmul.mubr.msk.bf16.gmra.mrb[44].mxu1 %vm3663_vm5, %v5125_v41 }
 0x687   : > { %11701 = vmatprep.mubr.msk.bf16.mxu1 %vm3663_vm5, %v5224_v43 }
 0x68e   : > { %11702 = vmatmul.mubr.msk.bf16.vlgmr.msra.gmra.mrb[40].mxu1 %vm3663_vm5, %v5225_v45 }
 0x68f   : > { %11705 = vmatprep.mubr.msk.bf16.mxu1 %vm3663_vm5, %v5226_v26  ;;  %11710 = vmatpush3.bf16.msra.mxu1 %v5345_v21 }
 0x690   : > { %12792 = vmatprep.subr.msk.bf16.mxu1 %vm3711_vm4, %v10531_v27 }
 0x696   : > { %11706 = vmatmul.mubr.msk.bf16.gmra.mrb[44].mxu1 %vm3663_vm5, %v5227_v53 }
 0x697   : > { %11711 = vmatprep.mubr.msk.bf16.mxu1 %vm3663_vm5, %v5326_v6 }
 0x69e   : > { %11712 = vmatmul.mubr.msk.bf16.vlgmr.msra.gmra.mrb[40].mxu1 %vm3663_vm5, %v5327_v52 }
 0x69f   : > { %11715 = vmatprep.mubr.msk.bf16.mxu1 %vm3663_vm5, %v5328_v40  ;;  %11720 = vmatpush3.bf16.msra.mxu1 %v5447_v3 }
 0x6a0   : > { %12793 = vmatprep.subr.msk.bf16.mxu1 %vm3711_vm4, %v10536_v4  ;;  %v12869_v4 = vld [vmem:[%s14829_s22 + $0x10] sm:$0xff]  }
 0x6a6   : > { %11716 = vmatmul.mubr.msk.bf16.gmra.mrb[44].mxu1 %vm3663_vm5, %v5329_v36  ;;  %v12871_v36 = vld [vmem:[%s14829_s22] sm:$0xff]  }
 0x6a7   : > { %11721 = vmatprep.mubr.msk.bf16.mxu1 %vm3663_vm5, %v14012_v44  ;;  %v5651_v44 = vsel %vm3711_vm4, %v10541_v31, 0 }
 0x6ae   : > { %11722 = vmatmul.mubr.msk.bf16.vlgmr.msra.gmra.mrb[40].mxu1 %vm3663_vm5, %v14015_v32  ;;  %v14094_v32 = vld [vmem:[#allocation2 + $0xa2] sm:$0xff] }
 0x6af   : > { %11725 = vmatprep.mubr.msk.bf16.mxu1 %vm3663_vm5, %v14023_v61  ;;  %11730 = vmatpush3.bf16.msra.mxu1 %v5549_v63  ;;  %v5533_v61 = vpack.c.bf16 %v14094_v32, %v5223_v23  ;;  %v10547_v63 = vld [vmem:[%s14830_s26] ss:$0 sm:$0xff]  ;;  %s945_s26 = scalar_lea.vmem %s13124_s27, %s14846_s12 }
 0x6b0   : > { %12794 = vmatprep.subr.msk.bf16.mxu1 %vm3711_vm4, %v10541_v31 }
 0x6b6   : > { %11726 = vmatmul.mubr.msk.bf16.gmra.mrb[44].mxu1 %vm3663_vm5, %v5431_v62 }
 0x6b7   : > { %11731 = vmatprep.mubr.msk.bf16.mxu1 %vm3663_vm5, %v13981_v24  ;;  %v5774_v24 = vsel %vm3711_vm4, %v5753_v15, 0 }
 0x6be   : > { %11732 = vmatmul.mubr.msk.bf16.vlgmr.msra.gmra.mrb[40].mxu1 %vm3663_vm5, %v13994_v54  ;;  %v14105_v54 = vld [vmem:[#allocation2 + $0xa3] sm:$0xff] }
 0x6bf   : > { %11735 = vmatprep.mubr.msk.bf16.mxu1 %vm3663_vm5, %v14006_v48  ;;  %11740 = vmatpush3.bf16.msra.mxu1 %v5651_v44  ;;  %v5635_v48 = vpack.c.bf16 %v14105_v54, %v5325_v47  ;;  %v12870_v47 = vld [vmem:[%s14829_s22 + $0x18] sm:$0xff]  }
 0x6c0   : > { %12795 = vmatprep.subr.msk.bf16.mxu1 %vm3711_vm4, %v5753_v15 }
 0x6c6   : > { %11736 = vmatmul.mubr.msk.bf16.gmra.mrb[44].mxu1 %vm3663_vm5, %v5533_v61 }
 0x6c7   : > { %11741 = vmatprep.mubr.msk.bf16.mxu1 %vm3663_vm5, %v14029_v7 }
 0x6ce   : > { %11742 = vmatmul.mubr.msk.bf16.vlgmr.msra.gmra.mrb[40].mxu1 %vm3663_vm5, %v14032_v20 }
 0x6cf   : > { %11745 = vmatprep.mubr.msk.bf16.mxu1 %vm3663_vm5, %v14040_v51  ;;  %11750 = vmatpush3.bf16.msra.mxu1 %v5774_v24 }
 0x6d0   : > { %11759 = vmatprep.subr.bf16.mxu1 %v12869_v4 }
 0x6d6   : > { %11746 = vmatmul.mubr.msk.bf16.gmra.mrb[44].mxu1 %vm3663_vm5, %v5635_v48 }
 0x7a1   : > { %v11743_v60 = vpop.f32.mrb[40].mxu1 }
 0x7a2   : > { %v5735_v16 = vadd.f32 %v11743_v60, %v10546_v59  ;;  %v5687_v34 = vpop.f32.mrb[41].mxu1 }
 0x7a3   : > { %v5733_v7 = vadd.f32 %v10546_v59, %v5687_v34  ;;  %v11744_v30 = vpop.f32.mrb[42].mxu1 }
 0x7a4   : > { %v5736_v58 = vadd.f32 %v11744_v30, %v10546_v59  ;;  %v5690_v18 = vpop.f32.mrb[43].mxu1  ;;  %v5743_v20 = vmax.f32 %v5735_v16, 0.0 }
 0x7a5   : > { %v5734_v25 = vadd.f32 %v10546_v59, %v5690_v18  ;;  %v5741_v33 = vmax.f32 %v5733_v7, 0.0 }
 0x7a6   : > { %v5744_v5 = vmax.f32 %v5736_v58, 0.0 }
 0x7a7   : > { %v5742_v51 = vmax.f32 %v5734_v25, 0.0 }
 0x7a8   : > { %v5750_v29 = vpack.c.bf16 %v5744_v5, %v5743_v20 }
 0x7a9   : > { %v5749_v8 = vpack.c.bf16 %v5742_v51, %v5741_v33  ;;  %v11747_v9 = vpop.f32.mrb[44].mxu1 }
 0x7aa   : > { %v5739_v39 = vadd.f32 %v11747_v9, %v10546_v59  ;;  %v5703_v41 = vpop.f32.mrb[45].mxu1 }
 0x7ab   : > { %v5737_v43 = vadd.f32 %v10546_v59, %v5703_v41  ;;  %v11748_v45 = vpop.f32.mrb[46].mxu1  ;;  %11751 = vmatprep.mubr.msk.bf16.mxu1 %vm3663_vm5, %v5749_v8 }
 0x7ac   : > { %v5740_v21 = vadd.f32 %v11748_v45, %v10546_v59  ;;  %v5706_v26 = vpop.f32.mrb[47].mxu1  ;;  %11752 = vmatmul.mubr.msk.bf16.vlgmr.msra.gmra.mrb[48].mxu1 %vm3663_vm5, %v5750_v29  ;;  %v5747_v23 = vmax.f32 %v5739_v39, 0.0  ;;  %v14136_v29 = vld [vmem:[#allocation2 + $0x12] sm:$0xff]  ;;  %v12873_v39 = vld [vmem:[%s14829_s22 + $0x20] sm:$0xff]  }
 0x7ad   : > { %v5738_v27 = vadd.f32 %v10546_v59, %v5706_v26  ;;  %v5745_v6 = vmax.f32 %v5737_v43, 0.0  ;;  %11760 = vmatpush3.bf16.msra.mxu1 %v12869_v4 }
 0x7ae   : > { %v5748_v53 = vmax.f32 %v5740_v21, 0.0  ;;  %11761 = vmatprep.subr.bf16.mxu1 %v12870_v47 }
 0x7af   : > { %v5746_v52 = vmax.f32 %v5738_v27, 0.0 }
 0x7b0   : > { %v5752_v3 = vpack.c.bf16 %v5748_v53, %v5747_v23 }
 0x7b1   : > { %v5751_v40 = vpack.c.bf16 %v5746_v52, %v5745_v6  ;;  %11762 = vmatpush3.bf16.msra.mxu1 %v12870_v47 }
 0x7b2   : > { %11771 = vmatprep.subr.bf16.mxu1 %v12871_v36 }
 0x7b3   : > { %11755 = vmatprep.mubr.msk.bf16.mxu1 %vm3663_vm5, %v5751_v40 }
 0x7b4   : > { %11756 = vmatmul.mubr.msk.bf16.gmra.mrb[52].mxu1 %vm3663_vm5, %v5752_v3 }
 0x87f   : > { %v11753_v31 = vpop.f32.mrb[48].mxu1 }
 0x880   : > { %v5819_v62 = vadd.f32 %v11753_v31, %v10547_v63  ;;  %v5810_v44 = vpop.f32.mrb[49].mxu1 }
 0x881   : > { %v5811_v15 = vadd.f32 %v10547_v63, %v5810_v44  ;;  %v11754_v61 = vpop.f32.mrb[50].mxu1  ;;  %v14833_v44 = vld [vmem:[#allocation20_spill] sm:$0xff] }
 0x882   : > { %v5843_v24 = vadd.f32 %v5819_v62, %v4699_v22  ;;  %v5822_v48 = vadd.f32 %v11754_v61, %v10547_v63  ;;  %v5813_v59 = vpop.f32.mrb[51].mxu1  ;;  %6925 = vrot.lane.b32.xlu0 %v14833_v44, %s12976_s1  ;;  %v14834_v61 = vld [vmem:[#allocation21_spill] sm:$0xff] }
 0x883   : > { %v5841_v60 = vadd.f32 %v5811_v15, %v4697_v0  ;;  %v5814_v16 = vadd.f32 %v10547_v63, %v5813_v59 }
 0x884   : > { %v5851_v34 = vmax.f32 %v5843_v24, 0.0  ;;  %v5844_v7 = vadd.f32 %v5822_v48, %v4700_v42 }
 0x885   : > { %v5849_v30 = vmax.f32 %v5841_v60, 0.0  ;;  %v5842_v58 = vadd.f32 %v5814_v16, %v4698_v50 }
 0x886   : > { %5859 = vst.msk [vmem:[#allocation2 + $0x42] sm:$0xff] %vm947_vm1, %v5851_v34  ;;  %v5852_v18 = vmax.f32 %v5844_v7, 0.0  ;;  %v12876_v34 = vld [vmem:[%s14829_s22 + $0x38] sm:$0xff]  }
 0x887   : > { %5857 = vst.msk [vmem:[#allocation2 + $0x22] sm:$0xff] %vm947_vm1, %v5849_v30  ;;  %v5850_v56 = vmax.f32 %v5842_v58, 0.0  ;;  %v11757_v22 = vpop.f32.mrb[52].mxu1  ;;  %v12877_v30 = vld [vmem:[%s14829_s22 + $0x40] sm:$0xff]  }
 0x888   : > { %5860 = vst.msk [vmem:[#allocation2 + $0x52] sm:$0xff] %vm947_vm1, %v5852_v18  ;;  %v5835_v28 = vadd.f32 %v11757_v22, %v10547_v63  ;;  %v5826_v0 = vpop.f32.mrb[53].mxu1 }
 0x889   : > { %5858 = vst.msk [vmem:[#allocation2 + $0x32] sm:$0xff] %vm947_vm1, %v5850_v56  ;;  %v5827_v25 = vadd.f32 %v10547_v63, %v5826_v0  ;;  %v11758_v14 = vpop.f32.mrb[54].mxu1  ;;  %v12878_v0 = vld [vmem:[%s14829_s22 + $0x48] sm:$0xff]  }
 0x88a   : > { %v5847_v42 = vadd.f32 %v5835_v28, %v4703_v49  ;;  %v5838_v35 = vadd.f32 %v11758_v14, %v10547_v63  ;;  %v5829_v50 = vpop.f32.mrb[55].mxu1  ;;  %v12879_v14 = vld [vmem:[%s14829_s22 + $0x50] sm:$0xff]  }
 0x88b   : > { %v5845_v20 = vadd.f32 %v5827_v25, %v4701_v19  ;;  %v5830_v5 = vadd.f32 %v10547_v63, %v5829_v50  ;;  %v14199_v63 = vld [vmem:[#allocation2 + $0x13] sm:$0xff] }
 0x88c   : > { %v5855_v33 = vmax.f32 %v5847_v42, 0.0  ;;  %v5848_v51 = vadd.f32 %v5838_v35, %v4704_v57 }
 0x88d   : > { %v5853_v8 = vmax.f32 %v5845_v20, 0.0  ;;  %v5846_v9 = vadd.f32 %v5830_v5, %v4702_v2  ;;  %v14149_v19 = vld [vmem:[#allocation2 + $0x42] sm:$0xff]  ;;  %v12880_v5 = vld [vmem:[%s14829_s22 + $0x58] sm:$0xff]  }
 0x88e   : > { %5863 = vst.msk [vmem:[#allocation2 + $0x82] sm:$0xff] %vm947_vm1, %v5855_v33  ;;  %v5856_v17 = vmax.f32 %v5848_v51, 0.0  ;;  %v14141_v49 = vld [vmem:[#allocation2 + $0x22] sm:$0xff] }
 0x88f   : > { %5861 = vst.msk [vmem:[#allocation2 + $0x62] sm:$0xff] %vm947_vm1, %v5853_v8  ;;  %v5854_v38 = vmax.f32 %v5846_v9, 0.0  ;;  %v5889_v46 = vpack.c.bf16 %v14141_v49, %v14136_v29  ;;  %v12872_v2 = vld [vmem:[%s14829_s22 + $0x8] sm:$0xff]   ;;  %v14161_v41 = vld [vmem:[#allocation2 + $0x52] sm:$0xff]  ;;  %v12881_v51 = vld [vmem:[%s14829_s22 + $0x60] sm:$0xff]  }
 0x890   : > { %5864 = vst.msk [vmem:[#allocation2 + $0x92] sm:$0xff] %vm947_vm1, %v5856_v17  ;;  %v14147_v57 = vld [vmem:[#allocation2 + $0x32] sm:$0xff]  ;;  %v5866_v21 = vld [vmem:[#allocation2 + $0x21] sm:$0xff]  ;;  %v6313_v20 = vpack.c.bf16 %v14161_v41, %v14149_v19 }
 0x891   : > { %5862 = vst.msk [vmem:[#allocation2 + $0x72] sm:$0xff] %vm947_vm1, %v5854_v38  ;;  %11763 = vmatprep.mubr.msk.bf16.mxu1 %vm947_vm1, %v5889_v46  ;;  %v14155_v55 = vpack.c.bf16 %v14149_v19, %v14147_v57  ;;  %v5873_v53 = vpack.c.bf16 %v5866_v21, %v13996_v1  ;;  %v5867_v6 = vld [vmem:[#allocation2 + $0x31] sm:$0xff]  ;;  %v5868_v3 = vld [vmem:[#allocation2 + $0x41] sm:$0xff]  ;;  %v6312_v50 = vpack.c.bf16 %v14147_v57, %v14141_v49 }
 0x892   : > { %v14186_v40 = vpack.c.bf16 %v5868_v3, %v5867_v6  ;;  %v5869_v4 = vld [vmem:[#allocation2 + $0x51] sm:$0xff]  ;;  %v12874_v1 = vld [vmem:[%s14829_s22 + $0x28] sm:$0xff]   ;;  %v6198_v22 = vpack.c.bf16 %v5867_v6, %v5866_v21  ;;  %v10638_v6 = vld [vmem:[%s14836_s2] ss:$0 sm:$0xff] }
 0x893   : > { %11764 = vmatmul.mubr.msk.bf16.vlgmr.msra.gmra.mrb[56].mxu1 %vm947_vm1, %v14155_v55  ;;  %v6077_v11 = vld [vmem:[#allocation2 + $0x23] sm:$0xff]  ;;  %v6078_v24 = vld [vmem:[#allocation2 + $0x33] sm:$0xff]  ;;  %v6199_v28 = vpack.c.bf16 %v5869_v4, %v5868_v3 }
 0x894   : > { %11772 = vmatpush3.bf16.msra.mxu1 %v12871_v36  ;;  %v14832_v36 = vld [vmem:[#allocation19_spill] sm:$0xff]  ;;  %v6084_v15 = vpack.c.bf16 %v6077_v11, %v14199_v63  ;;  %v6079_v59 = vld [vmem:[#allocation2 + $0x43] sm:$0xff]  ;;  %v6080_v16 = vld [vmem:[#allocation2 + $0x53] sm:$0xff]  ;;  %v6426_v17 = vpack.c.bf16 %v6078_v24, %v6077_v11 }
 0x895   : > { %11773 = vmatprep.subr.bf16.mxu1 %v12872_v2  ;;  %v14171_v27 = vld [vmem:[#allocation2 + $0x82] sm:$0xff]  ;;  %6923 = vrot.lane.b32.xlu1 %v14832_v36, %s12976_s1  ;;  %v14209_v60 = vpack.c.bf16 %v6079_v59, %v6078_v24  ;;  %v6427_v49 = vpack.c.bf16 %v6080_v16, %v6079_v59  ;;  %v12883_v57 = vld [vmem:[%s14829_s22 + $0x70] sm:$0xff]  }
 0x896   : > { %v14163_v43 = vld [vmem:[#allocation2 + $0x62] sm:$0xff] }
 0x897   : > { %v14167_v45 = vpack.c.bf16 %v14163_v43, %v14161_v41  ;;  %v5870_v52 = vld [vmem:[#allocation2 + $0x61] sm:$0xff]  ;;  %v6197_v42 = vld [vmem:[#allocation2 + $0x91] sm:$0xff] }
 0x898   : > { %v14169_v26 = vld [vmem:[#allocation2 + $0x72] sm:$0xff]  ;;  %11774 = vmatpush3.bf16.msra.mxu1 %v12872_v2  ;;  %v14190_v47 = vpack.c.bf16 %v5870_v52, %v5869_v4  ;;  %v5872_v31 = vld [vmem:[#allocation2 + $0x81] sm:$0xff] }
 0x899   : > { %11767 = vmatprep.mubr.msk.bf16.mxu1 %vm947_vm1, %v14167_v45  ;;  %v14177_v23 = vpack.c.bf16 %v14171_v27, %v14169_v26  ;;  %11783 = vmatprep.subr.bf16.mxu1 %v12873_v39  ;;  %v5871_v13 = vld [vmem:[#allocation2 + $0x71] sm:$0xff]  ;;  %v6081_v48 = vld [vmem:[#allocation2 + $0x63] sm:$0xff]  ;;  %v6201_v35 = vpack.c.bf16 %v6197_v42, %v5872_v31  ;;  %v6314_v33 = vpack.c.bf16 %v14169_v26, %v14163_v43 }
 0x89a   : > { %v14201_v62 = vpack.c.bf16 %v5872_v31, %v5871_v13  ;;  %6927 = vrot.lane.b32.xlu1 %v14834_v61, %s12976_s1  ;;  %v14212_v7 = vpack.c.bf16 %v6081_v48, %v6080_v16  ;;  %v6082_v58 = vld [vmem:[#allocation2 + $0x73] sm:$0xff]  ;;  %v6083_v18 = vld [vmem:[#allocation2 + $0x83] sm:$0xff]  ;;  %v6200_v25 = vpack.c.bf16 %v5871_v13, %v5870_v52  ;;  %v6543_v43 = vpack.c.bf16 %v14081_v37, %v6197_v42  ;;  %v6918_v52 = vpop.permute.xlu1 %6917 }
 0x89b   : > { %11768 = vmatmul.mubr.msk.bf16.gmra.mrb[60].mxu1 %vm947_vm1, %v14177_v23  ;;  %v14219_v56 = vpack.c.bf16 %v6083_v18, %v6082_v58  ;;  %v6311_v8 = vld [vmem:[#allocation2 + $0x92] sm:$0xff]  ;;  %v12882_v38 = vld [vmem:[%s14829_s22 + $0x68] sm:$0xff]   ;;  %v6428_v46 = vpack.c.bf16 %v6082_v58, %v6081_v48  ;;  %v12885_v41 = vld [vmem:[%s14829_s22 + $0x80] sm:$0xff]  }
 0x89c   : > { %11775 = vmatprep.mubr.msk.bf16.mxu1 %vm947_vm1, %v5873_v53  ;;  %v6315_v9 = vpack.c.bf16 %v6311_v8, %v14171_v27  ;;  %v6425_v19 = vld [vmem:[#allocation2 + $0x93] sm:$0xff]  ;;  %v12886_v21 = vld [vmem:[%s14829_s22 + $0x88] sm:$0xff]   ;;  %v6657_v26 = vpack.c.bf16 %v14094_v32, %v6311_v8  ;;  %v12888_v53 = vld [vmem:[%s14835_s28] sm:$0x1f]  }
 0x89d   : > { %v6429_v2 = vpack.c.bf16 %v6425_v19, %v6083_v18  ;;  %v6771_v37 = vpack.c.bf16 %v14105_v54, %v6425_v19  ;;  %v14278_v27 = vld [vmem:[#allocation2 + $0x11] sm:$0xff]  ;;  %v6914_v54 = vpop.permute.xlu0 %6913  ;;  %v7080_v8 = vsel %vm6993_vm6, %v12888_v53, 0 }
 0x89e   : > { %v6920_v44 = vpop.permute.xlu1 %6919 }
 0x8a1   : > { %v6916_v3 = vpop.permute.xlu0 %6915 }
 0x8a3   : > { %11776 = vmatmul.mubr.msk.bf16.vlgmr.msra.gmra.mrb[56].mxu1 %vm947_vm1, %v14186_v40 }
 0x8a4   : > { %11779 = vmatprep.mubr.msk.bf16.mxu1 %vm947_vm1, %v14190_v47  ;;  %11784 = vmatpush3.bf16.msra.mxu1 %v12873_v39  ;;  %v12884_v39 = vld [vmem:[%s14829_s22 + $0x78] sm:$0xff]  }
 0x8a5   : > { %11785 = vmatprep.subr.bf16.mxu1 %v12874_v1 }
 0x8a8   : > { %11786 = vmatpush3.bf16.msra.mxu1 %v12874_v1 }
 0x8a9   : > { %11795 = vmatprep.subr.bf16.mxu1 %v12875_v10 }
 0x8ab   : > { %11780 = vmatmul.mubr.msk.bf16.gmra.mrb[60].mxu1 %vm947_vm1, %v14201_v62 }
 0x8ac   : > { %11787 = vmatprep.mubr.msk.bf16.mxu1 %vm947_vm1, %v6084_v15  ;;  %v6922_v15 = vpop.permute.xlu0 %6921 }
 0x8b3   : > { %11788 = vmatmul.mubr.msk.bf16.vlgmr.msra.gmra.mrb[56].mxu1 %vm947_vm1, %v14209_v60 }
 0x8b4   : > { %11791 = vmatprep.mubr.msk.bf16.mxu1 %vm947_vm1, %v14212_v7  ;;  %11796 = vmatpush3.bf16.msra.mxu1 %v12875_v10 }
 0x8b5   : > { %11797 = vmatprep.subr.bf16.mxu1 %v12876_v34 }
 0x8b8   : > { %11798 = vmatpush3.bf16.msra.mxu1 %v12876_v34 }
 0x8b9   : > { %11807 = vmatprep.subr.bf16.mxu1 %v12877_v30 }
 0x8bb   : > { %11792 = vmatmul.mubr.msk.bf16.gmra.mrb[60].mxu1 %vm947_vm1, %v14219_v56 }
 0x8bc   : > { %11799 = vmatprep.mubr.msk.bf16.mxu1 %vm947_vm1, %v6198_v22 }
 0x8c3   : > { %11800 = vmatmul.mubr.msk.bf16.vlgmr.msra.gmra.mrb[56].mxu1 %vm947_vm1, %v6199_v28 }
 0x8c4   : > { %11803 = vmatprep.mubr.msk.bf16.mxu1 %vm947_vm1, %v6200_v25  ;;  %11808 = vmatpush3.bf16.msra.mxu1 %v12877_v30 }
 0x8c5   : > { %11809 = vmatprep.subr.bf16.mxu1 %v12878_v0 }
 0x8c8   : > { %11810 = vmatpush3.bf16.msra.mxu1 %v12878_v0 }
 0x8c9   : > { %11819 = vmatprep.subr.bf16.mxu1 %v12879_v14 }
 0x8cb   : > { %11804 = vmatmul.mubr.msk.bf16.gmra.mrb[60].mxu1 %vm947_vm1, %v6201_v35 }
 0x8cc   : > { %11811 = vmatprep.mubr.msk.bf16.mxu1 %vm947_vm1, %v6312_v50 }
 0x8d3   : > { %11812 = vmatmul.mubr.msk.bf16.vlgmr.msra.gmra.mrb[56].mxu1 %vm947_vm1, %v6313_v20 }
 0x8d4   : > { %11815 = vmatprep.mubr.msk.bf16.mxu1 %vm947_vm1, %v6314_v33  ;;  %11820 = vmatpush3.bf16.msra.mxu1 %v12879_v14 }
 0x8d5   : > { %11821 = vmatprep.subr.bf16.mxu1 %v12880_v5 }
 0x8d8   : > { %11822 = vmatpush3.bf16.msra.mxu1 %v12880_v5 }
 0x8d9   : > { %11831 = vmatprep.subr.bf16.mxu1 %v12881_v51 }
 0x8db   : > { %11816 = vmatmul.mubr.msk.bf16.gmra.mrb[60].mxu1 %vm947_vm1, %v6315_v9  ;;  %v12889_v9 = vld [vmem:[%s14835_s28 + $0x10] sm:$0x1f]  }
 0x8dc   : > { %11823 = vmatprep.mubr.msk.bf16.mxu1 %vm947_vm1, %v6426_v17 }
 0x8e3   : > { %11824 = vmatmul.mubr.msk.bf16.vlgmr.msra.gmra.mrb[56].mxu1 %vm947_vm1, %v6427_v49 }
 0x8e4   : > { %11827 = vmatprep.mubr.msk.bf16.mxu1 %vm947_vm1, %v6428_v46  ;;  %11832 = vmatpush3.bf16.msra.mxu1 %v12881_v51 }
 0x8e5   : > { %11833 = vmatprep.subr.bf16.mxu1 %v12882_v38 }
 0x8e8   : > { %11834 = vmatpush3.bf16.msra.mxu1 %v12882_v38 }
 0x8e9   : > { %11843 = vmatprep.subr.bf16.mxu1 %v12883_v57 }
 0x8eb   : > { %11828 = vmatmul.mubr.msk.bf16.gmra.mrb[60].mxu1 %vm947_vm1, %v6429_v2 }
 0x8ec   : > { %11835 = vmatprep.mubr.msk.bf16.mxu1 %vm947_vm1, %v14186_v40 }
 0x8f3   : > { %11836 = vmatmul.mubr.msk.bf16.vlgmr.msra.gmra.mrb[56].mxu1 %vm947_vm1, %v14190_v47 }
 0x8f4   : > { %11839 = vmatprep.mubr.msk.bf16.mxu1 %vm947_vm1, %v14201_v62  ;;  %11844 = vmatpush3.bf16.msra.mxu1 %v12883_v57  ;;  %v6926_v18 = vpop.permute.xlu0 %6925 }
 0x8f5   : > { %11845 = vmatprep.subr.bf16.mxu1 %v12884_v39 }
 0x8f8   : > { %11846 = vmatpush3.bf16.msra.mxu1 %v12884_v39 }
 0x8f9   : > { %11855 = vmatprep.subr.bf16.mxu1 %v12885_v41 }
 0x8fb   : > { %11840 = vmatmul.mubr.msk.bf16.gmra.mrb[60].mxu1 %vm947_vm1, %v6543_v43  ;;  %v14337_v43 = vld [vmem:[#allocation2 + $0x10] sm:$0xff] }
 0x8fc   : > { %11847 = vmatprep.mubr.msk.bf16.mxu1 %vm947_vm1, %v14155_v55  ;;  %v12887_v55 = vld [vmem:[%s14835_s28 + $0x8] sm:$0x1f]  }
 0x8fd   : > { %12796 = vmatprep.subr.msk.bf16.mxu0 %vm6993_vm6, %v12887_v55  ;;  %v6995_v32 = vsel %vm6993_vm6, %v12887_v55, 0 }
 0x8fe   : > { %11868 = vmatpush3.bf16.msra.mxu0 %v6995_v32 }
 0x8ff   : > { %12797 = vmatprep.subr.msk.bf16.mxu0 %vm6993_vm6, %v12888_v53 }
 0x903   : > { %11848 = vmatmul.mubr.msk.bf16.vlgmr.msra.gmra.mrb[56].mxu1 %vm947_vm1, %v14167_v45  ;;  %v6960_v45 = vld [vmem:[#allocation2 + $0x1] sm:$0xff] }
 0x904   : > { %11851 = vmatprep.mubr.msk.bf16.mxu1 %vm947_vm1, %v14177_v23  ;;  %11856 = vmatpush3.bf16.msra.mxu1 %v12885_v41  ;;  %v6968_v23 = vpack.c.bf16 %v14278_v27, %v6960_v45  ;;  %v6946_v41 = vld [vmem:[#allocation2] sm:$0xff] }
 0x905   : > { %11857 = vmatprep.subr.bf16.mxu1 %v12886_v21 }
 0x906   : > { %11869 = vmatprep.mubr.msk.bf16.mxu0 %vm6980_vm7, %v6968_v23 }
 0x908   : > { %11858 = vmatpush3.bf16.msra.mxu1 %v12886_v21 }
 0x90b   : > { %11852 = vmatmul.mubr.msk.bf16.gmra.mrb[60].mxu1 %vm947_vm1, %v6657_v26 }
 0x90c   : > { %11859 = vmatprep.mubr.msk.bf16.mxu1 %vm947_vm1, %v14209_v60  ;;  %v6924_v60 = vpop.permute.xlu1 %6923 }
 0x910   : > { %v6928_v25 = vpop.permute.xlu1 %6927 }
 0x913   : > { %11860 = vmatmul.mubr.msk.bf16.vlgmr.msra.gmra.mrb[56].mxu1 %vm947_vm1, %v14212_v7 }
 0x914   : > { %11863 = vmatprep.mubr.msk.bf16.mxu1 %vm947_vm1, %v14219_v56 }
 0x91b   : > { %11864 = vmatmul.mubr.msk.bf16.gmra.mrb[60].mxu1 %vm947_vm1, %v6771_v37 }
 0x9e6   : > { %v11861_v40 = vpop.f32.mrb[56].mxu1 }
 0x9e7   : > { %v6883_v4 = vadd.f32 %v11861_v40, %v10638_v6  ;;  %v6835_v1 = vpop.f32.mrb[57].mxu1 }
 0x9e8   : > { %v6881_v47 = vadd.f32 %v10638_v6, %v6835_v1  ;;  %v11862_v10 = vpop.f32.mrb[58].mxu1 }
 0x9e9   : > { %v6891_v12 = vmax.f32 %v6883_v4, 0.0  ;;  %v6884_v13 = vadd.f32 %v11862_v10, %v10638_v6  ;;  %v6838_v36 = vpop.f32.mrb[59].mxu1 }
 0x9ea   : > { %v6889_v11 = vmax.f32 %v6881_v47, 0.0  ;;  %v6882_v31 = vadd.f32 %v10638_v6, %v6838_v36  ;;  %v7180_v36 = vsel %vm6993_vm6, %v12889_v9, 0 }
 0x9eb   : > { %6899 = vst.msk [vmem:[#allocation2 + $0x42] sm:$0xff] %vm3663_vm5, %v6891_v12  ;;  %v6892_v62 = vmax.f32 %v6884_v13, 0.0 }
 0x9ec   : > { %6897 = vst.msk [vmem:[#allocation2 + $0x22] sm:$0xff] %vm3663_vm5, %v6889_v11  ;;  %v6890_v61 = vmax.f32 %v6882_v31, 0.0  ;;  %v12890_v11 = vld [vmem:[%s14835_s28 + $0x18] sm:$0x1f]  }
 0x9ed   : > { %6940 = vst.msk [vmem:[#allocation2 + $0x42] sm:$0xff] %vm6937_vm8, %v6918_v52  ;;  %6938 = vst.msk [vmem:[#allocation2 + $0x22] sm:$0xff] %vm6937_vm8, %v6914_v54  ;;  %v6954_v52 = vpack.c.bf16 %v14337_v43, %v6946_v41 }
 0x9ee   : > { %6900 = vst.msk [vmem:[#allocation2 + $0x52] sm:$0xff] %vm3663_vm5, %v6892_v62  ;;  %6898 = vst.msk [vmem:[#allocation2 + $0x32] sm:$0xff] %vm3663_vm5, %v6890_v61  ;;  %v11865_v24 = vpop.f32.mrb[60].mxu1  ;;  %v7147_v62 = vld [vmem:[#allocation2 + $0x2] sm:$0xff] }
 0x9ef   : > { %6941 = vst.msk [vmem:[#allocation2 + $0x52] sm:$0xff] %vm6937_vm8, %v6920_v44  ;;  %v6887_v48 = vadd.f32 %v11865_v24, %v10638_v6  ;;  %v6851_v59 = vpop.f32.mrb[61].mxu1  ;;  %6939 = vst.msk [vmem:[#allocation2 + $0x32] sm:$0xff] %vm6937_vm8, %v6916_v3  ;;  %v7155_v61 = vpack.c.bf16 %v14136_v29, %v7147_v62  ;;  %v12897_v62 = vld [vmem:[%s14835_s28 + $0x50] sm:$0x1f]  }
 0x9f0   : > { %v6885_v16 = vadd.f32 %v10638_v6, %v6851_v59  ;;  %v11866_v34 = vpop.f32.mrb[62].mxu1 }
 0x9f1   : > { %v6895_v7 = vmax.f32 %v6887_v48, 0.0  ;;  %v6888_v30 = vadd.f32 %v11866_v34, %v10638_v6  ;;  %v6854_v58 = vpop.f32.mrb[63].mxu1 }
 0x9f2   : > { %v6893_v56 = vmax.f32 %v6885_v16, 0.0  ;;  %v6886_v22 = vadd.f32 %v10638_v6, %v6854_v58  ;;  %v12891_v16 = vld [vmem:[%s14835_s28 + $0x20] sm:$0x1f]  }
 0x9f3   : > { %6903 = vst.msk [vmem:[#allocation2 + $0x82] sm:$0xff] %vm3663_vm5, %v6895_v7  ;;  %v6896_v28 = vmax.f32 %v6888_v30, 0.0  ;;  %v7255_v7 = vld [vmem:[#allocation2 + $0x3] sm:$0xff] }
 0x9f4   : > { %v6964_v0 = vld [vmem:[#allocation2 + $0x41] sm:$0xff]  ;;  %6901 = vst.msk [vmem:[#allocation2 + $0x62] sm:$0xff] %vm3663_vm5, %v6893_v56  ;;  %v6894_v14 = vmax.f32 %v6886_v22, 0.0  ;;  %v7263_v58 = vpack.c.bf16 %v14199_v63, %v7255_v7 }
 0x9f5   : > { %6944 = vst.msk [vmem:[#allocation2 + $0x82] sm:$0xff] %vm6937_vm8, %v6926_v18  ;;  %6942 = vst.msk [vmem:[#allocation2 + $0x62] sm:$0xff] %vm6937_vm8, %v6922_v15  ;;  %v14298_v35 = vld [vmem:[#allocation2 + $0x42] sm:$0xff] }
 0x9f6   : > { %6904 = vst.msk [vmem:[#allocation2 + $0x92] sm:$0xff] %vm3663_vm5, %v6896_v28  ;;  %v6965_v42 = vld [vmem:[#allocation2 + $0x51] sm:$0xff]  ;;  %6902 = vst.msk [vmem:[#allocation2 + $0x72] sm:$0xff] %vm3663_vm5, %v6894_v14  ;;  %v14301_v50 = vld [vmem:[#allocation2 + $0x21] sm:$0xff]  ;;  %v7396_v28 = vsel %vm6993_vm6, %v12891_v16, 0 }
 0x9f7   : > { %v6963_v20 = vld [vmem:[#allocation2 + $0x31] sm:$0xff]  ;;  %v14303_v5 = vpack.c.bf16 %v6965_v42, %v6964_v0  ;;  %6945 = vst.msk [vmem:[#allocation2 + $0x92] sm:$0xff] %vm6937_vm8, %v6928_v25  ;;  %6943 = vst.msk [vmem:[#allocation2 + $0x72] sm:$0xff] %vm6937_vm8, %v6924_v60  ;;  %v14314_v49 = vld [vmem:[#allocation2 + $0x43] sm:$0xff]  ;;  %v7288_v60 = vsel %vm6993_vm6, %v12890_v11, 0 }
 0x9f8   : > { %v7150_v33 = vld [vmem:[#allocation2 + $0x32] sm:$0xff]  ;;  %v14307_v51 = vpack.c.bf16 %v6963_v20, %v14301_v50  ;;  %v14318_v46 = vpack.c.bf16 %v6964_v0, %v6963_v20  ;;  %v14325_v19 = vld [vmem:[#allocation2 + $0x44] sm:$0xff] }
 0x9f9   : > { %v14312_v17 = vld [vmem:[#allocation2 + $0x33] sm:$0xff]  ;;  %v14321_v57 = vpack.c.bf16 %v14298_v35, %v7150_v33  ;;  %v14365_v47 = vld [vmem:[#allocation2 + $0x40] sm:$0xff]  ;;  %v12892_v0 = vld [vmem:[%s14835_s28 + $0x28] sm:$0x1f]  }
 0x9fa   : > { %v14316_v38 = vld [vmem:[#allocation2 + $0x34] sm:$0xff]  ;;  %11870 = vmatmul.mubr.msk.bf16.vlgmr.msra.gmra.mrb[8].mxu0 %vm6980_vm7, %v14307_v51  ;;  %v14329_v2 = vpack.c.bf16 %v14314_v49, %v14312_v17  ;;  %v6948_v12 = vld [vmem:[#allocation2 + $0x20] sm:$0xff] }
 0x9fb   : > { %11873 = vmatprep.mubr.msk.bf16.mxu0 %vm6980_vm7, %v14303_v5  ;;  %11878 = vmatpush3.bf16.msra.mxu0 %v7080_v8  ;;  %v14335_v39 = vpack.c.bf16 %v14325_v19, %v14316_v38  ;;  %v7152_v21 = vld [vmem:[#allocation2 + $0x52] sm:$0xff]  ;;  %v14389_v48 = vld [vmem:[#allocation2 + $0x22] sm:$0xff] }
 0x9fc   : > { %12798 = vmatprep.subr.msk.bf16.mxu0 %vm6993_vm6, %v12889_v9  ;;  %v6966_v26 = vld [vmem:[#allocation2 + $0x61] sm:$0xff]  ;;  %v7260_v55 = vld [vmem:[#allocation2 + $0x53] sm:$0xff]  ;;  %v14392_v59 = vpack.c.bf16 %v7150_v33, %v14389_v48  ;;  %v14397_v34 = vpack.c.bf16 %v7152_v21, %v14298_v35 }
 0x9fd   : > { %v7153_v37 = vld [vmem:[#allocation2 + $0x62] sm:$0xff]  ;;  %v14340_v45 = vld [vmem:[#allocation2 + $0x54] sm:$0xff]  ;;  %v14344_v53 = vpack.c.bf16 %v6966_v26, %v6965_v42  ;;  %v14422_v25 = vpack.c.bf16 %v7260_v55, %v14314_v49 }
 0x9fe   : > { %v7261_v32 = vld [vmem:[#allocation2 + $0x63] sm:$0xff]  ;;  %v14346_v54 = vpack.c.bf16 %v7153_v37, %v7152_v21  ;;  %v14348_v6 = vld [vmem:[#allocation2 + $0x71] sm:$0xff]  ;;  %v14444_v41 = vpack.c.bf16 %v14340_v45, %v14325_v19 }
 0x9ff   : > { %v14342_v23 = vld [vmem:[#allocation2 + $0x64] sm:$0xff]  ;;  %v14351_v3 = vpack.c.bf16 %v7261_v32, %v7260_v55  ;;  %v14358_v4 = vpack.c.bf16 %v14348_v6, %v6966_v26  ;;  %v14363_v1 = vld [vmem:[#allocation2 + $0x30] sm:$0xff]  ;;  %v7479_v26 = vpack.c.bf16 %v6948_v12, %v14337_v43  ;;  %v12894_v55 = vld [vmem:[%s14835_s28 + $0x38] sm:$0x1f]  }
 0xa00   : > { %v14355_v40 = vpack.c.bf16 %v14342_v23, %v14340_v45  ;;  %v14367_v10 = vld [vmem:[#allocation2 + $0x50] sm:$0xff]  ;;  %v14370_v13 = vpack.c.bf16 %v14363_v1, %v6948_v12  ;;  %v6952_v15 = vld [vmem:[#allocation2 + $0x60] sm:$0xff]  ;;  %v14460_v19 = vpack.c.bf16 %v14365_v47, %v14363_v1  ;;  %v12896_v12 = vld [vmem:[%s14835_s28 + $0x48] sm:$0x1f]  }
 0xa01   : > { %v14376_v31 = vpack.c.bf16 %v14367_v10, %v14365_v47  ;;  %v6953_v44 = vld [vmem:[#allocation2 + $0x70] sm:$0xff]  ;;  %v14413_v56 = vld [vmem:[#allocation2 + $0x23] sm:$0xff] }
 0xa02   : > { %11874 = vmatmul.mubr.msk.bf16.gmra.mrb[12].mxu0 %vm6980_vm7, %v14358_v4  ;;  %v14384_v24 = vpack.c.bf16 %v6953_v44, %v6952_v15  ;;  %v14404_v30 = vld [vmem:[#allocation2 + $0x72] sm:$0xff]  ;;  %v14417_v22 = vpack.c.bf16 %v14312_v17, %v14413_v56  ;;  %v7363_v14 = vld [vmem:[#allocation2 + $0x4] sm:$0xff]  ;;  %v7504_v17 = vsel %vm6993_vm6, %v12892_v0, 0 }
 0xa03   : > { %11879 = vmatprep.mubr.msk.bf16.mxu0 %vm6980_vm7, %v6954_v52  ;;  %v14408_v18 = vpack.c.bf16 %v14404_v30, %v7153_v37  ;;  %v7262_v42 = vld [vmem:[#allocation2 + $0x73] sm:$0xff]  ;;  %v7365_v8 = vld [vmem:[#allocation2 + $0x24] sm:$0xff]  ;;  %v7720_v52 = vsel %vm6993_vm6, %v12894_v55, 0 }
 0xa04   : > { %v14429_v35 = vld [vmem:[#allocation2 + $0x14] sm:$0xff]  ;;  %v14432_v33 = vpack.c.bf16 %v7262_v42, %v7261_v32  ;;  %v14438_v9 = vpack.c.bf16 %v14316_v38, %v7365_v8  ;;  %v14465_v32 = vpack.c.bf16 %v6952_v15, %v14367_v10  ;;  %v7478_v43 = vld [vmem:[#allocation2 + $0x80] sm:$0xff] }
 0xa05   : > { %v7371_v20 = vpack.c.bf16 %v14429_v35, %v7363_v14  ;;  %v12893_v49 = vld [vmem:[%s14835_s28 + $0x30] sm:$0x1f]   ;;  %v14472_v45 = vpack.c.bf16 %v7478_v43, %v6953_v44  ;;  %v12895_v1 = vld [vmem:[%s14835_s28 + $0x40] sm:$0x1f]   ;;  %v7911_v15 = vpack.c.bf16 %v7365_v8, %v14429_v35  ;;  %v12902_v8 = vld [vmem:[%s14835_s28 + $0x78] sm:$0x1f]  }
 0xa06   : > { %v7370_v21 = vld [vmem:[#allocation2 + $0x74] sm:$0xff]  ;;  %v7612_v37 = vsel %vm6993_vm6, %v12893_v49, 0  ;;  %v7586_v47 = vld [vmem:[#allocation2 + $0x81] sm:$0xff]  ;;  %v7828_v10 = vsel %vm6993_vm6, %v12895_v1, 0 }
 0xa07   : > { %v14452_v38 = vpack.c.bf16 %v7370_v21, %v14342_v23  ;;  %v7587_v23 = vpack.c.bf16 %v14301_v50, %v14278_v27  ;;  %v14487_v27 = vpack.c.bf16 %v7586_v47, %v14348_v6  ;;  %v7695_v50 = vpack.c.bf16 %v14389_v48, %v14136_v29  ;;  %v7694_v6 = vld [vmem:[#allocation2 + $0x82] sm:$0xff]  ;;  %v12898_v48 = vld [vmem:[%s14835_s28 + $0x58] sm:$0x1f]  }
 0xa08   : > { %v14502_v29 = vpack.c.bf16 %v7694_v6, %v14404_v30  ;;  %v7802_v44 = vld [vmem:[#allocation2 + $0x83] sm:$0xff]  ;;  %v8152_v7 = vsel %vm6993_vm6, %v12898_v48, 0  ;;  %v8234_v35 = vld [vmem:[#allocation2 + $0x92] sm:$0xff] }
 0xa09   : > { %v12899_v30 = vld [vmem:[%s14835_s28 + $0x60] sm:$0x1f]  }
 0xa0a   : > { %11880 = vmatmul.mubr.msk.bf16.vlgmr.msra.gmra.mrb[8].mxu0 %vm6980_vm7, %v14370_v13 }
 0xa0b   : > { %11883 = vmatprep.mubr.msk.bf16.mxu0 %vm6980_vm7, %v14376_v31  ;;  %11888 = vmatpush3.bf16.msra.mxu0 %v7180_v36  ;;  %v7803_v36 = vpack.c.bf16 %v14413_v56, %v14199_v63  ;;  %v14516_v63 = vpack.c.bf16 %v7802_v44, %v7262_v42  ;;  %v12901_v42 = vld [vmem:[%s14835_s28 + $0x70] sm:$0x1f]  }
 0xa0c   : > { %12799 = vmatprep.subr.msk.bf16.mxu0 %vm6993_vm6, %v12890_v11  ;;  %v7936_v11 = vsel %vm6993_vm6, %v12896_v12, 0 }
 0xa12   : > { %11884 = vmatmul.mubr.msk.bf16.gmra.mrb[12].mxu0 %vm6980_vm7, %v14384_v24 }
 0xa13   : > { %11889 = vmatprep.mubr.msk.bf16.mxu0 %vm6980_vm7, %v7155_v61  ;;  %v8044_v61 = vsel %vm6993_vm6, %v12897_v62, 0 }
 0xa1a   : > { %11890 = vmatmul.mubr.msk.bf16.vlgmr.msra.gmra.mrb[8].mxu0 %vm6980_vm7, %v14392_v59 }
 0xa1b   : > { %11893 = vmatprep.mubr.msk.bf16.mxu0 %vm6980_vm7, %v14397_v34  ;;  %11898 = vmatpush3.bf16.msra.mxu0 %v7288_v60  ;;  %v7910_v60 = vld [vmem:[#allocation2 + $0x84] sm:$0xff] }
 0xa1c   : > { %12800 = vmatprep.subr.msk.bf16.mxu0 %vm6993_vm6, %v12891_v16  ;;  %v14529_v16 = vpack.c.bf16 %v7910_v60, %v7370_v21  ;;  %v12903_v21 = vld [vmem:[%s14835_s28 + $0x80] sm:$0x1f]  }
 0xa22   : > { %11894 = vmatmul.mubr.msk.bf16.gmra.mrb[12].mxu0 %vm6980_vm7, %v14408_v18 }
 0xa23   : > { %11899 = vmatprep.mubr.msk.bf16.mxu0 %vm6980_vm7, %v7263_v58  ;;  %v8018_v58 = vld [vmem:[#allocation2 + $0x90] sm:$0xff] }
 0xa24   : > { %v14542_v56 = vpack.c.bf16 %v8018_v58, %v7478_v43  ;;  %v8558_v43 = vld [vmem:[#allocation2 + $0xa0] sm:$0xff] }
 0xa2a   : > { %11900 = vmatmul.mubr.msk.bf16.vlgmr.msra.gmra.mrb[8].mxu0 %vm6980_vm7, %v14417_v22 }
 0xa2b   : > { %11903 = vmatprep.mubr.msk.bf16.mxu0 %vm6980_vm7, %v14422_v25  ;;  %11908 = vmatpush3.bf16.msra.mxu0 %v7396_v28  ;;  %v12900_v28 = vld [vmem:[%s14835_s28 + $0x68] sm:$0x1f]  }
 0xa2c   : > { %12801 = vmatprep.subr.msk.bf16.mxu0 %vm6993_vm6, %v12892_v0  ;;  %v8126_v0 = vld [vmem:[#allocation2 + $0x91] sm:$0xff] }
 0xa2d   : > { %v14555_v14 = vpack.c.bf16 %v8126_v0, %v7586_v47  ;;  %v12906_v47 = vld [vmem:[%s14835_s28 + $0x98] sm:$0x1f]  }
 0xa32   : > { %11904 = vmatmul.mubr.msk.bf16.gmra.mrb[12].mxu0 %vm6980_vm7, %v14432_v33 }
 0xa33   : > { %11909 = vmatprep.mubr.msk.bf16.mxu0 %vm6980_vm7, %v7371_v20  ;;  %v14568_v20 = vpack.c.bf16 %v8234_v35, %v7694_v6  ;;  %v12908_v6 = vld [vmem:[%s14835_s28 + $0xa8] sm:$0x1f]  }
 0xa3a   : > { %11910 = vmatmul.mubr.msk.bf16.vlgmr.msra.gmra.mrb[8].mxu0 %vm6980_vm7, %v14438_v9 }
 0xa3b   : > { %11913 = vmatprep.mubr.msk.bf16.mxu0 %vm6980_vm7, %v14444_v41  ;;  %11918 = vmatpush3.bf16.msra.mxu0 %v7504_v17  ;;  %v8342_v17 = vld [vmem:[#allocation2 + $0x93] sm:$0xff] }
 0xa3c   : > { %12802 = vmatprep.subr.msk.bf16.mxu0 %vm6993_vm6, %v12893_v49  ;;  %v14581_v49 = vpack.c.bf16 %v8342_v17, %v7802_v44 }
 0xa42   : > { %11914 = vmatmul.mubr.msk.bf16.gmra.mrb[12].mxu0 %vm6980_vm7, %v14452_v38 }
 0xa43   : > { %11919 = vmatprep.mubr.msk.bf16.mxu0 %vm6980_vm7, %v7479_v26  ;;  %v8450_v26 = vld [vmem:[#allocation2 + $0x94] sm:$0xff] }
 0xa4a   : > { %11920 = vmatmul.mubr.msk.bf16.vlgmr.msra.gmra.mrb[8].mxu0 %vm6980_vm7, %v14460_v19 }
 0xa4b   : > { %11923 = vmatprep.mubr.msk.bf16.mxu0 %vm6980_vm7, %v14465_v32  ;;  %11928 = vmatpush3.bf16.msra.mxu0 %v7612_v37  ;;  %v14594_v37 = vpack.c.bf16 %v8450_v26, %v7910_v60 }
 0xa4c   : > { %12803 = vmatprep.subr.msk.bf16.mxu0 %vm6993_vm6, %v12894_v55  ;;  %v12904_v55 = vld [vmem:[%s14835_s28 + $0x88] sm:$0x1f]  }
 0xa52   : > { %11924 = vmatmul.mubr.msk.bf16.gmra.mrb[12].mxu0 %vm6980_vm7, %v14472_v45 }
 0xa53   : > { %11929 = vmatprep.mubr.msk.bf16.mxu0 %vm6980_vm7, %v7587_v23  ;;  %v8562_v23 = vpack.c.bf16 %v8558_v43, %v8018_v58 }
 0xa5a   : > { %11930 = vmatmul.mubr.msk.bf16.vlgmr.msra.gmra.mrb[8].mxu0 %vm6980_vm7, %v14318_v46 }
 0xa5b   : > { %11933 = vmatprep.mubr.msk.bf16.mxu0 %vm6980_vm7, %v14344_v53  ;;  %11938 = vmatpush3.bf16.msra.mxu0 %v7720_v52  ;;  %v12905_v52 = vld [vmem:[%s14835_s28 + $0x90] sm:$0x1f]  }
 0xa5c   : > { %12804 = vmatprep.subr.msk.bf16.mxu0 %vm6993_vm6, %v12895_v1  ;;  %v9658_v1 = vld [vmem:[%s14837_s10] sm:$0xf] }
 0xa5d   : > { %12821 = vmatprep.subr.msk.bf16.mxu1 %vm3711_vm4, %v9658_v1 }
 0xa62   : > { %11934 = vmatmul.mubr.msk.bf16.gmra.mrb[12].mxu0 %vm6980_vm7, %v14487_v27 }
 0xa63   : > { %11939 = vmatprep.mubr.msk.bf16.mxu0 %vm6980_vm7, %v7695_v50  ;;  %v9016_v50 = vsel %vm6993_vm6, %v12906_v47, 0 }
 0xa6a   : > { %11940 = vmatmul.mubr.msk.bf16.vlgmr.msra.gmra.mrb[8].mxu0 %vm6980_vm7, %v14321_v57 }
 0xa6b   : > { %11943 = vmatprep.mubr.msk.bf16.mxu0 %vm6980_vm7, %v14346_v54  ;;  %11948 = vmatpush3.bf16.msra.mxu0 %v7828_v10  ;;  %v12907_v10 = vld [vmem:[%s14835_s28 + $0xa0] sm:$0x1f]  }
 0xa6c   : > { %12805 = vmatprep.subr.msk.bf16.mxu0 %vm6993_vm6, %v12896_v12 }
 0xa72   : > { %11944 = vmatmul.mubr.msk.bf16.gmra.mrb[12].mxu0 %vm6980_vm7, %v14502_v29 }
 0xa73   : > { %11949 = vmatprep.mubr.msk.bf16.mxu0 %vm6980_vm7, %v7803_v36  ;;  %v12909_v36 = vld [vmem:[%s14835_s28 + $0xb0] sm:$0x1f]  }
 0xa7a   : > { %11950 = vmatmul.mubr.msk.bf16.vlgmr.msra.gmra.mrb[8].mxu0 %vm6980_vm7, %v14329_v2 }
 0xa7b   : > { %11953 = vmatprep.mubr.msk.bf16.mxu0 %vm6980_vm7, %v14351_v3  ;;  %11958 = vmatpush3.bf16.msra.mxu0 %v7936_v11 }
 0xa7c   : > { %12806 = vmatprep.subr.msk.bf16.mxu0 %vm6993_vm6, %v12897_v62  ;;  %v12910_v62 = vld [vmem:[%s14835_s28 + $0xb8] sm:$0x1f]  }
 0xa82   : > { %11954 = vmatmul.mubr.msk.bf16.gmra.mrb[12].mxu0 %vm6980_vm7, %v14516_v63 }
 0xa83   : > { %11959 = vmatprep.mubr.msk.bf16.mxu0 %vm6980_vm7, %v7911_v15 }
 0xa8a   : > { %11960 = vmatmul.mubr.msk.bf16.vlgmr.msra.gmra.mrb[8].mxu0 %vm6980_vm7, %v14335_v39 }
 0xa8b   : > { %11963 = vmatprep.mubr.msk.bf16.mxu0 %vm6980_vm7, %v14355_v40  ;;  %11968 = vmatpush3.bf16.msra.mxu0 %v8044_v61 }
 0xa8c   : > { %12807 = vmatprep.subr.msk.bf16.mxu0 %vm6993_vm6, %v12898_v48  ;;  %v9758_v48 = vld [vmem:[%s14838_s7] sm:$0x3] }
 0xa8d   : > { %v9781_v60 = vsel %vm9779_vm9, %v9758_v48, 0 }
 0xa92   : > { %11964 = vmatmul.mubr.msk.bf16.gmra.mrb[12].mxu0 %vm6980_vm7, %v14529_v16 }
 0xa93   : > { %11969 = vmatprep.mubr.msk.bf16.mxu0 %vm6980_vm7, %v14370_v13  ;;  %v8260_v13 = vsel %vm6993_vm6, %v12899_v30, 0 }
 0xa9a   : > { %11970 = vmatmul.mubr.msk.bf16.vlgmr.msra.gmra.mrb[8].mxu0 %vm6980_vm7, %v14376_v31 }
 0xa9b   : > { %11973 = vmatprep.mubr.msk.bf16.mxu0 %vm6980_vm7, %v14384_v24  ;;  %11978 = vmatpush3.bf16.msra.mxu0 %v8152_v7 }
 0xa9c   : > { %12808 = vmatprep.subr.msk.bf16.mxu0 %vm6993_vm6, %v12899_v30 }
 0xaa2   : > { %11974 = vmatmul.mubr.msk.bf16.gmra.mrb[12].mxu0 %vm6980_vm7, %v14542_v56 }
 0xaa3   : > { %11979 = vmatprep.mubr.msk.bf16.mxu0 %vm6980_vm7, %v14307_v51  ;;  %v8368_v51 = vsel %vm6993_vm6, %v12900_v28, 0 }
 0xaaa   : > { %11980 = vmatmul.mubr.msk.bf16.vlgmr.msra.gmra.mrb[8].mxu0 %vm6980_vm7, %v14303_v5 }
 0xaab   : > { %11983 = vmatprep.mubr.msk.bf16.mxu0 %vm6980_vm7, %v14358_v4  ;;  %11988 = vmatpush3.bf16.msra.mxu0 %v8260_v13 }
 0xaac   : > { %12809 = vmatprep.subr.msk.bf16.mxu0 %vm6993_vm6, %v12900_v28 }
 0xab2   : > { %11984 = vmatmul.mubr.msk.bf16.gmra.mrb[12].mxu0 %vm6980_vm7, %v14555_v14 }
 0xab3   : > { %11989 = vmatprep.mubr.msk.bf16.mxu0 %vm6980_vm7, %v14392_v59  ;;  %v8476_v59 = vsel %vm6993_vm6, %v12901_v42, 0 }
 0xaba   : > { %11990 = vmatmul.mubr.msk.bf16.vlgmr.msra.gmra.mrb[8].mxu0 %vm6980_vm7, %v14397_v34 }
 0xabb   : > { %11993 = vmatprep.mubr.msk.bf16.mxu0 %vm6980_vm7, %v14408_v18  ;;  %11998 = vmatpush3.bf16.msra.mxu0 %v8368_v51 }
 0xabc   : > { %12810 = vmatprep.subr.msk.bf16.mxu0 %vm6993_vm6, %v12901_v42 }
 0xac2   : > { %11994 = vmatmul.mubr.msk.bf16.gmra.mrb[12].mxu0 %vm6980_vm7, %v14568_v20 }
 0xac3   : > { %11999 = vmatprep.mubr.msk.bf16.mxu0 %vm6980_vm7, %v14417_v22  ;;  %v8584_v22 = vsel %vm6993_vm6, %v12902_v8, 0 }
 0xaca   : > { %12000 = vmatmul.mubr.msk.bf16.vlgmr.msra.gmra.mrb[8].mxu0 %vm6980_vm7, %v14422_v25 }
 0xacb   : > { %12003 = vmatprep.mubr.msk.bf16.mxu0 %vm6980_vm7, %v14432_v33  ;;  %12008 = vmatpush3.bf16.msra.mxu0 %v8476_v59 }
 0xacc   : > { %12811 = vmatprep.subr.msk.bf16.mxu0 %vm6993_vm6, %v12902_v8 }
 0xad2   : > { %12004 = vmatmul.mubr.msk.bf16.gmra.mrb[12].mxu0 %vm6980_vm7, %v14581_v49 }
 0xad3   : > { %12009 = vmatprep.mubr.msk.bf16.mxu0 %vm6980_vm7, %v14438_v9  ;;  %v8692_v9 = vsel %vm6993_vm6, %v12903_v21, 0 }
 0xada   : > { %12010 = vmatmul.mubr.msk.bf16.vlgmr.msra.gmra.mrb[8].mxu0 %vm6980_vm7, %v14444_v41 }
 0xadb   : > { %12013 = vmatprep.mubr.msk.bf16.mxu0 %vm6980_vm7, %v14452_v38  ;;  %12018 = vmatpush3.bf16.msra.mxu0 %v8584_v22 }
 0xadc   : > { %12812 = vmatprep.subr.msk.bf16.mxu0 %vm6993_vm6, %v12903_v21 }
 0xae2   : > { %12014 = vmatmul.mubr.msk.bf16.gmra.mrb[12].mxu0 %vm6980_vm7, %v14594_v37 }
 0xae3   : > { %12019 = vmatprep.mubr.msk.bf16.mxu0 %vm6980_vm7, %v14460_v19  ;;  %v8800_v19 = vsel %vm6993_vm6, %v12904_v55, 0 }
 0xaea   : > { %12020 = vmatmul.mubr.msk.bf16.vlgmr.msra.gmra.mrb[8].mxu0 %vm6980_vm7, %v14465_v32  ;;  %v8666_v32 = vld [vmem:[#allocation2 + $0xa1] sm:$0xff] }
 0xaeb   : > { %12023 = vmatprep.mubr.msk.bf16.mxu0 %vm6980_vm7, %v14472_v45  ;;  %12028 = vmatpush3.bf16.msra.mxu0 %v8692_v9  ;;  %v8670_v45 = vpack.c.bf16 %v8666_v32, %v8126_v0 }
 0xaec   : > { %12813 = vmatprep.subr.msk.bf16.mxu0 %vm6993_vm6, %v12904_v55 }
 0xaf2   : > { %12024 = vmatmul.mubr.msk.bf16.gmra.mrb[12].mxu0 %vm6980_vm7, %v8562_v23 }
 0xaf3   : > { %12029 = vmatprep.mubr.msk.bf16.mxu0 %vm6980_vm7, %v14318_v46  ;;  %v9679_v46 = vsel %vm3711_vm4, %v9658_v1, 0 }
 0xaf4   : > { %12118 = vmatpush3.bf16.msra.mxu1 %v9679_v46 }
 0xaf5   : > { %12822 = vmatprep.subr.msk.bf16.mxu1 %vm9779_vm9, %v9758_v48 }
 0xafa   : > { %12030 = vmatmul.mubr.msk.bf16.vlgmr.msra.gmra.mrb[8].mxu0 %vm6980_vm7, %v14344_v53  ;;  %v8908_v53 = vsel %vm6993_vm6, %v12905_v52, 0 }
 0xafb   : > { %12033 = vmatprep.mubr.msk.bf16.mxu0 %vm6980_vm7, %v14487_v27  ;;  %12038 = vmatpush3.bf16.msra.mxu0 %v8800_v19  ;;  %v8774_v27 = vld [vmem:[#allocation2 + $0xa2] sm:$0xff] }
 0xafc   : > { %12814 = vmatprep.subr.msk.bf16.mxu0 %vm6993_vm6, %v12905_v52 }
 0xb02   : > { %12034 = vmatmul.mubr.msk.bf16.gmra.mrb[12].mxu0 %vm6980_vm7, %v8670_v45  ;;  %v10813_v45 = vld [vmem:[%s14841_s0] ss:$0 sm:$0xff] }
 0xb03   : > { %12039 = vmatprep.mubr.msk.bf16.mxu0 %vm6980_vm7, %v14321_v57  ;;  %v8778_v57 = vpack.c.bf16 %v8774_v27, %v8234_v35 }
 0xb0a   : > { %12040 = vmatmul.mubr.msk.bf16.vlgmr.msra.gmra.mrb[8].mxu0 %vm6980_vm7, %v14346_v54  ;;  %v8882_v54 = vld [vmem:[#allocation2 + $0xa3] sm:$0xff] }
 0xb0b   : > { %12043 = vmatprep.mubr.msk.bf16.mxu0 %vm6980_vm7, %v14502_v29  ;;  %12048 = vmatpush3.bf16.msra.mxu0 %v8908_v53  ;;  %v8886_v12 = vpack.c.bf16 %v8882_v54, %v8342_v17 }
 0xb0c   : > { %12815 = vmatprep.subr.msk.bf16.mxu0 %vm6993_vm6, %v12906_v47 }
 0xb12   : > { %12044 = vmatmul.mubr.msk.bf16.gmra.mrb[12].mxu0 %vm6980_vm7, %v8778_v57 }
 0xb13   : > { %12049 = vmatprep.mubr.msk.bf16.mxu0 %vm6980_vm7, %v14329_v2  ;;  %v9124_v2 = vsel %vm6993_vm6, %v12907_v10, 0 }
 0xb1a   : > { %12050 = vmatmul.mubr.msk.bf16.vlgmr.msra.gmra.mrb[8].mxu0 %vm6980_vm7, %v14351_v3  ;;  %v8990_v3 = vld [vmem:[#allocation2 + $0xa4] sm:$0xff] }
 0xb1b   : > { %12053 = vmatprep.mubr.msk.bf16.mxu0 %vm6980_vm7, %v14516_v63  ;;  %12058 = vmatpush3.bf16.msra.mxu0 %v9016_v50  ;;  %v8994_v29 = vpack.c.bf16 %v8990_v3, %v8450_v26  ;;  %v12911_v63 = vld [vmem:[%s14835_s28 + $0xc0] sm:$0x1f]  }
 0xb1c   : > { %12816 = vmatprep.subr.msk.bf16.mxu0 %vm6993_vm6, %v12907_v10 }
 0xb22   : > { %12054 = vmatmul.mubr.msk.bf16.gmra.mrb[12].mxu0 %vm6980_vm7, %v8886_v12 }
 0xb23   : > { %12059 = vmatprep.mubr.msk.bf16.mxu0 %vm6980_vm7, %v14335_v39  ;;  %v9232_v39 = vsel %vm6993_vm6, %v12908_v6, 0 }
 0xb2a   : > { %12060 = vmatmul.mubr.msk.bf16.vlgmr.msra.gmra.mrb[8].mxu0 %vm6980_vm7, %v14355_v40  ;;  %v9098_v40 = vld [vmem:[#allocation2 + $0xb0] sm:$0xff] }
 0xb2b   : > { %12063 = vmatprep.mubr.msk.bf16.mxu0 %vm6980_vm7, %v14529_v16  ;;  %12068 = vmatpush3.bf16.msra.mxu0 %v9124_v2  ;;  %v9102_v11 = vpack.c.bf16 %v9098_v40, %v8558_v43  ;;  %v10812_v16 = vld [vmem:[%s14839_s11] ss:$0 sm:$0xff] }
 0xb2c   : > { %12817 = vmatprep.subr.msk.bf16.mxu0 %vm6993_vm6, %v12908_v6 }
 0xb32   : > { %12064 = vmatmul.mubr.msk.bf16.gmra.mrb[12].mxu0 %vm6980_vm7, %v8994_v29 }
 0xb33   : > { %12069 = vmatprep.mubr.msk.bf16.mxu0 %vm6980_vm7, %v14376_v31  ;;  %v9340_v31 = vsel %vm6993_vm6, %v12909_v36, 0 }
 0xb3a   : > { %12070 = vmatmul.mubr.msk.bf16.vlgmr.msra.gmra.mrb[8].mxu0 %vm6980_vm7, %v14384_v24  ;;  %v9206_v24 = vld [vmem:[#allocation2 + $0xb1] sm:$0xff] }
 0xb3b   : > { %12073 = vmatprep.mubr.msk.bf16.mxu0 %vm6980_vm7, %v14542_v56  ;;  %12078 = vmatpush3.bf16.msra.mxu0 %v9232_v39  ;;  %v9210_v44 = vpack.c.bf16 %v9206_v24, %v8666_v32  ;;  %v9932_v32 = vld [vmem:[%s14840_s15] sm:$0xf] }
 0xb3c   : > { %12818 = vmatprep.subr.msk.bf16.mxu0 %vm6993_vm6, %v12909_v36 }
 0xb42   : > { %12074 = vmatmul.mubr.msk.bf16.gmra.mrb[12].mxu0 %vm6980_vm7, %v9102_v11  ;;  %v9941_v11 = vsel %vm3711_vm4, %v9932_v32, 0 }
 0xb43   : > { %12079 = vmatprep.mubr.msk.bf16.mxu0 %vm6980_vm7, %v14303_v5  ;;  %v9448_v5 = vsel %vm6993_vm6, %v12910_v62, 0 }
 0xb4a   : > { %12080 = vmatmul.mubr.msk.bf16.vlgmr.msra.gmra.mrb[8].mxu0 %vm6980_vm7, %v14358_v4  ;;  %v9314_v4 = vld [vmem:[#allocation2 + $0xb2] sm:$0xff] }
 0xb4b   : > { %12083 = vmatprep.mubr.msk.bf16.mxu0 %vm6980_vm7, %v14555_v14  ;;  %12088 = vmatpush3.bf16.msra.mxu0 %v9340_v31  ;;  %v9318_v15 = vpack.c.bf16 %v9314_v4, %v8774_v27 }
 0xb4c   : > { %12819 = vmatprep.subr.msk.bf16.mxu0 %vm6993_vm6, %v12910_v62 }
 0xb52   : > { %12084 = vmatmul.mubr.msk.bf16.gmra.mrb[12].mxu0 %vm6980_vm7, %v9210_v44 }
 0xb53   : > { %12089 = vmatprep.mubr.msk.bf16.mxu0 %vm6980_vm7, %v14397_v34  ;;  %v9556_v34 = vsel %vm6993_vm6, %v12911_v63, 0 }
 0xb5a   : > { %12090 = vmatmul.mubr.msk.bf16.vlgmr.msra.gmra.mrb[8].mxu0 %vm6980_vm7, %v14408_v18  ;;  %v9422_v18 = vld [vmem:[#allocation2 + $0xb3] sm:$0xff] }
 0xb5b   : > { %12093 = vmatprep.mubr.msk.bf16.mxu0 %vm6980_vm7, %v14568_v20  ;;  %12098 = vmatpush3.bf16.msra.mxu0 %v9448_v5  ;;  %v9426_v61 = vpack.c.bf16 %v9422_v18, %v8882_v54 }
 0xb5c   : > { %12820 = vmatprep.subr.msk.bf16.mxu0 %vm6993_vm6, %v12911_v63 }
 0xb62   : > { %12094 = vmatmul.mubr.msk.bf16.gmra.mrb[12].mxu0 %vm6980_vm7, %v9318_v15 }
 0xb63   : > { %12099 = vmatprep.mubr.msk.bf16.mxu0 %vm6980_vm7, %v14422_v25  ;;  %v9530_v25 = vld [vmem:[#allocation2 + $0xb4] sm:$0xff] }
 0xb6a   : > { %12100 = vmatmul.mubr.msk.bf16.vlgmr.msra.gmra.mrb[8].mxu0 %vm6980_vm7, %v14432_v33  ;;  %v9534_v33 = vpack.c.bf16 %v9530_v25, %v8990_v3  ;;  %v12912_v25 = vld [vmem:[%s14842_s18] sm:$0xff]  }
 0xb6b   : > { %12103 = vmatprep.mubr.msk.bf16.mxu0 %vm6980_vm7, %v14581_v49  ;;  %12108 = vmatpush3.bf16.msra.mxu0 %v9556_v34 }
 0xb72   : > { %12104 = vmatmul.mubr.msk.bf16.gmra.mrb[12].mxu0 %vm6980_vm7, %v9426_v61 }
 0xb73   : > { %12109 = vmatprep.mubr.msk.bf16.mxu0 %vm6980_vm7, %v14444_v41 }
 0xb7a   : > { %12110 = vmatmul.mubr.msk.bf16.vlgmr.msra.gmra.mrb[8].mxu0 %vm6980_vm7, %v14452_v38 }
 0xb7b   : > { %12113 = vmatprep.mubr.msk.bf16.mxu0 %vm6980_vm7, %v14594_v37 }
 0xb82   : > { %12114 = vmatmul.mubr.msk.bf16.gmra.mrb[12].mxu0 %vm6980_vm7, %v9534_v33 }
 0xc4d   : > { %v12111_v7 = vpop.f32.mrb[8].mxu0 }
 0xc4e   : > { %v9640_v30 = vadd.f32 %v12111_v7, %v10812_v16  ;;  %v9592_v58 = vpop.f32.mrb[9].mxu0  ;;  %v10818_v7 = vld [vmem:[#allocation3] ss:$0 sm:$0xff] }
 0xc4f   : > { %v9638_v56 = vadd.f32 %v10812_v16, %v9592_v58  ;;  %v12112_v41 = vpop.f32.mrb[10].mxu0 }
 0xc50   : > { %v9641_v13 = vadd.f32 %v12112_v41, %v10812_v16  ;;  %v9595_v28 = vpop.f32.mrb[11].mxu0  ;;  %v9648_v0 = vmax.f32 %v9640_v30, 0.0 }
 0xc51   : > { %v9639_v38 = vadd.f32 %v10812_v16, %v9595_v28  ;;  %v9646_v51 = vmax.f32 %v9638_v56, 0.0 }
 0xc52   : > { %v9649_v14 = vmax.f32 %v9641_v13, 0.0 }
 0xc53   : > { %v9647_v42 = vmax.f32 %v9639_v38, 0.0 }
 0xc54   : > { %v9655_v35 = vpack.c.bf16 %v9649_v14, %v9648_v0 }
 0xc55   : > { %v9654_v20 = vpack.c.bf16 %v9647_v42, %v9646_v51  ;;  %v12115_v59 = vpop.f32.mrb[12].mxu0 }
 0xc56   : > { %v9644_v8 = vadd.f32 %v12115_v59, %v10812_v16  ;;  %v9608_v17 = vpop.f32.mrb[13].mxu0 }
 0xc57   : > { %v9642_v49 = vadd.f32 %v10812_v16, %v9608_v17  ;;  %v12116_v22 = vpop.f32.mrb[14].mxu0  ;;  %12119 = vmatprep.mubr.msk.bf16.mxu1 %vm3663_vm5, %v9654_v20 }
 0xc58   : > { %v9645_v21 = vadd.f32 %v12116_v22, %v10812_v16  ;;  %v9611_v26 = vpop.f32.mrb[15].mxu0  ;;  %12120 = vmatmul.mubr.msk.bf16.vlgmr.msra.gmra.mrb[64].mxu1 %vm3663_vm5, %v9655_v35  ;;  %v9652_v9 = vmax.f32 %v9644_v8, 0.0 }
 0xc59   : > { %v9643_v37 = vadd.f32 %v10812_v16, %v9611_v26  ;;  %12128 = vmatpush3.bf16.msra.mxu1 %v9781_v60  ;;  %v9650_v43 = vmax.f32 %v9642_v49, 0.0 }
 0xc5a   : > { %v9653_v55 = vmax.f32 %v9645_v21, 0.0  ;;  %12823 = vmatprep.subr.msk.bf16.mxu1 %vm3711_vm4, %v9932_v32 }
 0xc5b   : > { %v9651_v23 = vmax.f32 %v9643_v37, 0.0 }
 0xc5c   : > { %v9657_v19 = vpack.c.bf16 %v9653_v55, %v9652_v9 }
 0xc5d   : > { %v9656_v52 = vpack.c.bf16 %v9651_v23, %v9650_v43  ;;  %v10823_v43 = vld [vmem:[#allocation4] ss:$0 sm:$0xff] }
 0xc5f   : > { %12123 = vmatprep.mubr.msk.bf16.mxu1 %vm3663_vm5, %v9656_v52 }
 0xc60   : > { %12124 = vmatmul.mubr.msk.bf16.gmra.mrb[68].mxu1 %vm3663_vm5, %v9657_v19 }
 0xd2b   : > { %v12121_v1 = vpop.f32.mrb[64].mxu1 }
 0xd2c   : > { %v9724_v46 = vadd.f32 %v12121_v1, %v10813_v45  ;;  %v9715_v53 = vpop.f32.mrb[65].mxu1 }
 0xd2d   : > { %v9716_v47 = vadd.f32 %v10813_v45, %v9715_v53  ;;  %v12122_v27 = vpop.f32.mrb[66].mxu1 }
 0xd2e   : > { %v9727_v57 = vadd.f32 %v12122_v27, %v10813_v45  ;;  %v9718_v50 = vpop.f32.mrb[67].mxu1  ;;  %v9748_v54 = vmax.f32 %v9724_v46, 0.0 }
 0xd2f   : > { %v9719_v10 = vadd.f32 %v10813_v45, %v9718_v50  ;;  %v9746_v2 = vmax.f32 %v9716_v47, 0.0 }
 0xd30   : > { %v9749_v12 = vmax.f32 %v9727_v57, 0.0 }
 0xd31   : > { %v9747_v6 = vmax.f32 %v9719_v10, 0.0 }
 0xd32   : > { %v9755_v3 = vpack.c.bf16 %v9749_v12, %v9748_v54 }
 0xd33   : > { %v9754_v29 = vpack.c.bf16 %v9747_v6, %v9746_v2  ;;  %v12125_v39 = vpop.f32.mrb[68].mxu1 }
 0xd34   : > { %v9740_v36 = vadd.f32 %v12125_v39, %v10813_v45  ;;  %v9731_v40 = vpop.f32.mrb[69].mxu1 }
 0xd35   : > { %v9732_v31 = vadd.f32 %v10813_v45, %v9731_v40  ;;  %v12126_v62 = vpop.f32.mrb[70].mxu1  ;;  %12129 = vmatprep.mubr.msk.bf16.mxu1 %vm9766_vm10, %v9754_v29 }
 0xd36   : > { %v9743_v24 = vadd.f32 %v12126_v62, %v10813_v45  ;;  %v9734_v44 = vpop.f32.mrb[71].mxu1  ;;  %12130 = vmatmul.mubr.msk.bf16.vlgmr.msra.gmra.mrb[72].mxu1 %vm9766_vm10, %v9755_v3  ;;  %v9752_v63 = vmax.f32 %v9740_v36, 0.0 }
 0xd37   : > { %v9735_v5 = vadd.f32 %v10813_v45, %v9734_v44  ;;  %12138 = vmatpush3.bf16.msra.mxu1 %v9941_v11  ;;  %v9750_v15 = vmax.f32 %v9732_v31, 0.0 }
 0xd38   : > { %v9753_v4 = vmax.f32 %v9743_v24, 0.0 }
 0xd39   : > { %v9751_v34 = vmax.f32 %v9735_v5, 0.0 }
 0xd3a   : > { %v9757_v18 = vpack.c.bf16 %v9753_v4, %v9752_v63 }
 0xd3b   : > { %v9756_v61 = vpack.c.bf16 %v9751_v34, %v9750_v15 }
 0xd3d   : > { %12133 = vmatprep.mubr.msk.bf16.mxu1 %vm9766_vm10, %v9756_v61 }
 0xd3e   : > { %12134 = vmatmul.mubr.msk.bf16.gmra.mrb[76].mxu1 %vm9766_vm10, %v9757_v18 }
 0xd3f   : > { %12139 = vmatprep.mubr.msk.bf16.mxu1 %vm3663_vm5, %v9654_v20 }
 0xd46   : > { %12140 = vmatmul.mubr.msk.bf16.vlgmr.msra.gmra.mrb[80].mxu1 %vm3663_vm5, %v9655_v35 }
 0xd47   : > { %12143 = vmatprep.mubr.msk.bf16.mxu1 %vm3663_vm5, %v9656_v52 }
 0xd4e   : > { %12144 = vmatmul.mubr.msk.bf16.gmra.mrb[84].mxu1 %vm3663_vm5, %v9657_v19 }
 0xd4f   : > { %12155 = vmatprep.mubr.msk.bf16.mxu1 %vm10056_vm11, %v12912_v25 }
 0xe09   : > { %v12131_v33 = vpop.f32.mrb[72].mxu1 }
 0xe0a   : > { %v9817_v48 = vpop.f32.mrb[73].mxu1  ;;  %v14716_v30 = vadd.f32 %v12131_v33, %v10818_v7 }
 0xe0b   : > { %v12132_v60 = vpop.f32.mrb[74].mxu1  ;;  %v14718_v58 = vadd.f32 %v10818_v7, %v9817_v48 }
 0xe0c   : > { %v9820_v16 = vpop.f32.mrb[75].mxu1  ;;  %v14720_v41 = vadd.f32 %v12132_v60, %v10818_v7  ;;  %v9851_v51 = vsel %vm9848_vm12, %v14716_v30, -inf }
 0xe0d   : > { %v14724_v38 = vadd.f32 %v10818_v7, %v9820_v16  ;;  %v9849_v59 = vsel %vm9848_vm12, %v14718_v58, -inf }
 0xe0e   : > { %v9852_v22 = vsel %vm9848_vm12, %v14720_v41, -inf }
 0xe0f   : > { %v9850_v37 = vsel %vm9848_vm12, %v14724_v38, -inf }
 0xe11   : > { %v12135_v56 = vpop.f32.mrb[76].mxu1 }
 0xe12   : > { %v14722_v13 = vadd.f32 %v12135_v56, %v10818_v7  ;;  %v9833_v28 = vpop.f32.mrb[77].mxu1 }
 0xe13   : > { %v14726_v0 = vadd.f32 %v10818_v7, %v9833_v28  ;;  %v12136_v14 = vpop.f32.mrb[78].mxu1 }
 0xe14   : > { %v9857_v42 = vsel %vm9848_vm12, %v14722_v13, -inf  ;;  %v14732_v35 = vadd.f32 %v12136_v14, %v10818_v7  ;;  %v9836_v20 = vpop.f32.mrb[79].mxu1 }
 0xe15   : > { %v9858_v8 = vmax.f32 %v9851_v51, %v9857_v42  ;;  %v9853_v17 = vsel %vm9848_vm12, %v14726_v0, -inf  ;;  %v14738_v49 = vadd.f32 %v10818_v7, %v9836_v20 }
 0xe16   : > { %v9854_v21 = vmax.f32 %v9849_v59, %v9853_v17  ;;  %v9859_v26 = vsel %vm9848_vm12, %v14732_v35, -inf }
 0xe17   : > { %v9860_v9 = vmax.f32 %v9852_v22, %v9859_v26  ;;  %v9855_v55 = vsel %vm9848_vm12, %v14738_v49, -inf  ;;  %v12915_v22 = vld [vmem:[%s14842_s18 + $0x18] sm:$0xff]  }
 0xe18   : > { %v9856_v23 = vmax.f32 %v9850_v37, %v9855_v55 }
 0xe19   : > { %v9862_v19 = vmax.f32 %v9858_v8, %v9860_v9  ;;  %v12141_v52 = vpop.f32.mrb[80].mxu1 }
 0xe1a   : > { %v9861_v32 = vmax.f32 %v9854_v21, %v9856_v23  ;;  %v9986_v45 = vadd.f32 %v12141_v52, %v10823_v43  ;;  %v9977_v1 = vpop.f32.mrb[81].mxu1 }
 0xe1b   : > { %v9978_v46 = vadd.f32 %v10823_v43, %v9977_v1  ;;  %v12142_v53 = vpop.f32.mrb[82].mxu1 }
 0xe1c   : > { %v9863_v47 = vmax.f32 %v9861_v32, %v9862_v19  ;;  %v9989_v27 = vadd.f32 %v12142_v53, %v10823_v43  ;;  %v9980_v57 = vpop.f32.mrb[83].mxu1  ;;  %v10010_v54 = vmax.f32 %v9986_v45, 0.0 }
 0xe1d   : > { %v9981_v50 = vadd.f32 %v10823_v43, %v9980_v57  ;;  %v10008_v2 = vmax.f32 %v9978_v46, 0.0 }
 0xe1e   : > { %v9864_v10 = vrot.slane %v9863_v47, 4  ;;  %v10011_v12 = vmax.f32 %v9989_v27, 0.0 }
 0xe1f   : > { %v10009_v6 = vmax.f32 %v9981_v50, 0.0 }
 0xe20   : > { %v9865_v3 = vmax.f32 %v9863_v47, %v9864_v10  ;;  %v10025_v29 = vpack.c.bf16 %v10011_v12, %v10010_v54 }
 0xe21   : > { %v10024_v39 = vpack.c.bf16 %v10009_v6, %v10008_v2  ;;  %v12145_v36 = vpop.f32.mrb[84].mxu1 }
 0xe22   : > { %v9866_v40 = vrot.slane %v9865_v3, 2  ;;  %v10002_v11 = vadd.f32 %v12145_v36, %v10823_v43  ;;  %v9993_v31 = vpop.f32.mrb[85].mxu1 }
 0xe23   : > { %v9994_v62 = vadd.f32 %v10823_v43, %v9993_v31  ;;  %v12146_v24 = vpop.f32.mrb[86].mxu1  ;;  %12147 = vmatprep.subr.bf16.mxu1 %v10024_v39 }
 0xe24   : > { %v9867_v44 = vmax.f32 %v9865_v3, %v9866_v40  ;;  %v10005_v5 = vadd.f32 %v12146_v24, %v10823_v43  ;;  %v9996_v63 = vpop.f32.mrb[87].mxu1  ;;  %12148 = vmatpush3.bf16.msra.mxu1 %v10024_v39  ;;  %v10014_v34 = vmax.f32 %v10002_v11, 0.0 }
 0xe25   : > { %v9997_v4 = vadd.f32 %v10823_v43, %v9996_v63  ;;  %12149 = vmatprep.subr.bf16.mxu1 %v10025_v29  ;;  %v10012_v61 = vmax.f32 %v9994_v62, 0.0 }
 0xe26   : > { %v9868_v15 = vrot.slane %v9867_v44, 1  ;;  %v10015_v18 = vmax.f32 %v10005_v5, 0.0 }
 0xe27   : > { %v10013_v25 = vmax.f32 %v9997_v4, 0.0 }
 0xe28   : > { %v9869_v33 = vmax.f32 %v9867_v44, %v9868_v15  ;;  %v10027_v48 = vpack.c.bf16 %v10015_v18, %v10014_v34  ;;  %12150 = vmatpush3.bf16.msra.mxu1 %v10025_v29  ;;  %v10030_v18 = vld [vmem:[%s13109_s4 + $0x10] sm:$0xff] }
 0xe29   : > { %v10026_v60 = vpack.c.bf16 %v10013_v25, %v10012_v61  ;;  %v10028_v61 = vld [vmem:[%s13109_s4] sm:$0xff] }
 0xe2a   : > { %v9870_v16 = vsub.f32 %v14718_v58, %v9869_v33  ;;  %v9871_v7 = vsub.f32 %v14724_v38, %v9869_v33  ;;  %v9872_v56 = vsub.f32 %v14716_v30, %v9869_v33  ;;  %v9873_v28 = vsub.f32 %v14720_v41, %v9869_v33  ;;  %v12913_v41 = vld [vmem:[%s14842_s18 + $0x8] sm:$0xff]  }
 0xe2b   : > { %v9874_v14 = vsub.f32 %v14726_v0, %v9869_v33  ;;  %v9875_v51 = vsub.f32 %v14738_v49, %v9869_v33  ;;  %v9876_v42 = vsub.f32 %v14722_v13, %v9869_v33  ;;  %v9877_v20 = vsub.f32 %v14732_v35, %v9869_v33  ;;  %12151 = vmatprep.subr.bf16.mxu1 %v10026_v60  ;;  %v12914_v0 = vld [vmem:[%s14842_s18 + $0x10] sm:$0xff]   ;;  %v10031_v33 = vld [vmem:[%s13109_s4 + $0x18] sm:$0xff] }
 0xe2c   : > { %v9878_v59 = vmul.f32 1.442695, %v9870_v16  ;;  %v9880_v8 = vmul.f32 1.442695, %v9871_v7  ;;  %v9882_v58 = vmul.f32 1.442695, %v9872_v56  ;;  %12152 = vmatpush3.bf16.msra.mxu1 %v10026_v60 }
 0xe2d   : > { %v9884_v38 = vmul.f32 1.442695, %v9873_v28  ;;  %12153 = vmatprep.subr.bf16.mxu1 %v10027_v48  ;;  %v9886_v30 = vmul.f32 1.442695, %v9874_v14  ;;  %v9888_v17 = vmul.f32 1.442695, %v9875_v51 }
 0xe2e   : > { %12916 = vpow2.f32 %v9878_v59  ;;  %v14843_v13 = vmov 0.0   ;;  %v9890_v35 = vmul.f32 1.442695, %v9876_v42  ;;  %v9892_v49 = vmul.f32 1.442695, %v9877_v20  ;;  %v10029_v16 = vld [vmem:[%s13109_s4 + $0x8] sm:$0xff] }
 0xe2f   : > { %12918 = vpow2.f32 %v9880_v8 }
 0xe30   : > { %12920 = vpow2.f32 %v9882_v58  ;;  %12154 = vmatpush3.bf16.msra.mxu1 %v10027_v48  ;;  %v10034_v58 = vld [vmem:[%s13109_s4 + $0x30] sm:$0xff] }
 0xe31   : > { %12922 = vpow2.f32 %v9884_v38  ;;  %12163 = vmatprep.subr.bf16.mxu1 %v14843_v13 }
 0xe32   : > { %12924 = vpow2.f32 %v9886_v30  ;;  %v10032_v30 = vld [vmem:[%s13109_s4 + $0x20] sm:$0xff] }
 0xe33   : > { %12156 = vmatmul.mubr.msk.bf16.vlgmr.msra.gmra.mrb[88].mxu1 %vm10056_vm11, %v12913_v41  ;;  %12926 = vpow2.f32 %v9888_v17  ;;  %v10035_v17 = vld [vmem:[%s13109_s4 + $0x38] sm:$0xff] }
 0xe34   : > { %12159 = vmatprep.mubr.msk.bf16.mxu1 %vm10056_vm11, %v12914_v0  ;;  %12928 = vpow2.f32 %v9890_v35 }
 0xe35   : > { %12930 = vpow2.f32 %v9892_v49 }
 0xe38   : > { %v12917_v21 = vpop.eup %12916 }
 0xe39   : > { %v12919_v26 = vpop.eup %12918  ;;  %v9894_v37 = vsel %vm9848_vm12, %v12917_v21, 0.0 }
 0xe3a   : > { %v12921_v9 = vpop.eup %12920  ;;  %v9895_v55 = vsel %vm9848_vm12, %v12919_v26, 0.0 }
 0xe3b   : > { %v12923_v43 = vpop.eup %12922  ;;  %v9896_v23 = vadd.f32 %v9895_v55, %v9894_v37  ;;  %12160 = vmatmul.mubr.msk.bf16.gmra.mrb[92].mxu1 %vm10056_vm11, %v12915_v22  ;;  %v9897_v19 = vsel %vm9848_vm12, %v12921_v9, 0.0  ;;  %v10033_v22 = vld [vmem:[%s13109_s4 + $0x28] sm:$0xff] }
 0xe3c   : > { %v12925_v52 = vpop.eup %12924  ;;  %v9899_v45 = vsel %vm9848_vm12, %v12923_v43, 0.0  ;;  %12171 = vmatprep.mubr.msk.bf16.mxu1 %vm12977_vm13, %v14843_v13 }
 0xe3d   : > { %v9898_v32 = vadd.f32 %v9897_v19, %v9896_v23  ;;  %v12927_v1 = vpop.eup %12926  ;;  %v9901_v53 = vsel %vm9848_vm12, %v12925_v52, 0.0 }
 0xe3e   : > { %v12929_v47 = vpop.eup %12928  ;;  %v9903_v57 = vsel %vm9848_vm12, %v12927_v1, 0.0 }
 0xe3f   : > { %v9900_v46 = vadd.f32 %v9899_v45, %v9898_v32  ;;  %v12931_v50 = vpop.eup %12930  ;;  %v9905_v54 = vsel %vm9848_vm12, %v12929_v47, 0.0 }
 0xe40   : > { %v9907_v2 = vsel %vm9848_vm12, %v12931_v50, 0.0 }
 0xe41   : > { %v9902_v27 = vadd.f32 %v9901_v53, %v9900_v46  ;;  %v10147_v46 = vld [vmem:[#allocation5] sm:$0x1] }
 0xe43   : > { %v9904_v10 = vadd.f32 %v9903_v57, %v9902_v27 }
 0xe45   : > { %v9906_v12 = vadd.f32 %v9905_v54, %v9904_v10 }
 0xe47   : > { %v9908_v6 = vadd.f32 %v9907_v2, %v9906_v12 }
 0xe49   : > { %v9909_v3 = vrot.slane %v9908_v6, 4 }
 0xe4b   : > { %v9910_v29 = vadd.f32 %v9909_v3, %v9908_v6 }
 0xe4d   : > { %v9911_v39 = vrot.slane %v9910_v29, 2 }
 0xe4f   : > { %v9912_v36 = vadd.f32 %v9911_v39, %v9910_v29 }
 0xe51   : > { %v9913_v40 = vrot.slane %v9912_v36, 1 }
 0xe53   : > { %v9914_v11 = vadd.f32 %v9913_v40, %v9912_v36 }
 0xe55   : > { %12932 = vrcp.f32 %v9914_v11 }
 0xe5f   : > { %v12933_v31 = vpop.eup %12932 }
 0xe60   : > { %v9916_v62 = vmul.f32 %v12933_v31, %v12917_v21  ;;  %v9917_v24 = vmul.f32 %v12933_v31, %v12919_v26  ;;  %v9918_v44 = vmul.f32 %v12933_v31, %v12921_v9  ;;  %v9919_v5 = vmul.f32 %v12933_v31, %v12923_v43 }
 0xe61   : > { %v9920_v63 = vmul.f32 %v12933_v31, %v12925_v52  ;;  %v9921_v4 = vmul.f32 %v12933_v31, %v12927_v1  ;;  %v9922_v15 = vmul.f32 %v12933_v31, %v12929_v47  ;;  %v9923_v34 = vmul.f32 %v12933_v31, %v12931_v50  ;;  %v10142_v1 = vld [vmem:[%s14844_s30] sm:$0x1] }
 0xe62   : > { %9924 = vst.msk [vmem:[%s942_s23] sm:$0xff] %vm9848_vm12, %v9916_v62  ;;  %9925 = vst.msk [vmem:[%s942_s23 + $0x8] sm:$0xff] %vm9848_vm12, %v9917_v24 }
 0xe63   : > { %9926 = vst.msk [vmem:[%s942_s23 + $0x10] sm:$0xff] %vm9848_vm12, %v9918_v44  ;;  %9927 = vst.msk [vmem:[%s942_s23 + $0x18] sm:$0xff] %vm9848_vm12, %v9919_v5 }
 0xe64   : > { %9928 = vst.msk [vmem:[%s942_s23 + $0x20] sm:$0xff] %vm9848_vm12, %v9920_v63  ;;  %9929 = vst.msk [vmem:[%s942_s23 + $0x28] sm:$0xff] %vm9848_vm12, %v9921_v4 }
 0xe65   : > { %9930 = vst.msk [vmem:[%s942_s23 + $0x30] sm:$0xff] %vm9848_vm12, %v9922_v15  ;;  %9931 = vst.msk [vmem:[%s942_s23 + $0x38] sm:$0xff] %vm9848_vm12, %v9923_v34 }
 0xf06   : > { %v12157_v25 = vpop.f32.mrb[88].mxu1 }
 0xf07   : > { %v10112_v48 = vadd.f32 %v12157_v25, %v10030_v18  ;;  %v10103_v60 = vpop.f32.mrb[89].mxu1 }
 0xf08   : > { %v10104_v7 = vadd.f32 %v10103_v60, %v10028_v61  ;;  %v12158_v56 = vpop.f32.mrb[90].mxu1 }
 0xf09   : > { %v10115_v28 = vadd.f32 %v12158_v56, %v10031_v33  ;;  %v10106_v14 = vpop.f32.mrb[91].mxu1  ;;  %v10136_v42 = vmax.f32 %v10112_v48, 0.0 }
 0xf0a   : > { %v10107_v51 = vadd.f32 %v10106_v14, %v10029_v16  ;;  %v10134_v59 = vmax.f32 %v10104_v7, 0.0 }
 0xf0b   : > { %v10137_v20 = vmax.f32 %v10115_v28, 0.0 }
 0xf0c   : > { %v10135_v8 = vmax.f32 %v10107_v51, 0.0 }
 0xf0d   : > { %v10144_v38 = vpack.c.bf16 %v10137_v20, %v10136_v42 }
 0xf0e   : > { %v10143_v41 = vpack.c.bf16 %v10135_v8, %v10134_v59  ;;  %v12161_v0 = vpop.f32.mrb[92].mxu1 }
 0xf0f   : > { %v10128_v35 = vadd.f32 %v12161_v0, %v10034_v58  ;;  %v10119_v49 = vpop.f32.mrb[93].mxu1 }
 0xf10   : > { %v10120_v21 = vadd.f32 %v10119_v49, %v10032_v30  ;;  %v12162_v26 = vpop.f32.mrb[94].mxu1  ;;  %12164 = vmatpush3.bf16.msra.mxu1 %v10143_v41 }
 0xf11   : > { %v10131_v37 = vadd.f32 %v12162_v26, %v10035_v17  ;;  %v10122_v9 = vpop.f32.mrb[95].mxu1  ;;  %12165 = vmatprep.subr.bf16.mxu1 %v14843_v13  ;;  %v10140_v43 = vmax.f32 %v10128_v35, 0.0 }
 0xf12   : > { %v10123_v55 = vadd.f32 %v10122_v9, %v10033_v22  ;;  %v10138_v19 = vmax.f32 %v10120_v21, 0.0 }
 0xf13   : > { %v10141_v23 = vmax.f32 %v10131_v37, 0.0 }
 0xf14   : > { %v10139_v52 = vmax.f32 %v10123_v55, 0.0  ;;  %12166 = vmatpush3.bf16.msra.mxu1 %v10144_v38 }
 0xf15   : > { %v10146_v32 = vpack.c.bf16 %v10141_v23, %v10140_v43  ;;  %12167 = vmatprep.subr.bf16.mxu1 %v14843_v13 }
 0xf16   : > { %v10145_v45 = vpack.c.bf16 %v10139_v52, %v10138_v19 }
 0xf18   : > { %12168 = vmatpush3.bf16.msra.mxu1 %v10145_v45 }
 0xf19   : > { %12169 = vmatprep.subr.bf16.mxu1 %v14843_v13 }
 0xf1c   : > { %12170 = vmatpush3.bf16.msra.mxu1 %v10146_v32 }
 0xf1f   : > { %12172 = vmatmul.mubr.msk.bf16.vlgmr.msra.gmra.mrb[96].mxu1 %vm10056_vm11, %v10142_v1 }
 0xff2   : > { %v10185_v53 = vpop.f32.mrb[96].mxu1 }
 0xff3   : > { %v10186_v47 = vadd.f32 %v10185_v53, %v10147_v46  ;;  %v12173_v27 = vpop.f32.mrb[97].mxu1 }
 0xff4   : > { %v10188_v57 = vpop.f32.mrb[98].mxu1 }
 0xff5   : > { %12934 = vtanh.f32 %v10186_v47  ;;  %v12174_v50 = vpop.f32.mrb[99].mxu1 }
 0xfff   : > { %v12935_v10 = vpop.eup %12934 }
0x1000   : > { %10193 = vst.msk [vmem:[%s945_s26] sm:$0x1] %vm10192_vm14, %v12935_v10 }
0x1001 PF: > { %s78_s16 = sadd.s32 1, %s12943_s16  }
0x1002   : > { %p75_p4 = scmp.ge.s32.totalorder %s78_s16, 4  }
0x1004   :  { %77 = sbr.rel (!%p75_p4) target bundleno = 49 (0x31), region = 284 }

</bundles_post_ra>
